<compile_context>
chip_gen: v5e
topology: v5e:2x2
jax: 0.10.0
libtpu: 0.0.40
codegen_flags: <defaults>
</compile_context>

<pallas_src>
import math

import jax
import jax.numpy as jnp
from jax import lax
from jax.experimental import pallas as pl
from jax.experimental.pallas import tpu as pltpu

B = 2
C_IMG = 3
H = W = 16
HW = H * W
SMPL_DIM = 85                      # cam(3) + pose(72) + shape(10)
THETA_DIM = SMPL_DIM - 3
NV = 128                           # synthetic SMPL vertex count
NJ = 8                             # synthetic joint count
SIGMA2 = 0.05                      # splat bandwidth for the cond maps
NEG_INV_SIGMA2 = -1.0 / SIGMA2
BG_THRESH = SIGMA2 * math.log(2.0)  # min_d2 > sigma^2*ln2  <=>  max occupancy < 0.5
F32 = jnp.float32

# output-slab channel layout (all rows lane-dense, HW=256 wide)
_R_SYN = 0        # 3 rows : syn_img
_R_GBG = 3        # 3 rows : src_img * src_bg_mask
_R_GBG_M = 6      # 1 row  : src_bg_mask
_R_GSRC = 7       # 3 rows : src_img * (1 - src_crop_mask)
_R_GSRC_C = 10    # 3 rows : src_cond
_R_GTSF = 13      # 3 rows : syn_img
_R_GTSF_C = 16    # 3 rows : ref_cond
_R_CONDS = 19     # 6 rows : [src_cond, ref_cond]
_R_CROP_S = 25    # 1 row  : src_crop_mask
_R_CROP_T = 26    # 1 row  : tsf_crop_mask
_R_T = 27         # 2 rows : T (x, y)
N_SLAB = 29


def _erode_lane(m, y_idx, stages):
    """util.morph(mask, ks, 'erode') on a (1, H*W) row-major {0,1} mask, kept in lane layout.

    Pad-with-ones erosion (matches util.morph's F.pad(value=1.0) + conv == ks*ks), implemented
    as log-composed windowed mins with pltpu.roll: stages=(1,) -> ks=3, (1,2,4) -> ks=15.
    Row/array-boundary validity is derived by rolling the row-index constant alongside the data,
    so the result is independent of the roll sign convention and of circular wraparound.
    """
    for s in stages:                           # x-direction (within each 16-pixel image row)
        for sh in (s, HW - s):
            nb = pltpu.roll(m, sh, axis=1)
            ok = pltpu.roll(y_idx, sh, axis=1) == y_idx
            m = jnp.minimum(m, jnp.where(ok, nb, 1.0))
    for s in stages:                           # y-direction (across image rows, shift = s*W lanes)
        for sh in (s * W, HW - s * W):
            nb = pltpu.roll(m, sh, axis=1)
            ok = jnp.abs(pltpu.roll(y_idx, sh, axis=1) - y_idx) == float(s)
            m = jnp.minimum(m, jnp.where(ok, nb, 1.0))
    return m


# ---------------------------------------------------------------------------
# Fused per-batch kernel
# ---------------------------------------------------------------------------
def _brf_kernel(cam_ref, theta_ref, img_ref, pix_ref, wcid_ref, wrid_ref,
                blend_ref, templ_ref, jreg_ref,
                slab_ref, j2d_ref, vscr):
    # ---- HMR.get_details stand-in: linear SMPL decode, verts land on sublanes -------------
    # TODO(synk): the real HMR/SMPL LBS (rodrigues + blend skinning) is nonlinear; linear stand-in.
    cam = cam_ref[0]                                  # (3, 2)  rows [scale, tx, ty], cols [src, ref]
    theta = theta_ref[0]                              # (THETA_DIM, 2)
    vxy = jnp.dot(blend_ref[...], theta,
                  preferred_element_type=F32) + templ_ref[...]          # (2*NV, 2): [x(128) ; y(128)]
    vscr[...] = vxy                                   # park raw verts; reloaded in 8-row chunks below

    scale_s = cam[0:1, 0:1]
    scale_r = cam[0:1, 1:2]
    tx_s = cam[1:2, 0:1]
    tx_r = cam[1:2, 1:2]
    ty_s = cam[2:3, 0:1]
    ty_r = cam[2:3, 1:2]

    # ref j2d: block-diag joint regression (one matmul) + weak-perspective projection
    jxy = jnp.dot(jreg_ref[...], vxy, preferred_element_type=F32)       # (2*NJ, 2)
    j2d_ref[0, :, 0:1] = scale_r * jxy[0:NJ, 1:2] + tx_r                # (NJ, 1)
    j2d_ref[0, :, 1:2] = scale_r * jxy[NJ:2 * NJ, 1:2] + ty_r

    # ---- precomputed pixel constants (lane layout) -----------------------------------------
    pxn = pix_ref[0:1, :]                             # (1, HW) normalized pixel-center x
    pyn = pix_ref[1:2, :]                             # (1, HW) normalized pixel-center y
    y_idx = pix_ref[2:3, :]                           # (1, HW) image-row index (float)

    # ---- vertex-splat condition maps (stand-in for render_fim_wim + encode_fim) ------------
    # TODO(synk): mesh rasterization into fim/wim maps is not implementable as a Pallas kernel.
    # Two occupancy channels come from an arbitrary split of the vertex list into halves.
    big = jnp.full((8, HW), 1e30, F32)

    def chunk_body(i, carry):
        a_sa, a_sb, a_ra, a_rb = carry
        o = pl.multiple_of(i * 8, 8)
        xa = vscr[pl.ds(o, 8), :]                     # (8,2) x coords, vertex half A
        ya = vscr[pl.ds(o + NV, 8), :]
        xb = vscr[pl.ds(o + NV // 2, 8), :]           # vertex half B
        yb = vscr[pl.ds(o + NV + NV // 2, 8), :]

        def upd(acc_s, acc_r, xc, yc):
            sx = scale_s * xc[:, 0:1] + tx_s          # (8,1) projected src verts
            sy = scale_s * yc[:, 0:1] + ty_s
            rx = scale_r * xc[:, 1:2] + tx_r
            ry = scale_r * yc[:, 1:2] + ty_r
            d2s = (pxn - sx) ** 2 + (pyn - sy) ** 2   # (8, HW)
            d2r = (pxn - rx) ** 2 + (pyn - ry) ** 2
            return jnp.minimum(acc_s, d2s), jnp.minimum(acc_r, d2r)

        a_sa, a_ra = upd(a_sa, a_ra, xa, ya)
        a_sb, a_rb = upd(a_sb, a_rb, xb, yb)
        return a_sa, a_sb, a_ra, a_rb

    a_sa, a_sb, a_ra, a_rb = lax.fori_loop(0, NV // 2 // 8, chunk_body,
                                           (big, big, big, big), unroll=True)

    d2_sa = jnp.min(a_sa, axis=0, keepdims=True)      # (1, HW)
    d2_sb = jnp.min(a_sb, axis=0, keepdims=True)
    d2_ra = jnp.min(a_ra, axis=0, keepdims=True)
    d2_rb = jnp.min(a_rb, axis=0, keepdims=True)

    occ_sa = jnp.exp(d2_sa * NEG_INV_SIGMA2)          # exp only on the reduced rows
    occ_sb = jnp.exp(d2_sb * NEG_INV_SIGMA2)
    occ_ra = jnp.exp(d2_ra * NEG_INV_SIGMA2)
    occ_rb = jnp.exp(d2_rb * NEG_INV_SIGMA2)
    src_bg = (jnp.minimum(d2_sa, d2_sb) > BG_THRESH).astype(F32)
    ref_bg = (jnp.minimum(d2_ra, d2_rb) > BG_THRESH).astype(F32)

    # ---- util.morph erodes (separable, roll-based, no big constants / matmuls) -------------
    src_bg_mask = _erode_lane(src_bg, y_idx, (1, 2, 4))   # ks = 15
    src_crop = _erode_lane(src_bg, y_idx, (1,))           # ks = 3
    tsf_crop = _erode_lane(ref_bg, y_idx, (1,))           # ks = 3

    # ---- transform grid T (from cam scalars only) -------------------------------------------
    # TODO(synk): SMPLRenderer.cal_bc_transform (barycentric transform from rasterized fim/wim)
    # has no clean Pallas equivalent; deterministic cam-relative affine warp of the same shape.
    s_ratio = scale_s / scale_r
    tgx = (pxn - tx_r) * s_ratio + tx_s               # (1, HW)
    tgy = (pyn - ty_r) * s_ratio + ty_s

    # ---- store the non-image rows of the slab (direct sub-ref stores, no concats) ----------
    def put(row, v):
        slab_ref[0, row:row + 1, :] = v

    put(_R_GBG_M, src_bg_mask)
    put(_R_GSRC_C + 0, occ_sa)
    put(_R_GSRC_C + 1, occ_sb)
    put(_R_GSRC_C + 2, src_bg)
    put(_R_GTSF_C + 0, occ_ra)
    put(_R_GTSF_C + 1, occ_rb)
    put(_R_GTSF_C + 2, ref_bg)
    put(_R_CONDS + 0, occ_sa)
    put(_R_CONDS + 1, occ_sb)
    put(_R_CONDS + 2, src_bg)
    put(_R_CONDS + 3, occ_ra)
    put(_R_CONDS + 4, occ_rb)
    put(_R_CONDS + 5, ref_bg)
    put(_R_CROP_S, src_crop)
    put(_R_CROP_T, tsf_crop)
    put(_R_T + 0, tgx)
    put(_R_T + 1, tgy)

    # ---- F.grid_sample (bilinear, zeros, align_corners=False) + identity resample -----------
    # separable weights: bilinear factors as wrow * wcol; out-of-range corners never match the
    # iota -> zeros padding for free.  The left 256 columns use exact one-hot weights, so the
    # same single MXU push also yields the lane-major copy of src_img for the masking epilogue.
    fx = (tgx + 1.0) * (W * 0.5) - 0.5
    fy = (tgy + 1.0) * (H * 0.5) - 0.5
    x0 = jnp.floor(fx)
    y0 = jnp.floor(fy)
    wx1 = fx - x0
    wy1 = fy - y0
    x0i = x0.astype(jnp.int32)
    y0i = y0.astype(jnp.int32)
    wio = lax.broadcasted_iota(jnp.int32, (W, 1), 0)
    hio = lax.broadcasted_iota(jnp.int32, (H, 1), 0)
    wcol_t = (jnp.where(wio == x0i, 1.0 - wx1, 0.0)
              + jnp.where(wio == x0i + 1, wx1, 0.0))              # (W, HW)
    wrow_t = (jnp.where(hio == y0i, 1.0 - wy1, 0.0)
              + jnp.where(hio == y0i + 1, wy1, 0.0))              # (H, HW)

    wcol_cat = jnp.concatenate([wcid_ref[...], wcol_t], axis=1)   # (W, 2*HW), 128-aligned concat
    wrow_cat = jnp.concatenate([wrid_ref[...], wrow_t], axis=1)   # (H, 2*HW)
    gmat = jnp.dot(img_ref[0], wcol_cat, preferred_element_type=F32)   # (C*H, 2*HW), one MXU push

    inv_crop = 1.0 - src_crop
    for c in range(C_IMG):
        seg = gmat[H * c:H * (c + 1), :]                          # (H, 2*HW) static sublane slice
        row = jnp.sum(wrow_cat * seg, axis=0, keepdims=True)      # (1, 2*HW)
        imgf_c = row[:, 0:HW]          # exact lane-major src_img channel c (one-hot weights)
        syn_c = row[:, HW:2 * HW]      # grid-sampled channel c
        put(_R_SYN + c, syn_c)
        put(_R_GTSF + c, syn_c)
        put(_R_GBG + c, imgf_c * src_bg_mask)
        put(_R_GSRC + c, imgf_c * inv_crop)


# ---------------------------------------------------------------------------
# Host-side glue
# ---------------------------------------------------------------------------
def body_recovery_flow(src_img, src_smpl, ref_smpl, params):
    b = src_img.shape[0]
    cam_t = jnp.stack([src_smpl[:, 0:3], ref_smpl[:, 0:3]], axis=-1)              # (B, 3, 2)
    theta_t = jnp.stack([src_smpl[:, 3:SMPL_DIM], ref_smpl[:, 3:SMPL_DIM]], axis=-1)  # (B, 82, 2)
    img48 = src_img.reshape(b, C_IMG * H, W)                                      # contiguous (free)

    slab, j2d = pl.pallas_call(
        _brf_kernel,
        grid=(b,),
        in_specs=[
            pl.BlockSpec((1, 3, 2), lambda i: (i, 0, 0)),                 # cam (src|ref)
            pl.BlockSpec((1, THETA_DIM, 2), lambda i: (i, 0, 0)),         # theta (src|ref)
            pl.BlockSpec((1, C_IMG * H, W), lambda i: (i, 0, 0)),         # src image, spatial
            pl.BlockSpec((3, HW), lambda i: (0, 0)),                      # pixel constants
            pl.BlockSpec((W, HW), lambda i: (0, 0)),                      # identity col weights
            pl.BlockSpec((H, HW), lambda i: (0, 0)),                      # identity row weights
            pl.BlockSpec((2 * NV, THETA_DIM), lambda i: (0, 0)),          # SMPL blend (x,y)
            pl.BlockSpec((2 * NV, 1), lambda i: (0, 0)),                  # SMPL template (x,y)
            pl.BlockSpec((2 * NJ, 2 * NV), lambda i: (0, 0)),             # block-diag joint reg
        ],
        out_specs=(
            pl.BlockSpec((1, N_SLAB, HW), lambda i: (i, 0, 0)),           # fused output slab
            pl.BlockSpec((1, NJ, 2), lambda i: (i, 0, 0)),                # ref j2d
        ),
        out_shape=(
            jax.ShapeDtypeStruct((b, N_SLAB, HW), F32),
            jax.ShapeDtypeStruct((b, NJ, 2), F32),
        ),
        scratch_shapes=[pltpu.VMEM((2 * NV, 2), F32)],
        compiler_params=pltpu.CompilerParams(dimension_semantics=("parallel",)),
    )(cam_t, theta_t, img48,
      params["pix"], params["wcol_id"], params["wrow_id"],
      params["blend_t"], params["templ_t"], params["jreg_blk"])

    slab4 = slab.reshape(b, N_SLAB, H, W)                                 # contiguous (free)
    syn_img = slab4[:, _R_SYN:_R_SYN + 3]
    input_G_bg = slab4[:, _R_GBG:_R_GBG_M + 1]
    input_G_src = slab4[:, _R_GSRC:_R_GSRC_C + 3]
    input_G_tsf = slab4[:, _R_GTSF:_R_GTSF_C + 3]
    conds = slab4[:, _R_CONDS:_R_CONDS + 6]
    bg_mask = jnp.concatenate([slab4[:, _R_CROP_S:_R_CROP_S + 1],
                               slab4[:, _R_CROP_T:_R_CROP_T + 1]], axis=0)   # (2B, 1, H, W)
    T = jnp.moveaxis(slab4[:, _R_T:_R_T + 2], 1, -1)                         # (B, H, W, 2)
    return (syn_img, input_G_bg, input_G_src, input_G_tsf, T, bg_mask, conds, j2d)


def init_params(key):
    k1, k2, k3 = jax.random.split(key, 3)
    blend_t = jax.random.normal(k1, (2 * NV, THETA_DIM), F32) * 0.05
    templ_t = jax.random.uniform(k2, (2 * NV, 1), F32, minval=-0.6, maxval=0.6)
    jreg = jax.random.uniform(k3, (NJ, NV), F32)
    jreg = jreg / jnp.sum(jreg, axis=1, keepdims=True)          # convex joint regressor
    zeros = jnp.zeros((NJ, NV), F32)
    jreg_blk = jnp.concatenate(
        [jnp.concatenate([jreg, zeros], axis=1),
         jnp.concatenate([zeros, jreg], axis=1)], axis=0)        # (2*NJ, 2*NV)

    # pixel constants, precomputed once (no per-step iota div/mod on device)
    q = jnp.arange(HW, dtype=jnp.int32)
    xq = q % W
    yq = q // W
    pxn = (xq.astype(F32) + 0.5) / W * 2.0 - 1.0
    pyn = (yq.astype(F32) + 0.5) / H * 2.0 - 1.0
    pix = jnp.stack([pxn, pyn, yq.astype(F32)], axis=0)                       # (3, HW)
    wcol_id = (jnp.arange(W)[:, None] == xq[None, :]).astype(F32)             # (W, HW) one-hot
    wrow_id = (jnp.arange(H)[:, None] == yq[None, :]).astype(F32)             # (H, HW) one-hot
    return {"blend_t": blend_t, "templ_t": templ_t, "jreg_blk": jreg_blk,
            "pix": pix, "wcol_id": wcol_id, "wrow_id": wrow_id}


if __name__ == "__main__":
    key = jax.random.PRNGKey(0)
    k_par, k_img, k_src, k_ref = jax.random.split(key, 4)
    params = init_params(k_par)

    src_img = jax.random.uniform(k_img, (B, C_IMG, H, W), F32)
    cam_s = jnp.concatenate([jnp.full((B, 1), 0.9, F32), jnp.zeros((B, 2), F32)], axis=1)
    src_smpl = jnp.concatenate(
        [cam_s, jax.random.normal(k_src, (B, THETA_DIM), F32) * 0.1], axis=1)
    cam_r = jnp.concatenate([jnp.full((B, 1), 0.8, F32),
                             jnp.full((B, 1), 0.05, F32),
                             jnp.full((B, 1), -0.05, F32)], axis=1)
    ref_smpl = jnp.concatenate(
        [cam_r, jax.random.normal(k_ref, (B, THETA_DIM), F32) * 0.1], axis=1)

    outs = jax.jit(body_recovery_flow)(src_img, src_smpl, ref_smpl, params)
    outs = jax.block_until_ready(outs)

    expected = [(B, 3, H, W), (B, 4, H, W), (B, 6, H, W), (B, 6, H, W),
                (B, H, W, 2), (2 * B, 1, H, W), (B, 6, H, W), (B, NJ, 2)]
    got = [tuple(o.shape) for o in outs]
    assert got == expected, got
    assert all(bool(jnp.all(jnp.isfinite(o))) for o in outs)
    print("KERNEL_OK")
</pallas_src>

<mosaic_0001>
module attributes {stable_mosaic.version = 11 : i64} {
  func.func @_brf_kernel(%arg0: i32, %arg1: memref<1x3x2xf32, #tpu.memory_space<vmem>>, %arg2: memref<1x82x2xf32, #tpu.memory_space<vmem>>, %arg3: memref<1x48x16xf32, #tpu.memory_space<vmem>>, %arg4: memref<3x256xf32, #tpu.memory_space<vmem>>, %arg5: memref<16x256xf32, #tpu.memory_space<vmem>>, %arg6: memref<16x256xf32, #tpu.memory_space<vmem>>, %arg7: memref<256x82xf32, #tpu.memory_space<vmem>>, %arg8: memref<256x1xf32, #tpu.memory_space<vmem>>, %arg9: memref<16x256xf32, #tpu.memory_space<vmem>>, %arg10: memref<1x29x256xf32, #tpu.memory_space<vmem>>, %arg11: memref<1x8x2xf32, #tpu.memory_space<vmem>>, %arg12: memref<256x2xf32, #tpu.memory_space<vmem>>) attributes {dimension_semantics = [#tpu.dimension_semantics<parallel>], iteration_bounds = array<i64: 2>, scalar_prefetch = 0 : i64, scratch_operands = 1 : i64, tpu.core_type = #tpu.core_type<tc>, window_params = [{transform_indices = @transform_0, window_bounds = array<i64: 1, 3, 2>}, {transform_indices = @transform_1, window_bounds = array<i64: 1, 82, 2>}, {transform_indices = @transform_2, window_bounds = array<i64: 1, 48, 16>}, {pipeline_mode = #tpu.pipeline_mode<synchronous>, transform_indices = @transform_3, window_bounds = array<i64: 3, 256>}, {pipeline_mode = #tpu.pipeline_mode<synchronous>, transform_indices = @transform_4, window_bounds = array<i64: 16, 256>}, {pipeline_mode = #tpu.pipeline_mode<synchronous>, transform_indices = @transform_5, window_bounds = array<i64: 16, 256>}, {pipeline_mode = #tpu.pipeline_mode<synchronous>, transform_indices = @transform_6, window_bounds = array<i64: 256, 82>}, {pipeline_mode = #tpu.pipeline_mode<synchronous>, transform_indices = @transform_7, window_bounds = array<i64: 256, 1>}, {pipeline_mode = #tpu.pipeline_mode<synchronous>, transform_indices = @transform_8, window_bounds = array<i64: 16, 256>}, {transform_indices = @transform_9, window_bounds = array<i64: 1, 29, 256>}, {transform_indices = @transform_10, window_bounds = array<i64: 1, 8, 2>}]} {
    %c0 = arith.constant 0 : index
    %c0_0 = arith.constant 0 : index
    %c0_1 = arith.constant 0 : index
    %0 = vector.load %arg1[%c0, %c0_0, %c0_1] : memref<1x3x2xf32, #tpu.memory_space<vmem>>, vector<1x3x2xf32>
    %1 = vector.shape_cast %0 : vector<1x3x2xf32> to vector<3x2xf32>
    %c0_2 = arith.constant 0 : index
    %c0_3 = arith.constant 0 : index
    %c0_4 = arith.constant 0 : index
    %2 = vector.load %arg2[%c0_2, %c0_3, %c0_4] : memref<1x82x2xf32, #tpu.memory_space<vmem>>, vector<1x82x2xf32>
    %3 = vector.shape_cast %2 : vector<1x82x2xf32> to vector<82x2xf32>
    %c0_5 = arith.constant 0 : index
    %c0_6 = arith.constant 0 : index
    %4 = vector.load %arg7[%c0_5, %c0_6] : memref<256x82xf32, #tpu.memory_space<vmem>>, vector<256x82xf32>
    %cst = arith.constant dense<0.000000e+00> : vector<256x2xf32>
    %5 = tpu.matmul %4, %3, %cst {dimension_numbers = #tpu.dot_dimension_numbers<[1], [0], [0], [1], [0, 0, 1, 1], [], []>} : vector<256x82xf32>, vector<82x2xf32>, vector<256x2xf32> -> vector<256x2xf32>
    %c0_7 = arith.constant 0 : index
    %c0_8 = arith.constant 0 : index
    %6 = vector.load %arg8[%c0_7, %c0_8] : memref<256x1xf32, #tpu.memory_space<vmem>>, vector<256x1xf32>
    %7 = vector.broadcast %6 : vector<256x1xf32> to vector<256x2xf32>
    %8 = arith.addf %5, %7 : vector<256x2xf32>
    %c0_9 = arith.constant 0 : index
    %c0_10 = arith.constant 0 : index
    %9 = vector.load %arg12[%c0_9, %c0_10] : memref<256x2xf32, #tpu.memory_space<vmem>>, vector<256x2xf32>
    tpu.vector_store %arg12[%c0_9, %c0_10], %8 {strides = array<i32>} : memref<256x2xf32, #tpu.memory_space<vmem>>, vector<256x2xf32>,
    %10 = vector.extract_strided_slice %1 {offsets = [0, 0], sizes = [1, 1], strides = [1, 1]} : vector<3x2xf32> to vector<1x1xf32>
    %11 = vector.extract_strided_slice %1 {offsets = [0, 1], sizes = [1, 1], strides = [1, 1]} : vector<3x2xf32> to vector<1x1xf32>
    %12 = vector.extract_strided_slice %1 {offsets = [1, 0], sizes = [1, 1], strides = [1, 1]} : vector<3x2xf32> to vector<1x1xf32>
    %13 = vector.extract_strided_slice %1 {offsets = [1, 1], sizes = [1, 1], strides = [1, 1]} : vector<3x2xf32> to vector<1x1xf32>
    %14 = vector.extract_strided_slice %1 {offsets = [2, 0], sizes = [1, 1], strides = [1, 1]} : vector<3x2xf32> to vector<1x1xf32>
    %15 = vector.extract_strided_slice %1 {offsets = [2, 1], sizes = [1, 1], strides = [1, 1]} : vector<3x2xf32> to vector<1x1xf32>
    %c0_11 = arith.constant 0 : index
    %c0_12 = arith.constant 0 : index
    %16 = vector.load %arg9[%c0_11, %c0_12] : memref<16x256xf32, #tpu.memory_space<vmem>>, vector<16x256xf32>
    %cst_13 = arith.constant dense<0.000000e+00> : vector<16x2xf32>
    %17 = tpu.matmul %16, %8, %cst_13 {dimension_numbers = #tpu.dot_dimension_numbers<[1], [0], [0], [1], [0, 0, 1, 1], [], []>} : vector<16x256xf32>, vector<256x2xf32>, vector<16x2xf32> -> vector<16x2xf32>
    %18 = vector.extract_strided_slice %17 {offsets = [0, 1], sizes = [8, 1], strides = [1, 1]} : vector<16x2xf32> to vector<8x1xf32>
    %19 = vector.broadcast %11 : vector<1x1xf32> to vector<8x1xf32>
    %20 = arith.mulf %19, %18 : vector<8x1xf32>
    %21 = vector.broadcast %13 : vector<1x1xf32> to vector<8x1xf32>
    %22 = arith.addf %20, %21 : vector<8x1xf32>
    %c0_14 = arith.constant 0 : index
    %c0_15 = arith.constant 0 : index
    %c0_16 = arith.constant 0 : index
    %23 = vector.load %arg11[%c0_14, %c0_15, %c0_16] : memref<1x8x2xf32, #tpu.memory_space<vmem>>, vector<1x8x1xf32>
    %24 = vector.shape_cast %23 : vector<1x8x1xf32> to vector<8x1xf32>
    %25 = vector.shape_cast %22 : vector<8x1xf32> to vector<1x8x1xf32>
    tpu.vector_store %arg11[%c0_14, %c0_15, %c0_16], %25 {strides = array<i32>} : memref<1x8x2xf32, #tpu.memory_space<vmem>>, vector<1x8x1xf32>,
    %26 = vector.extract_strided_slice %17 {offsets = [8, 1], sizes = [8, 1], strides = [1, 1]} : vector<16x2xf32> to vector<8x1xf32>
    %27 = vector.broadcast %11 : vector<1x1xf32> to vector<8x1xf32>
    %28 = arith.mulf %27, %26 : vector<8x1xf32>
    %29 = vector.broadcast %15 : vector<1x1xf32> to vector<8x1xf32>
    %30 = arith.addf %28, %29 : vector<8x1xf32>
    %c0_17 = arith.constant 0 : index
    %c0_18 = arith.constant 0 : index
    %c1 = arith.constant 1 : index
    %31 = vector.load %arg11[%c0_17, %c0_18, %c1] : memref<1x8x2xf32, #tpu.memory_space<vmem>>, vector<1x8x1xf32>
    %32 = vector.shape_cast %31 : vector<1x8x1xf32> to vector<8x1xf32>
    %33 = vector.shape_cast %30 : vector<8x1xf32> to vector<1x8x1xf32>
    tpu.vector_store %arg11[%c0_17, %c0_18, %c1], %33 {strides = array<i32>} : memref<1x8x2xf32, #tpu.memory_space<vmem>>, vector<1x8x1xf32>,
    %c0_19 = arith.constant 0 : index
    %c0_20 = arith.constant 0 : index
    %34 = vector.load %arg4[%c0_19, %c0_20] : memref<3x256xf32, #tpu.memory_space<vmem>>, vector<1x256xf32>
    %c1_21 = arith.constant 1 : index
    %c0_22 = arith.constant 0 : index
    %35 = vector.load %arg4[%c1_21, %c0_22] : memref<3x256xf32, #tpu.memory_space<vmem>>, vector<1x256xf32>
    %c2 = arith.constant 2 : index
    %c0_23 = arith.constant 0 : index
    %36 = vector.load %arg4[%c2, %c0_23] : memref<3x256xf32, #tpu.memory_space<vmem>>, vector<1x256xf32>
    %cst_24 = arith.constant 1.000000e+30 : f32
    %37 = vector.broadcast %cst_24 : f32 to vector<8x256xf32>
    %c0_i32 = arith.constant 0 : i32
    %c8_i32 = arith.constant 8 : i32
    %38 = arith.muli %c0_i32, %c8_i32 : i32
    %39 = tpu.assume_multiple %38, 8 : i32
    %40 = arith.index_cast %39 : i32 to index
    %c0_25 = arith.constant 0 : index
    %41 = vector.load %arg12[%40, %c0_25] : memref<256x2xf32, #tpu.memory_space<vmem>>, vector<8x2xf32>
    %c128_i32 = arith.constant 128 : i32
    %42 = arith.addi %39, %c128_i32 : i32
    %43 = arith.index_cast %42 : i32 to index
    %c0_26 = arith.constant 0 : index
    %44 = vector.load %arg12[%43, %c0_26] : memref<256x2xf32, #tpu.memory_space<vmem>>, vector<8x2xf32>
    %c64_i32 = arith.constant 64 : i32
    %45 = arith.addi %39, %c64_i32 : i32
    %46 = arith.index_cast %45 : i32 to index
    %c0_27 = arith.constant 0 : index
    %47 = vector.load %arg12[%46, %c0_27] : memref<256x2xf32, #tpu.memory_space<vmem>>, vector<8x2xf32>
    %c128_i32_28 = arith.constant 128 : i32
    %48 = arith.addi %39, %c128_i32_28 : i32
    %c64_i32_29 = arith.constant 64 : i32
    %49 = arith.addi %48, %c64_i32_29 : i32
    %50 = arith.index_cast %49 : i32 to index
    %c0_30 = arith.constant 0 : index
    %51 = vector.load %arg12[%50, %c0_30] : memref<256x2xf32, #tpu.memory_space<vmem>>, vector<8x2xf32>
    %52 = vector.extract_strided_slice %41 {offsets = [0, 0], sizes = [8, 1], strides = [1, 1]} : vector<8x2xf32> to vector<8x1xf32>
    %53 = vector.broadcast %10 : vector<1x1xf32> to vector<8x1xf32>
    %54 = arith.mulf %53, %52 : vector<8x1xf32>
    %55 = vector.broadcast %12 : vector<1x1xf32> to vector<8x1xf32>
    %56 = arith.addf %54, %55 : vector<8x1xf32>
    %57 = vector.extract_strided_slice %44 {offsets = [0, 0], sizes = [8, 1], strides = [1, 1]} : vector<8x2xf32> to vector<8x1xf32>
    %58 = vector.broadcast %10 : vector<1x1xf32> to vector<8x1xf32>
    %59 = arith.mulf %58, %57 : vector<8x1xf32>
    %60 = vector.broadcast %14 : vector<1x1xf32> to vector<8x1xf32>
    %61 = arith.addf %59, %60 : vector<8x1xf32>
    %62 = vector.extract_strided_slice %41 {offsets = [0, 1], sizes = [8, 1], strides = [1, 1]} : vector<8x2xf32> to vector<8x1xf32>
    %63 = vector.broadcast %11 : vector<1x1xf32> to vector<8x1xf32>
    %64 = arith.mulf %63, %62 : vector<8x1xf32>
    %65 = vector.broadcast %13 : vector<1x1xf32> to vector<8x1xf32>
    %66 = arith.addf %64, %65 : vector<8x1xf32>
    %67 = vector.extract_strided_slice %44 {offsets = [0, 1], sizes = [8, 1], strides = [1, 1]} : vector<8x2xf32> to vector<8x1xf32>
    %68 = vector.broadcast %11 : vector<1x1xf32> to vector<8x1xf32>
    %69 = arith.mulf %68, %67 : vector<8x1xf32>
    %70 = vector.broadcast %15 : vector<1x1xf32> to vector<8x1xf32>
    %71 = arith.addf %69, %70 : vector<8x1xf32>
    %72 = vector.broadcast %34 : vector<1x256xf32> to vector<8x256xf32>
    %73 = vector.broadcast %56 : vector<8x1xf32> to vector<8x256xf32>
    %74 = arith.subf %72, %73 : vector<8x256xf32>
    %75 = arith.mulf %74, %74 : vector<8x256xf32>
    %76 = vector.broadcast %35 : vector<1x256xf32> to vector<8x256xf32>
    %77 = vector.broadcast %61 : vector<8x1xf32> to vector<8x256xf32>
    %78 = arith.subf %76, %77 : vector<8x256xf32>
    %79 = arith.mulf %78, %78 : vector<8x256xf32>
    %80 = arith.addf %75, %79 : vector<8x256xf32>
    %81 = vector.broadcast %34 : vector<1x256xf32> to vector<8x256xf32>
    %82 = vector.broadcast %66 : vector<8x1xf32> to vector<8x256xf32>
    %83 = arith.subf %81, %82 : vector<8x256xf32>
    %84 = arith.mulf %83, %83 : vector<8x256xf32>
    %85 = vector.broadcast %35 : vector<1x256xf32> to vector<8x256xf32>
    %86 = vector.broadcast %71 : vector<8x1xf32> to vector<8x256xf32>
    %87 = arith.subf %85, %86 : vector<8x256xf32>
    %88 = arith.mulf %87, %87 : vector<8x256xf32>
    %89 = arith.addf %84, %88 : vector<8x256xf32>
    %90 = arith.minimumf %37, %80 : vector<8x256xf32>
    %91 = arith.minimumf %37, %89 : vector<8x256xf32>
    %92 = vector.extract_strided_slice %47 {offsets = [0, 0], sizes = [8, 1], strides = [1, 1]} : vector<8x2xf32> to vector<8x1xf32>
    %93 = vector.broadcast %10 : vector<1x1xf32> to vector<8x1xf32>
    %94 = arith.mulf %93, %92 : vector<8x1xf32>
    %95 = vector.broadcast %12 : vector<1x1xf32> to vector<8x1xf32>
    %96 = arith.addf %94, %95 : vector<8x1xf32>
    %97 = vector.extract_strided_slice %51 {offsets = [0, 0], sizes = [8, 1], strides = [1, 1]} : vector<8x2xf32> to vector<8x1xf32>
    %98 = vector.broadcast %10 : vector<1x1xf32> to vector<8x1xf32>
    %99 = arith.mulf %98, %97 : vector<8x1xf32>
    %100 = vector.broadcast %14 : vector<1x1xf32> to vector<8x1xf32>
    %101 = arith.addf %99, %100 : vector<8x1xf32>
    %102 = vector.extract_strided_slice %47 {offsets = [0, 1], sizes = [8, 1], strides = [1, 1]} : vector<8x2xf32> to vector<8x1xf32>
    %103 = vector.broadcast %11 : vector<1x1xf32> to vector<8x1xf32>
    %104 = arith.mulf %103, %102 : vector<8x1xf32>
    %105 = vector.broadcast %13 : vector<1x1xf32> to vector<8x1xf32>
    %106 = arith.addf %104, %105 : vector<8x1xf32>
    %107 = vector.extract_strided_slice %51 {offsets = [0, 1], sizes = [8, 1], strides = [1, 1]} : vector<8x2xf32> to vector<8x1xf32>
    %108 = vector.broadcast %11 : vector<1x1xf32> to vector<8x1xf32>
    %109 = arith.mulf %108, %107 : vector<8x1xf32>
    %110 = vector.broadcast %15 : vector<1x1xf32> to vector<8x1xf32>
    %111 = arith.addf %109, %110 : vector<8x1xf32>
    %112 = vector.broadcast %34 : vector<1x256xf32> to vector<8x256xf32>
    %113 = vector.broadcast %96 : vector<8x1xf32> to vector<8x256xf32>
    %114 = arith.subf %112, %113 : vector<8x256xf32>
    %115 = arith.mulf %114, %114 : vector<8x256xf32>
    %116 = vector.broadcast %35 : vector<1x256xf32> to vector<8x256xf32>
    %117 = vector.broadcast %101 : vector<8x1xf32> to vector<8x256xf32>
    %118 = arith.subf %116, %117 : vector<8x256xf32>
    %119 = arith.mulf %118, %118 : vector<8x256xf32>
    %120 = arith.addf %115, %119 : vector<8x256xf32>
    %121 = vector.broadcast %34 : vector<1x256xf32> to vector<8x256xf32>
    %122 = vector.broadcast %106 : vector<8x1xf32> to vector<8x256xf32>
    %123 = arith.subf %121, %122 : vector<8x256xf32>
    %124 = arith.mulf %123, %123 : vector<8x256xf32>
    %125 = vector.broadcast %35 : vector<1x256xf32> to vector<8x256xf32>
    %126 = vector.broadcast %111 : vector<8x1xf32> to vector<8x256xf32>
    %127 = arith.subf %125, %126 : vector<8x256xf32>
    %128 = arith.mulf %127, %127 : vector<8x256xf32>
    %129 = arith.addf %124, %128 : vector<8x256xf32>
    %130 = arith.minimumf %37, %120 : vector<8x256xf32>
    %131 = arith.minimumf %37, %129 : vector<8x256xf32>
    %c1_i32 = arith.constant 1 : i32
    %c8_i32_31 = arith.constant 8 : i32
    %132 = arith.muli %c1_i32, %c8_i32_31 : i32
    %133 = tpu.assume_multiple %132, 8 : i32
    %134 = arith.index_cast %133 : i32 to index
    %c0_32 = arith.constant 0 : index
    %135 = vector.load %arg12[%134, %c0_32] : memref<256x2xf32, #tpu.memory_space<vmem>>, vector<8x2xf32>
    %c128_i32_33 = arith.constant 128 : i32
    %136 = arith.addi %133, %c128_i32_33 : i32
    %137 = arith.index_cast %136 : i32 to index
    %c0_34 = arith.constant 0 : index
    %138 = vector.load %arg12[%137, %c0_34] : memref<256x2xf32, #tpu.memory_space<vmem>>, vector<8x2xf32>
    %c64_i32_35 = arith.constant 64 : i32
    %139 = arith.addi %133, %c64_i32_35 : i32
    %140 = arith.index_cast %139 : i32 to index
    %c0_36 = arith.constant 0 : index
    %141 = vector.load %arg12[%140, %c0_36] : memref<256x2xf32, #tpu.memory_space<vmem>>, vector<8x2xf32>
    %c128_i32_37 = arith.constant 128 : i32
    %142 = arith.addi %133, %c128_i32_37 : i32
    %c64_i32_38 = arith.constant 64 : i32
    %143 = arith.addi %142, %c64_i32_38 : i32
    %144 = arith.index_cast %143 : i32 to index
    %c0_39 = arith.constant 0 : index
    %145 = vector.load %arg12[%144, %c0_39] : memref<256x2xf32, #tpu.memory_space<vmem>>, vector<8x2xf32>
    %146 = vector.extract_strided_slice %135 {offsets = [0, 0], sizes = [8, 1], strides = [1, 1]} : vector<8x2xf32> to vector<8x1xf32>
    %147 = vector.broadcast %10 : vector<1x1xf32> to vector<8x1xf32>
    %148 = arith.mulf %147, %146 : vector<8x1xf32>
    %149 = vector.broadcast %12 : vector<1x1xf32> to vector<8x1xf32>
    %150 = arith.addf %148, %149 : vector<8x1xf32>
    %151 = vector.extract_strided_slice %138 {offsets = [0, 0], sizes = [8, 1], strides = [1, 1]} : vector<8x2xf32> to vector<8x1xf32>
    %152 = vector.broadcast %10 : vector<1x1xf32> to vector<8x1xf32>
    %153 = arith.mulf %152, %151 : vector<8x1xf32>
    %154 = vector.broadcast %14 : vector<1x1xf32> to vector<8x1xf32>
    %155 = arith.addf %153, %154 : vector<8x1xf32>
    %156 = vector.extract_strided_slice %135 {offsets = [0, 1], sizes = [8, 1], strides = [1, 1]} : vector<8x2xf32> to vector<8x1xf32>
    %157 = vector.broadcast %11 : vector<1x1xf32> to vector<8x1xf32>
    %158 = arith.mulf %157, %156 : vector<8x1xf32>
    %159 = vector.broadcast %13 : vector<1x1xf32> to vector<8x1xf32>
    %160 = arith.addf %158, %159 : vector<8x1xf32>
    %161 = vector.extract_strided_slice %138 {offsets = [0, 1], sizes = [8, 1], strides = [1, 1]} : vector<8x2xf32> to vector<8x1xf32>
    %162 = vector.broadcast %11 : vector<1x1xf32> to vector<8x1xf32>
    %163 = arith.mulf %162, %161 : vector<8x1xf32>
    %164 = vector.broadcast %15 : vector<1x1xf32> to vector<8x1xf32>
    %165 = arith.addf %163, %164 : vector<8x1xf32>
    %166 = vector.broadcast %34 : vector<1x256xf32> to vector<8x256xf32>
    %167 = vector.broadcast %150 : vector<8x1xf32> to vector<8x256xf32>
    %168 = arith.subf %166, %167 : vector<8x256xf32>
    %169 = arith.mulf %168, %168 : vector<8x256xf32>
    %170 = vector.broadcast %35 : vector<1x256xf32> to vector<8x256xf32>
    %171 = vector.broadcast %155 : vector<8x1xf32> to vector<8x256xf32>
    %172 = arith.subf %170, %171 : vector<8x256xf32>
    %173 = arith.mulf %172, %172 : vector<8x256xf32>
    %174 = arith.addf %169, %173 : vector<8x256xf32>
    %175 = vector.broadcast %34 : vector<1x256xf32> to vector<8x256xf32>
    %176 = vector.broadcast %160 : vector<8x1xf32> to vector<8x256xf32>
    %177 = arith.subf %175, %176 : vector<8x256xf32>
    %178 = arith.mulf %177, %177 : vector<8x256xf32>
    %179 = vector.broadcast %35 : vector<1x256xf32> to vector<8x256xf32>
    %180 = vector.broadcast %165 : vector<8x1xf32> to vector<8x256xf32>
    %181 = arith.subf %179, %180 : vector<8x256xf32>
    %182 = arith.mulf %181, %181 : vector<8x256xf32>
    %183 = arith.addf %178, %182 : vector<8x256xf32>
    %184 = arith.minimumf %90, %174 : vector<8x256xf32>
    %185 = arith.minimumf %91, %183 : vector<8x256xf32>
    %186 = vector.extract_strided_slice %141 {offsets = [0, 0], sizes = [8, 1], strides = [1, 1]} : vector<8x2xf32> to vector<8x1xf32>
    %187 = vector.broadcast %10 : vector<1x1xf32> to vector<8x1xf32>
    %188 = arith.mulf %187, %186 : vector<8x1xf32>
    %189 = vector.broadcast %12 : vector<1x1xf32> to vector<8x1xf32>
    %190 = arith.addf %188, %189 : vector<8x1xf32>
    %191 = vector.extract_strided_slice %145 {offsets = [0, 0], sizes = [8, 1], strides = [1, 1]} : vector<8x2xf32> to vector<8x1xf32>
    %192 = vector.broadcast %10 : vector<1x1xf32> to vector<8x1xf32>
    %193 = arith.mulf %192, %191 : vector<8x1xf32>
    %194 = vector.broadcast %14 : vector<1x1xf32> to vector<8x1xf32>
    %195 = arith.addf %193, %194 : vector<8x1xf32>
    %196 = vector.extract_strided_slice %141 {offsets = [0, 1], sizes = [8, 1], strides = [1, 1]} : vector<8x2xf32> to vector<8x1xf32>
    %197 = vector.broadcast %11 : vector<1x1xf32> to vector<8x1xf32>
    %198 = arith.mulf %197, %196 : vector<8x1xf32>
    %199 = vector.broadcast %13 : vector<1x1xf32> to vector<8x1xf32>
    %200 = arith.addf %198, %199 : vector<8x1xf32>
    %201 = vector.extract_strided_slice %145 {offsets = [0, 1], sizes = [8, 1], strides = [1, 1]} : vector<8x2xf32> to vector<8x1xf32>
    %202 = vector.broadcast %11 : vector<1x1xf32> to vector<8x1xf32>
    %203 = arith.mulf %202, %201 : vector<8x1xf32>
    %204 = vector.broadcast %15 : vector<1x1xf32> to vector<8x1xf32>
    %205 = arith.addf %203, %204 : vector<8x1xf32>
    %206 = vector.broadcast %34 : vector<1x256xf32> to vector<8x256xf32>
    %207 = vector.broadcast %190 : vector<8x1xf32> to vector<8x256xf32>
    %208 = arith.subf %206, %207 : vector<8x256xf32>
    %209 = arith.mulf %208, %208 : vector<8x256xf32>
    %210 = vector.broadcast %35 : vector<1x256xf32> to vector<8x256xf32>
    %211 = vector.broadcast %195 : vector<8x1xf32> to vector<8x256xf32>
    %212 = arith.subf %210, %211 : vector<8x256xf32>
    %213 = arith.mulf %212, %212 : vector<8x256xf32>
    %214 = arith.addf %209, %213 : vector<8x256xf32>
    %215 = vector.broadcast %34 : vector<1x256xf32> to vector<8x256xf32>
    %216 = vector.broadcast %200 : vector<8x1xf32> to vector<8x256xf32>
    %217 = arith.subf %215, %216 : vector<8x256xf32>
    %218 = arith.mulf %217, %217 : vector<8x256xf32>
    %219 = vector.broadcast %35 : vector<1x256xf32> to vector<8x256xf32>
    %220 = vector.broadcast %205 : vector<8x1xf32> to vector<8x256xf32>
    %221 = arith.subf %219, %220 : vector<8x256xf32>
    %222 = arith.mulf %221, %221 : vector<8x256xf32>
    %223 = arith.addf %218, %222 : vector<8x256xf32>
    %224 = arith.minimumf %130, %214 : vector<8x256xf32>
    %225 = arith.minimumf %131, %223 : vector<8x256xf32>
    %c2_i32 = arith.constant 2 : i32
    %c8_i32_40 = arith.constant 8 : i32
    %226 = arith.muli %c2_i32, %c8_i32_40 : i32
    %227 = tpu.assume_multiple %226, 8 : i32
    %228 = arith.index_cast %227 : i32 to index
    %c0_41 = arith.constant 0 : index
    %229 = vector.load %arg12[%228, %c0_41] : memref<256x2xf32, #tpu.memory_space<vmem>>, vector<8x2xf32>
    %c128_i32_42 = arith.constant 128 : i32
    %230 = arith.addi %227, %c128_i32_42 : i32
    %231 = arith.index_cast %230 : i32 to index
    %c0_43 = arith.constant 0 : index
    %232 = vector.load %arg12[%231, %c0_43] : memref<256x2xf32, #tpu.memory_space<vmem>>, vector<8x2xf32>
    %c64_i32_44 = arith.constant 64 : i32
    %233 = arith.addi %227, %c64_i32_44 : i32
    %234 = arith.index_cast %233 : i32 to index
    %c0_45 = arith.constant 0 : index
    %235 = vector.load %arg12[%234, %c0_45] : memref<256x2xf32, #tpu.memory_space<vmem>>, vector<8x2xf32>
    %c128_i32_46 = arith.constant 128 : i32
    %236 = arith.addi %227, %c128_i32_46 : i32
    %c64_i32_47 = arith.constant 64 : i32
    %237 = arith.addi %236, %c64_i32_47 : i32
    %238 = arith.index_cast %237 : i32 to index
    %c0_48 = arith.constant 0 : index
    %239 = vector.load %arg12[%238, %c0_48] : memref<256x2xf32, #tpu.memory_space<vmem>>, vector<8x2xf32>
    %240 = vector.extract_strided_slice %229 {offsets = [0, 0], sizes = [8, 1], strides = [1, 1]} : vector<8x2xf32> to vector<8x1xf32>
    %241 = vector.broadcast %10 : vector<1x1xf32> to vector<8x1xf32>
    %242 = arith.mulf %241, %240 : vector<8x1xf32>
    %243 = vector.broadcast %12 : vector<1x1xf32> to vector<8x1xf32>
    %244 = arith.addf %242, %243 : vector<8x1xf32>
    %245 = vector.extract_strided_slice %232 {offsets = [0, 0], sizes = [8, 1], strides = [1, 1]} : vector<8x2xf32> to vector<8x1xf32>
    %246 = vector.broadcast %10 : vector<1x1xf32> to vector<8x1xf32>
    %247 = arith.mulf %246, %245 : vector<8x1xf32>
    %248 = vector.broadcast %14 : vector<1x1xf32> to vector<8x1xf32>
    %249 = arith.addf %247, %248 : vector<8x1xf32>
    %250 = vector.extract_strided_slice %229 {offsets = [0, 1], sizes = [8, 1], strides = [1, 1]} : vector<8x2xf32> to vector<8x1xf32>
    %251 = vector.broadcast %11 : vector<1x1xf32> to vector<8x1xf32>
    %252 = arith.mulf %251, %250 : vector<8x1xf32>
    %253 = vector.broadcast %13 : vector<1x1xf32> to vector<8x1xf32>
    %254 = arith.addf %252, %253 : vector<8x1xf32>
    %255 = vector.extract_strided_slice %232 {offsets = [0, 1], sizes = [8, 1], strides = [1, 1]} : vector<8x2xf32> to vector<8x1xf32>
    %256 = vector.broadcast %11 : vector<1x1xf32> to vector<8x1xf32>
    %257 = arith.mulf %256, %255 : vector<8x1xf32>
    %258 = vector.broadcast %15 : vector<1x1xf32> to vector<8x1xf32>
    %259 = arith.addf %257, %258 : vector<8x1xf32>
    %260 = vector.broadcast %34 : vector<1x256xf32> to vector<8x256xf32>
    %261 = vector.broadcast %244 : vector<8x1xf32> to vector<8x256xf32>
    %262 = arith.subf %260, %261 : vector<8x256xf32>
    %263 = arith.mulf %262, %262 : vector<8x256xf32>
    %264 = vector.broadcast %35 : vector<1x256xf32> to vector<8x256xf32>
    %265 = vector.broadcast %249 : vector<8x1xf32> to vector<8x256xf32>
    %266 = arith.subf %264, %265 : vector<8x256xf32>
    %267 = arith.mulf %266, %266 : vector<8x256xf32>
    %268 = arith.addf %263, %267 : vector<8x256xf32>
    %269 = vector.broadcast %34 : vector<1x256xf32> to vector<8x256xf32>
    %270 = vector.broadcast %254 : vector<8x1xf32> to vector<8x256xf32>
    %271 = arith.subf %269, %270 : vector<8x256xf32>
    %272 = arith.mulf %271, %271 : vector<8x256xf32>
    %273 = vector.broadcast %35 : vector<1x256xf32> to vector<8x256xf32>
    %274 = vector.broadcast %259 : vector<8x1xf32> to vector<8x256xf32>
    %275 = arith.subf %273, %274 : vector<8x256xf32>
    %276 = arith.mulf %275, %275 : vector<8x256xf32>
    %277 = arith.addf %272, %276 : vector<8x256xf32>
    %278 = arith.minimumf %184, %268 : vector<8x256xf32>
    %279 = arith.minimumf %185, %277 : vector<8x256xf32>
    %280 = vector.extract_strided_slice %235 {offsets = [0, 0], sizes = [8, 1], strides = [1, 1]} : vector<8x2xf32> to vector<8x1xf32>
    %281 = vector.broadcast %10 : vector<1x1xf32> to vector<8x1xf32>
    %282 = arith.mulf %281, %280 : vector<8x1xf32>
    %283 = vector.broadcast %12 : vector<1x1xf32> to vector<8x1xf32>
    %284 = arith.addf %282, %283 : vector<8x1xf32>
    %285 = vector.extract_strided_slice %239 {offsets = [0, 0], sizes = [8, 1], strides = [1, 1]} : vector<8x2xf32> to vector<8x1xf32>
    %286 = vector.broadcast %10 : vector<1x1xf32> to vector<8x1xf32>
    %287 = arith.mulf %286, %285 : vector<8x1xf32>
    %288 = vector.broadcast %14 : vector<1x1xf32> to vector<8x1xf32>
    %289 = arith.addf %287, %288 : vector<8x1xf32>
    %290 = vector.extract_strided_slice %235 {offsets = [0, 1], sizes = [8, 1], strides = [1, 1]} : vector<8x2xf32> to vector<8x1xf32>
    %291 = vector.broadcast %11 : vector<1x1xf32> to vector<8x1xf32>
    %292 = arith.mulf %291, %290 : vector<8x1xf32>
    %293 = vector.broadcast %13 : vector<1x1xf32> to vector<8x1xf32>
    %294 = arith.addf %292, %293 : vector<8x1xf32>
    %295 = vector.extract_strided_slice %239 {offsets = [0, 1], sizes = [8, 1], strides = [1, 1]} : vector<8x2xf32> to vector<8x1xf32>
    %296 = vector.broadcast %11 : vector<1x1xf32> to vector<8x1xf32>
    %297 = arith.mulf %296, %295 : vector<8x1xf32>
    %298 = vector.broadcast %15 : vector<1x1xf32> to vector<8x1xf32>
    %299 = arith.addf %297, %298 : vector<8x1xf32>
    %300 = vector.broadcast %34 : vector<1x256xf32> to vector<8x256xf32>
    %301 = vector.broadcast %284 : vector<8x1xf32> to vector<8x256xf32>
    %302 = arith.subf %300, %301 : vector<8x256xf32>
    %303 = arith.mulf %302, %302 : vector<8x256xf32>
    %304 = vector.broadcast %35 : vector<1x256xf32> to vector<8x256xf32>
    %305 = vector.broadcast %289 : vector<8x1xf32> to vector<8x256xf32>
    %306 = arith.subf %304, %305 : vector<8x256xf32>
    %307 = arith.mulf %306, %306 : vector<8x256xf32>
    %308 = arith.addf %303, %307 : vector<8x256xf32>
    %309 = vector.broadcast %34 : vector<1x256xf32> to vector<8x256xf32>
    %310 = vector.broadcast %294 : vector<8x1xf32> to vector<8x256xf32>
    %311 = arith.subf %309, %310 : vector<8x256xf32>
    %312 = arith.mulf %311, %311 : vector<8x256xf32>
    %313 = vector.broadcast %35 : vector<1x256xf32> to vector<8x256xf32>
    %314 = vector.broadcast %299 : vector<8x1xf32> to vector<8x256xf32>
    %315 = arith.subf %313, %314 : vector<8x256xf32>
    %316 = arith.mulf %315, %315 : vector<8x256xf32>
    %317 = arith.addf %312, %316 : vector<8x256xf32>
    %318 = arith.minimumf %224, %308 : vector<8x256xf32>
    %319 = arith.minimumf %225, %317 : vector<8x256xf32>
    %c3_i32 = arith.constant 3 : i32
    %c8_i32_49 = arith.constant 8 : i32
    %320 = arith.muli %c3_i32, %c8_i32_49 : i32
    %321 = tpu.assume_multiple %320, 8 : i32
    %322 = arith.index_cast %321 : i32 to index
    %c0_50 = arith.constant 0 : index
    %323 = vector.load %arg12[%322, %c0_50] : memref<256x2xf32, #tpu.memory_space<vmem>>, vector<8x2xf32>
    %c128_i32_51 = arith.constant 128 : i32
    %324 = arith.addi %321, %c128_i32_51 : i32
    %325 = arith.index_cast %324 : i32 to index
    %c0_52 = arith.constant 0 : index
    %326 = vector.load %arg12[%325, %c0_52] : memref<256x2xf32, #tpu.memory_space<vmem>>, vector<8x2xf32>
    %c64_i32_53 = arith.constant 64 : i32
    %327 = arith.addi %321, %c64_i32_53 : i32
    %328 = arith.index_cast %327 : i32 to index
    %c0_54 = arith.constant 0 : index
    %329 = vector.load %arg12[%328, %c0_54] : memref<256x2xf32, #tpu.memory_space<vmem>>, vector<8x2xf32>
    %c128_i32_55 = arith.constant 128 : i32
    %330 = arith.addi %321, %c128_i32_55 : i32
    %c64_i32_56 = arith.constant 64 : i32
    %331 = arith.addi %330, %c64_i32_56 : i32
    %332 = arith.index_cast %331 : i32 to index
    %c0_57 = arith.constant 0 : index
    %333 = vector.load %arg12[%332, %c0_57] : memref<256x2xf32, #tpu.memory_space<vmem>>, vector<8x2xf32>
    %334 = vector.extract_strided_slice %323 {offsets = [0, 0], sizes = [8, 1], strides = [1, 1]} : vector<8x2xf32> to vector<8x1xf32>
    %335 = vector.broadcast %10 : vector<1x1xf32> to vector<8x1xf32>
    %336 = arith.mulf %335, %334 : vector<8x1xf32>
    %337 = vector.broadcast %12 : vector<1x1xf32> to vector<8x1xf32>
    %338 = arith.addf %336, %337 : vector<8x1xf32>
    %339 = vector.extract_strided_slice %326 {offsets = [0, 0], sizes = [8, 1], strides = [1, 1]} : vector<8x2xf32> to vector<8x1xf32>
    %340 = vector.broadcast %10 : vector<1x1xf32> to vector<8x1xf32>
    %341 = arith.mulf %340, %339 : vector<8x1xf32>
    %342 = vector.broadcast %14 : vector<1x1xf32> to vector<8x1xf32>
    %343 = arith.addf %341, %342 : vector<8x1xf32>
    %344 = vector.extract_strided_slice %323 {offsets = [0, 1], sizes = [8, 1], strides = [1, 1]} : vector<8x2xf32> to vector<8x1xf32>
    %345 = vector.broadcast %11 : vector<1x1xf32> to vector<8x1xf32>
    %346 = arith.mulf %345, %344 : vector<8x1xf32>
    %347 = vector.broadcast %13 : vector<1x1xf32> to vector<8x1xf32>
    %348 = arith.addf %346, %347 : vector<8x1xf32>
    %349 = vector.extract_strided_slice %326 {offsets = [0, 1], sizes = [8, 1], strides = [1, 1]} : vector<8x2xf32> to vector<8x1xf32>
    %350 = vector.broadcast %11 : vector<1x1xf32> to vector<8x1xf32>
    %351 = arith.mulf %350, %349 : vector<8x1xf32>
    %352 = vector.broadcast %15 : vector<1x1xf32> to vector<8x1xf32>
    %353 = arith.addf %351, %352 : vector<8x1xf32>
    %354 = vector.broadcast %34 : vector<1x256xf32> to vector<8x256xf32>
    %355 = vector.broadcast %338 : vector<8x1xf32> to vector<8x256xf32>
    %356 = arith.subf %354, %355 : vector<8x256xf32>
    %357 = arith.mulf %356, %356 : vector<8x256xf32>
    %358 = vector.broadcast %35 : vector<1x256xf32> to vector<8x256xf32>
    %359 = vector.broadcast %343 : vector<8x1xf32> to vector<8x256xf32>
    %360 = arith.subf %358, %359 : vector<8x256xf32>
    %361 = arith.mulf %360, %360 : vector<8x256xf32>
    %362 = arith.addf %357, %361 : vector<8x256xf32>
    %363 = vector.broadcast %34 : vector<1x256xf32> to vector<8x256xf32>
    %364 = vector.broadcast %348 : vector<8x1xf32> to vector<8x256xf32>
    %365 = arith.subf %363, %364 : vector<8x256xf32>
    %366 = arith.mulf %365, %365 : vector<8x256xf32>
    %367 = vector.broadcast %35 : vector<1x256xf32> to vector<8x256xf32>
    %368 = vector.broadcast %353 : vector<8x1xf32> to vector<8x256xf32>
    %369 = arith.subf %367, %368 : vector<8x256xf32>
    %370 = arith.mulf %369, %369 : vector<8x256xf32>
    %371 = arith.addf %366, %370 : vector<8x256xf32>
    %372 = arith.minimumf %278, %362 : vector<8x256xf32>
    %373 = arith.minimumf %279, %371 : vector<8x256xf32>
    %374 = vector.extract_strided_slice %329 {offsets = [0, 0], sizes = [8, 1], strides = [1, 1]} : vector<8x2xf32> to vector<8x1xf32>
    %375 = vector.broadcast %10 : vector<1x1xf32> to vector<8x1xf32>
    %376 = arith.mulf %375, %374 : vector<8x1xf32>
    %377 = vector.broadcast %12 : vector<1x1xf32> to vector<8x1xf32>
    %378 = arith.addf %376, %377 : vector<8x1xf32>
    %379 = vector.extract_strided_slice %333 {offsets = [0, 0], sizes = [8, 1], strides = [1, 1]} : vector<8x2xf32> to vector<8x1xf32>
    %380 = vector.broadcast %10 : vector<1x1xf32> to vector<8x1xf32>
    %381 = arith.mulf %380, %379 : vector<8x1xf32>
    %382 = vector.broadcast %14 : vector<1x1xf32> to vector<8x1xf32>
    %383 = arith.addf %381, %382 : vector<8x1xf32>
    %384 = vector.extract_strided_slice %329 {offsets = [0, 1], sizes = [8, 1], strides = [1, 1]} : vector<8x2xf32> to vector<8x1xf32>
    %385 = vector.broadcast %11 : vector<1x1xf32> to vector<8x1xf32>
    %386 = arith.mulf %385, %384 : vector<8x1xf32>
    %387 = vector.broadcast %13 : vector<1x1xf32> to vector<8x1xf32>
    %388 = arith.addf %386, %387 : vector<8x1xf32>
    %389 = vector.extract_strided_slice %333 {offsets = [0, 1], sizes = [8, 1], strides = [1, 1]} : vector<8x2xf32> to vector<8x1xf32>
    %390 = vector.broadcast %11 : vector<1x1xf32> to vector<8x1xf32>
    %391 = arith.mulf %390, %389 : vector<8x1xf32>
    %392 = vector.broadcast %15 : vector<1x1xf32> to vector<8x1xf32>
    %393 = arith.addf %391, %392 : vector<8x1xf32>
    %394 = vector.broadcast %34 : vector<1x256xf32> to vector<8x256xf32>
    %395 = vector.broadcast %378 : vector<8x1xf32> to vector<8x256xf32>
    %396 = arith.subf %394, %395 : vector<8x256xf32>
    %397 = arith.mulf %396, %396 : vector<8x256xf32>
    %398 = vector.broadcast %35 : vector<1x256xf32> to vector<8x256xf32>
    %399 = vector.broadcast %383 : vector<8x1xf32> to vector<8x256xf32>
    %400 = arith.subf %398, %399 : vector<8x256xf32>
    %401 = arith.mulf %400, %400 : vector<8x256xf32>
    %402 = arith.addf %397, %401 : vector<8x256xf32>
    %403 = vector.broadcast %34 : vector<1x256xf32> to vector<8x256xf32>
    %404 = vector.broadcast %388 : vector<8x1xf32> to vector<8x256xf32>
    %405 = arith.subf %403, %404 : vector<8x256xf32>
    %406 = arith.mulf %405, %405 : vector<8x256xf32>
    %407 = vector.broadcast %35 : vector<1x256xf32> to vector<8x256xf32>
    %408 = vector.broadcast %393 : vector<8x1xf32> to vector<8x256xf32>
    %409 = arith.subf %407, %408 : vector<8x256xf32>
    %410 = arith.mulf %409, %409 : vector<8x256xf32>
    %411 = arith.addf %406, %410 : vector<8x256xf32>
    %412 = arith.minimumf %318, %402 : vector<8x256xf32>
    %413 = arith.minimumf %319, %411 : vector<8x256xf32>
    %c4_i32 = arith.constant 4 : i32
    %c8_i32_58 = arith.constant 8 : i32
    %414 = arith.muli %c4_i32, %c8_i32_58 : i32
    %415 = tpu.assume_multiple %414, 8 : i32
    %416 = arith.index_cast %415 : i32 to index
    %c0_59 = arith.constant 0 : index
    %417 = vector.load %arg12[%416, %c0_59] : memref<256x2xf32, #tpu.memory_space<vmem>>, vector<8x2xf32>
    %c128_i32_60 = arith.constant 128 : i32
    %418 = arith.addi %415, %c128_i32_60 : i32
    %419 = arith.index_cast %418 : i32 to index
    %c0_61 = arith.constant 0 : index
    %420 = vector.load %arg12[%419, %c0_61] : memref<256x2xf32, #tpu.memory_space<vmem>>, vector<8x2xf32>
    %c64_i32_62 = arith.constant 64 : i32
    %421 = arith.addi %415, %c64_i32_62 : i32
    %422 = arith.index_cast %421 : i32 to index
    %c0_63 = arith.constant 0 : index
    %423 = vector.load %arg12[%422, %c0_63] : memref<256x2xf32, #tpu.memory_space<vmem>>, vector<8x2xf32>
    %c128_i32_64 = arith.constant 128 : i32
    %424 = arith.addi %415, %c128_i32_64 : i32
    %c64_i32_65 = arith.constant 64 : i32
    %425 = arith.addi %424, %c64_i32_65 : i32
    %426 = arith.index_cast %425 : i32 to index
    %c0_66 = arith.constant 0 : index
    %427 = vector.load %arg12[%426, %c0_66] : memref<256x2xf32, #tpu.memory_space<vmem>>, vector<8x2xf32>
    %428 = vector.extract_strided_slice %417 {offsets = [0, 0], sizes = [8, 1], strides = [1, 1]} : vector<8x2xf32> to vector<8x1xf32>
    %429 = vector.broadcast %10 : vector<1x1xf32> to vector<8x1xf32>
    %430 = arith.mulf %429, %428 : vector<8x1xf32>
    %431 = vector.broadcast %12 : vector<1x1xf32> to vector<8x1xf32>
    %432 = arith.addf %430, %431 : vector<8x1xf32>
    %433 = vector.extract_strided_slice %420 {offsets = [0, 0], sizes = [8, 1], strides = [1, 1]} : vector<8x2xf32> to vector<8x1xf32>
    %434 = vector.broadcast %10 : vector<1x1xf32> to vector<8x1xf32>
    %435 = arith.mulf %434, %433 : vector<8x1xf32>
    %436 = vector.broadcast %14 : vector<1x1xf32> to vector<8x1xf32>
    %437 = arith.addf %435, %436 : vector<8x1xf32>
    %438 = vector.extract_strided_slice %417 {offsets = [0, 1], sizes = [8, 1], strides = [1, 1]} : vector<8x2xf32> to vector<8x1xf32>
    %439 = vector.broadcast %11 : vector<1x1xf32> to vector<8x1xf32>
    %440 = arith.mulf %439, %438 : vector<8x1xf32>
    %441 = vector.broadcast %13 : vector<1x1xf32> to vector<8x1xf32>
    %442 = arith.addf %440, %441 : vector<8x1xf32>
    %443 = vector.extract_strided_slice %420 {offsets = [0, 1], sizes = [8, 1], strides = [1, 1]} : vector<8x2xf32> to vector<8x1xf32>
    %444 = vector.broadcast %11 : vector<1x1xf32> to vector<8x1xf32>
    %445 = arith.mulf %444, %443 : vector<8x1xf32>
    %446 = vector.broadcast %15 : vector<1x1xf32> to vector<8x1xf32>
    %447 = arith.addf %445, %446 : vector<8x1xf32>
    %448 = vector.broadcast %34 : vector<1x256xf32> to vector<8x256xf32>
    %449 = vector.broadcast %432 : vector<8x1xf32> to vector<8x256xf32>
    %450 = arith.subf %448, %449 : vector<8x256xf32>
    %451 = arith.mulf %450, %450 : vector<8x256xf32>
    %452 = vector.broadcast %35 : vector<1x256xf32> to vector<8x256xf32>
    %453 = vector.broadcast %437 : vector<8x1xf32> to vector<8x256xf32>
    %454 = arith.subf %452, %453 : vector<8x256xf32>
    %455 = arith.mulf %454, %454 : vector<8x256xf32>
    %456 = arith.addf %451, %455 : vector<8x256xf32>
    %457 = vector.broadcast %34 : vector<1x256xf32> to vector<8x256xf32>
    %458 = vector.broadcast %442 : vector<8x1xf32> to vector<8x256xf32>
    %459 = arith.subf %457, %458 : vector<8x256xf32>
    %460 = arith.mulf %459, %459 : vector<8x256xf32>
    %461 = vector.broadcast %35 : vector<1x256xf32> to vector<8x256xf32>
    %462 = vector.broadcast %447 : vector<8x1xf32> to vector<8x256xf32>
    %463 = arith.subf %461, %462 : vector<8x256xf32>
    %464 = arith.mulf %463, %463 : vector<8x256xf32>
    %465 = arith.addf %460, %464 : vector<8x256xf32>
    %466 = arith.minimumf %372, %456 : vector<8x256xf32>
    %467 = arith.minimumf %373, %465 : vector<8x256xf32>
    %468 = vector.extract_strided_slice %423 {offsets = [0, 0], sizes = [8, 1], strides = [1, 1]} : vector<8x2xf32> to vector<8x1xf32>
    %469 = vector.broadcast %10 : vector<1x1xf32> to vector<8x1xf32>
    %470 = arith.mulf %469, %468 : vector<8x1xf32>
    %471 = vector.broadcast %12 : vector<1x1xf32> to vector<8x1xf32>
    %472 = arith.addf %470, %471 : vector<8x1xf32>
    %473 = vector.extract_strided_slice %427 {offsets = [0, 0], sizes = [8, 1], strides = [1, 1]} : vector<8x2xf32> to vector<8x1xf32>
    %474 = vector.broadcast %10 : vector<1x1xf32> to vector<8x1xf32>
    %475 = arith.mulf %474, %473 : vector<8x1xf32>
    %476 = vector.broadcast %14 : vector<1x1xf32> to vector<8x1xf32>
    %477 = arith.addf %475, %476 : vector<8x1xf32>
    %478 = vector.extract_strided_slice %423 {offsets = [0, 1], sizes = [8, 1], strides = [1, 1]} : vector<8x2xf32> to vector<8x1xf32>
    %479 = vector.broadcast %11 : vector<1x1xf32> to vector<8x1xf32>
    %480 = arith.mulf %479, %478 : vector<8x1xf32>
    %481 = vector.broadcast %13 : vector<1x1xf32> to vector<8x1xf32>
    %482 = arith.addf %480, %481 : vector<8x1xf32>
    %483 = vector.extract_strided_slice %427 {offsets = [0, 1], sizes = [8, 1], strides = [1, 1]} : vector<8x2xf32> to vector<8x1xf32>
    %484 = vector.broadcast %11 : vector<1x1xf32> to vector<8x1xf32>
    %485 = arith.mulf %484, %483 : vector<8x1xf32>
    %486 = vector.broadcast %15 : vector<1x1xf32> to vector<8x1xf32>
    %487 = arith.addf %485, %486 : vector<8x1xf32>
    %488 = vector.broadcast %34 : vector<1x256xf32> to vector<8x256xf32>
    %489 = vector.broadcast %472 : vector<8x1xf32> to vector<8x256xf32>
    %490 = arith.subf %488, %489 : vector<8x256xf32>
    %491 = arith.mulf %490, %490 : vector<8x256xf32>
    %492 = vector.broadcast %35 : vector<1x256xf32> to vector<8x256xf32>
    %493 = vector.broadcast %477 : vector<8x1xf32> to vector<8x256xf32>
    %494 = arith.subf %492, %493 : vector<8x256xf32>
    %495 = arith.mulf %494, %494 : vector<8x256xf32>
    %496 = arith.addf %491, %495 : vector<8x256xf32>
    %497 = vector.broadcast %34 : vector<1x256xf32> to vector<8x256xf32>
    %498 = vector.broadcast %482 : vector<8x1xf32> to vector<8x256xf32>
    %499 = arith.subf %497, %498 : vector<8x256xf32>
    %500 = arith.mulf %499, %499 : vector<8x256xf32>
    %501 = vector.broadcast %35 : vector<1x256xf32> to vector<8x256xf32>
    %502 = vector.broadcast %487 : vector<8x1xf32> to vector<8x256xf32>
    %503 = arith.subf %501, %502 : vector<8x256xf32>
    %504 = arith.mulf %503, %503 : vector<8x256xf32>
    %505 = arith.addf %500, %504 : vector<8x256xf32>
    %506 = arith.minimumf %412, %496 : vector<8x256xf32>
    %507 = arith.minimumf %413, %505 : vector<8x256xf32>
    %c5_i32 = arith.constant 5 : i32
    %c8_i32_67 = arith.constant 8 : i32
    %508 = arith.muli %c5_i32, %c8_i32_67 : i32
    %509 = tpu.assume_multiple %508, 8 : i32
    %510 = arith.index_cast %509 : i32 to index
    %c0_68 = arith.constant 0 : index
    %511 = vector.load %arg12[%510, %c0_68] : memref<256x2xf32, #tpu.memory_space<vmem>>, vector<8x2xf32>
    %c128_i32_69 = arith.constant 128 : i32
    %512 = arith.addi %509, %c128_i32_69 : i32
    %513 = arith.index_cast %512 : i32 to index
    %c0_70 = arith.constant 0 : index
    %514 = vector.load %arg12[%513, %c0_70] : memref<256x2xf32, #tpu.memory_space<vmem>>, vector<8x2xf32>
    %c64_i32_71 = arith.constant 64 : i32
    %515 = arith.addi %509, %c64_i32_71 : i32
    %516 = arith.index_cast %515 : i32 to index
    %c0_72 = arith.constant 0 : index
    %517 = vector.load %arg12[%516, %c0_72] : memref<256x2xf32, #tpu.memory_space<vmem>>, vector<8x2xf32>
    %c128_i32_73 = arith.constant 128 : i32
    %518 = arith.addi %509, %c128_i32_73 : i32
    %c64_i32_74 = arith.constant 64 : i32
    %519 = arith.addi %518, %c64_i32_74 : i32
    %520 = arith.index_cast %519 : i32 to index
    %c0_75 = arith.constant 0 : index
    %521 = vector.load %arg12[%520, %c0_75] : memref<256x2xf32, #tpu.memory_space<vmem>>, vector<8x2xf32>
    %522 = vector.extract_strided_slice %511 {offsets = [0, 0], sizes = [8, 1], strides = [1, 1]} : vector<8x2xf32> to vector<8x1xf32>
    %523 = vector.broadcast %10 : vector<1x1xf32> to vector<8x1xf32>
    %524 = arith.mulf %523, %522 : vector<8x1xf32>
    %525 = vector.broadcast %12 : vector<1x1xf32> to vector<8x1xf32>
    %526 = arith.addf %524, %525 : vector<8x1xf32>
    %527 = vector.extract_strided_slice %514 {offsets = [0, 0], sizes = [8, 1], strides = [1, 1]} : vector<8x2xf32> to vector<8x1xf32>
    %528 = vector.broadcast %10 : vector<1x1xf32> to vector<8x1xf32>
    %529 = arith.mulf %528, %527 : vector<8x1xf32>
    %530 = vector.broadcast %14 : vector<1x1xf32> to vector<8x1xf32>
    %531 = arith.addf %529, %530 : vector<8x1xf32>
    %532 = vector.extract_strided_slice %511 {offsets = [0, 1], sizes = [8, 1], strides = [1, 1]} : vector<8x2xf32> to vector<8x1xf32>
    %533 = vector.broadcast %11 : vector<1x1xf32> to vector<8x1xf32>
    %534 = arith.mulf %533, %532 : vector<8x1xf32>
    %535 = vector.broadcast %13 : vector<1x1xf32> to vector<8x1xf32>
    %536 = arith.addf %534, %535 : vector<8x1xf32>
    %537 = vector.extract_strided_slice %514 {offsets = [0, 1], sizes = [8, 1], strides = [1, 1]} : vector<8x2xf32> to vector<8x1xf32>
    %538 = vector.broadcast %11 : vector<1x1xf32> to vector<8x1xf32>
    %539 = arith.mulf %538, %537 : vector<8x1xf32>
    %540 = vector.broadcast %15 : vector<1x1xf32> to vector<8x1xf32>
    %541 = arith.addf %539, %540 : vector<8x1xf32>
    %542 = vector.broadcast %34 : vector<1x256xf32> to vector<8x256xf32>
    %543 = vector.broadcast %526 : vector<8x1xf32> to vector<8x256xf32>
    %544 = arith.subf %542, %543 : vector<8x256xf32>
    %545 = arith.mulf %544, %544 : vector<8x256xf32>
    %546 = vector.broadcast %35 : vector<1x256xf32> to vector<8x256xf32>
    %547 = vector.broadcast %531 : vector<8x1xf32> to vector<8x256xf32>
    %548 = arith.subf %546, %547 : vector<8x256xf32>
    %549 = arith.mulf %548, %548 : vector<8x256xf32>
    %550 = arith.addf %545, %549 : vector<8x256xf32>
    %551 = vector.broadcast %34 : vector<1x256xf32> to vector<8x256xf32>
    %552 = vector.broadcast %536 : vector<8x1xf32> to vector<8x256xf32>
    %553 = arith.subf %551, %552 : vector<8x256xf32>
    %554 = arith.mulf %553, %553 : vector<8x256xf32>
    %555 = vector.broadcast %35 : vector<1x256xf32> to vector<8x256xf32>
    %556 = vector.broadcast %541 : vector<8x1xf32> to vector<8x256xf32>
    %557 = arith.subf %555, %556 : vector<8x256xf32>
    %558 = arith.mulf %557, %557 : vector<8x256xf32>
    %559 = arith.addf %554, %558 : vector<8x256xf32>
    %560 = arith.minimumf %466, %550 : vector<8x256xf32>
    %561 = arith.minimumf %467, %559 : vector<8x256xf32>
    %562 = vector.extract_strided_slice %517 {offsets = [0, 0], sizes = [8, 1], strides = [1, 1]} : vector<8x2xf32> to vector<8x1xf32>
    %563 = vector.broadcast %10 : vector<1x1xf32> to vector<8x1xf32>
    %564 = arith.mulf %563, %562 : vector<8x1xf32>
    %565 = vector.broadcast %12 : vector<1x1xf32> to vector<8x1xf32>
    %566 = arith.addf %564, %565 : vector<8x1xf32>
    %567 = vector.extract_strided_slice %521 {offsets = [0, 0], sizes = [8, 1], strides = [1, 1]} : vector<8x2xf32> to vector<8x1xf32>
    %568 = vector.broadcast %10 : vector<1x1xf32> to vector<8x1xf32>
    %569 = arith.mulf %568, %567 : vector<8x1xf32>
    %570 = vector.broadcast %14 : vector<1x1xf32> to vector<8x1xf32>
    %571 = arith.addf %569, %570 : vector<8x1xf32>
    %572 = vector.extract_strided_slice %517 {offsets = [0, 1], sizes = [8, 1], strides = [1, 1]} : vector<8x2xf32> to vector<8x1xf32>
    %573 = vector.broadcast %11 : vector<1x1xf32> to vector<8x1xf32>
    %574 = arith.mulf %573, %572 : vector<8x1xf32>
    %575 = vector.broadcast %13 : vector<1x1xf32> to vector<8x1xf32>
    %576 = arith.addf %574, %575 : vector<8x1xf32>
    %577 = vector.extract_strided_slice %521 {offsets = [0, 1], sizes = [8, 1], strides = [1, 1]} : vector<8x2xf32> to vector<8x1xf32>
    %578 = vector.broadcast %11 : vector<1x1xf32> to vector<8x1xf32>
    %579 = arith.mulf %578, %577 : vector<8x1xf32>
    %580 = vector.broadcast %15 : vector<1x1xf32> to vector<8x1xf32>
    %581 = arith.addf %579, %580 : vector<8x1xf32>
    %582 = vector.broadcast %34 : vector<1x256xf32> to vector<8x256xf32>
    %583 = vector.broadcast %566 : vector<8x1xf32> to vector<8x256xf32>
    %584 = arith.subf %582, %583 : vector<8x256xf32>
    %585 = arith.mulf %584, %584 : vector<8x256xf32>
    %586 = vector.broadcast %35 : vector<1x256xf32> to vector<8x256xf32>
    %587 = vector.broadcast %571 : vector<8x1xf32> to vector<8x256xf32>
    %588 = arith.subf %586, %587 : vector<8x256xf32>
    %589 = arith.mulf %588, %588 : vector<8x256xf32>
    %590 = arith.addf %585, %589 : vector<8x256xf32>
    %591 = vector.broadcast %34 : vector<1x256xf32> to vector<8x256xf32>
    %592 = vector.broadcast %576 : vector<8x1xf32> to vector<8x256xf32>
    %593 = arith.subf %591, %592 : vector<8x256xf32>
    %594 = arith.mulf %593, %593 : vector<8x256xf32>
    %595 = vector.broadcast %35 : vector<1x256xf32> to vector<8x256xf32>
    %596 = vector.broadcast %581 : vector<8x1xf32> to vector<8x256xf32>
    %597 = arith.subf %595, %596 : vector<8x256xf32>
    %598 = arith.mulf %597, %597 : vector<8x256xf32>
    %599 = arith.addf %594, %598 : vector<8x256xf32>
    %600 = arith.minimumf %506, %590 : vector<8x256xf32>
    %601 = arith.minimumf %507, %599 : vector<8x256xf32>
    %c6_i32 = arith.constant 6 : i32
    %c8_i32_76 = arith.constant 8 : i32
    %602 = arith.muli %c6_i32, %c8_i32_76 : i32
    %603 = tpu.assume_multiple %602, 8 : i32
    %604 = arith.index_cast %603 : i32 to index
    %c0_77 = arith.constant 0 : index
    %605 = vector.load %arg12[%604, %c0_77] : memref<256x2xf32, #tpu.memory_space<vmem>>, vector<8x2xf32>
    %c128_i32_78 = arith.constant 128 : i32
    %606 = arith.addi %603, %c128_i32_78 : i32
    %607 = arith.index_cast %606 : i32 to index
    %c0_79 = arith.constant 0 : index
    %608 = vector.load %arg12[%607, %c0_79] : memref<256x2xf32, #tpu.memory_space<vmem>>, vector<8x2xf32>
    %c64_i32_80 = arith.constant 64 : i32
    %609 = arith.addi %603, %c64_i32_80 : i32
    %610 = arith.index_cast %609 : i32 to index
    %c0_81 = arith.constant 0 : index
    %611 = vector.load %arg12[%610, %c0_81] : memref<256x2xf32, #tpu.memory_space<vmem>>, vector<8x2xf32>
    %c128_i32_82 = arith.constant 128 : i32
    %612 = arith.addi %603, %c128_i32_82 : i32
    %c64_i32_83 = arith.constant 64 : i32
    %613 = arith.addi %612, %c64_i32_83 : i32
    %614 = arith.index_cast %613 : i32 to index
    %c0_84 = arith.constant 0 : index
    %615 = vector.load %arg12[%614, %c0_84] : memref<256x2xf32, #tpu.memory_space<vmem>>, vector<8x2xf32>
    %616 = vector.extract_strided_slice %605 {offsets = [0, 0], sizes = [8, 1], strides = [1, 1]} : vector<8x2xf32> to vector<8x1xf32>
    %617 = vector.broadcast %10 : vector<1x1xf32> to vector<8x1xf32>
    %618 = arith.mulf %617, %616 : vector<8x1xf32>
    %619 = vector.broadcast %12 : vector<1x1xf32> to vector<8x1xf32>
    %620 = arith.addf %618, %619 : vector<8x1xf32>
    %621 = vector.extract_strided_slice %608 {offsets = [0, 0], sizes = [8, 1], strides = [1, 1]} : vector<8x2xf32> to vector<8x1xf32>
    %622 = vector.broadcast %10 : vector<1x1xf32> to vector<8x1xf32>
    %623 = arith.mulf %622, %621 : vector<8x1xf32>
    %624 = vector.broadcast %14 : vector<1x1xf32> to vector<8x1xf32>
    %625 = arith.addf %623, %624 : vector<8x1xf32>
    %626 = vector.extract_strided_slice %605 {offsets = [0, 1], sizes = [8, 1], strides = [1, 1]} : vector<8x2xf32> to vector<8x1xf32>
    %627 = vector.broadcast %11 : vector<1x1xf32> to vector<8x1xf32>
    %628 = arith.mulf %627, %626 : vector<8x1xf32>
    %629 = vector.broadcast %13 : vector<1x1xf32> to vector<8x1xf32>
    %630 = arith.addf %628, %629 : vector<8x1xf32>
    %631 = vector.extract_strided_slice %608 {offsets = [0, 1], sizes = [8, 1], strides = [1, 1]} : vector<8x2xf32> to vector<8x1xf32>
    %632 = vector.broadcast %11 : vector<1x1xf32> to vector<8x1xf32>
    %633 = arith.mulf %632, %631 : vector<8x1xf32>
    %634 = vector.broadcast %15 : vector<1x1xf32> to vector<8x1xf32>
    %635 = arith.addf %633, %634 : vector<8x1xf32>
    %636 = vector.broadcast %34 : vector<1x256xf32> to vector<8x256xf32>
    %637 = vector.broadcast %620 : vector<8x1xf32> to vector<8x256xf32>
    %638 = arith.subf %636, %637 : vector<8x256xf32>
    %639 = arith.mulf %638, %638 : vector<8x256xf32>
    %640 = vector.broadcast %35 : vector<1x256xf32> to vector<8x256xf32>
    %641 = vector.broadcast %625 : vector<8x1xf32> to vector<8x256xf32>
    %642 = arith.subf %640, %641 : vector<8x256xf32>
    %643 = arith.mulf %642, %642 : vector<8x256xf32>
    %644 = arith.addf %639, %643 : vector<8x256xf32>
    %645 = vector.broadcast %34 : vector<1x256xf32> to vector<8x256xf32>
    %646 = vector.broadcast %630 : vector<8x1xf32> to vector<8x256xf32>
    %647 = arith.subf %645, %646 : vector<8x256xf32>
    %648 = arith.mulf %647, %647 : vector<8x256xf32>
    %649 = vector.broadcast %35 : vector<1x256xf32> to vector<8x256xf32>
    %650 = vector.broadcast %635 : vector<8x1xf32> to vector<8x256xf32>
    %651 = arith.subf %649, %650 : vector<8x256xf32>
    %652 = arith.mulf %651, %651 : vector<8x256xf32>
    %653 = arith.addf %648, %652 : vector<8x256xf32>
    %654 = arith.minimumf %560, %644 : vector<8x256xf32>
    %655 = arith.minimumf %561, %653 : vector<8x256xf32>
    %656 = vector.extract_strided_slice %611 {offsets = [0, 0], sizes = [8, 1], strides = [1, 1]} : vector<8x2xf32> to vector<8x1xf32>
    %657 = vector.broadcast %10 : vector<1x1xf32> to vector<8x1xf32>
    %658 = arith.mulf %657, %656 : vector<8x1xf32>
    %659 = vector.broadcast %12 : vector<1x1xf32> to vector<8x1xf32>
    %660 = arith.addf %658, %659 : vector<8x1xf32>
    %661 = vector.extract_strided_slice %615 {offsets = [0, 0], sizes = [8, 1], strides = [1, 1]} : vector<8x2xf32> to vector<8x1xf32>
    %662 = vector.broadcast %10 : vector<1x1xf32> to vector<8x1xf32>
    %663 = arith.mulf %662, %661 : vector<8x1xf32>
    %664 = vector.broadcast %14 : vector<1x1xf32> to vector<8x1xf32>
    %665 = arith.addf %663, %664 : vector<8x1xf32>
    %666 = vector.extract_strided_slice %611 {offsets = [0, 1], sizes = [8, 1], strides = [1, 1]} : vector<8x2xf32> to vector<8x1xf32>
    %667 = vector.broadcast %11 : vector<1x1xf32> to vector<8x1xf32>
    %668 = arith.mulf %667, %666 : vector<8x1xf32>
    %669 = vector.broadcast %13 : vector<1x1xf32> to vector<8x1xf32>
    %670 = arith.addf %668, %669 : vector<8x1xf32>
    %671 = vector.extract_strided_slice %615 {offsets = [0, 1], sizes = [8, 1], strides = [1, 1]} : vector<8x2xf32> to vector<8x1xf32>
    %672 = vector.broadcast %11 : vector<1x1xf32> to vector<8x1xf32>
    %673 = arith.mulf %672, %671 : vector<8x1xf32>
    %674 = vector.broadcast %15 : vector<1x1xf32> to vector<8x1xf32>
    %675 = arith.addf %673, %674 : vector<8x1xf32>
    %676 = vector.broadcast %34 : vector<1x256xf32> to vector<8x256xf32>
    %677 = vector.broadcast %660 : vector<8x1xf32> to vector<8x256xf32>
    %678 = arith.subf %676, %677 : vector<8x256xf32>
    %679 = arith.mulf %678, %678 : vector<8x256xf32>
    %680 = vector.broadcast %35 : vector<1x256xf32> to vector<8x256xf32>
    %681 = vector.broadcast %665 : vector<8x1xf32> to vector<8x256xf32>
    %682 = arith.subf %680, %681 : vector<8x256xf32>
    %683 = arith.mulf %682, %682 : vector<8x256xf32>
    %684 = arith.addf %679, %683 : vector<8x256xf32>
    %685 = vector.broadcast %34 : vector<1x256xf32> to vector<8x256xf32>
    %686 = vector.broadcast %670 : vector<8x1xf32> to vector<8x256xf32>
    %687 = arith.subf %685, %686 : vector<8x256xf32>
    %688 = arith.mulf %687, %687 : vector<8x256xf32>
    %689 = vector.broadcast %35 : vector<1x256xf32> to vector<8x256xf32>
    %690 = vector.broadcast %675 : vector<8x1xf32> to vector<8x256xf32>
    %691 = arith.subf %689, %690 : vector<8x256xf32>
    %692 = arith.mulf %691, %691 : vector<8x256xf32>
    %693 = arith.addf %688, %692 : vector<8x256xf32>
    %694 = arith.minimumf %600, %684 : vector<8x256xf32>
    %695 = arith.minimumf %601, %693 : vector<8x256xf32>
    %c7_i32 = arith.constant 7 : i32
    %c8_i32_85 = arith.constant 8 : i32
    %696 = arith.muli %c7_i32, %c8_i32_85 : i32
    %697 = tpu.assume_multiple %696, 8 : i32
    %698 = arith.index_cast %697 : i32 to index
    %c0_86 = arith.constant 0 : index
    %699 = vector.load %arg12[%698, %c0_86] : memref<256x2xf32, #tpu.memory_space<vmem>>, vector<8x2xf32>
    %c128_i32_87 = arith.constant 128 : i32
    %700 = arith.addi %697, %c128_i32_87 : i32
    %701 = arith.index_cast %700 : i32 to index
    %c0_88 = arith.constant 0 : index
    %702 = vector.load %arg12[%701, %c0_88] : memref<256x2xf32, #tpu.memory_space<vmem>>, vector<8x2xf32>
    %c64_i32_89 = arith.constant 64 : i32
    %703 = arith.addi %697, %c64_i32_89 : i32
    %704 = arith.index_cast %703 : i32 to index
    %c0_90 = arith.constant 0 : index
    %705 = vector.load %arg12[%704, %c0_90] : memref<256x2xf32, #tpu.memory_space<vmem>>, vector<8x2xf32>
    %c128_i32_91 = arith.constant 128 : i32
    %706 = arith.addi %697, %c128_i32_91 : i32
    %c64_i32_92 = arith.constant 64 : i32
    %707 = arith.addi %706, %c64_i32_92 : i32
    %708 = arith.index_cast %707 : i32 to index
    %c0_93 = arith.constant 0 : index
    %709 = vector.load %arg12[%708, %c0_93] : memref<256x2xf32, #tpu.memory_space<vmem>>, vector<8x2xf32>
    %710 = vector.extract_strided_slice %699 {offsets = [0, 0], sizes = [8, 1], strides = [1, 1]} : vector<8x2xf32> to vector<8x1xf32>
    %711 = vector.broadcast %10 : vector<1x1xf32> to vector<8x1xf32>
    %712 = arith.mulf %711, %710 : vector<8x1xf32>
    %713 = vector.broadcast %12 : vector<1x1xf32> to vector<8x1xf32>
    %714 = arith.addf %712, %713 : vector<8x1xf32>
    %715 = vector.extract_strided_slice %702 {offsets = [0, 0], sizes = [8, 1], strides = [1, 1]} : vector<8x2xf32> to vector<8x1xf32>
    %716 = vector.broadcast %10 : vector<1x1xf32> to vector<8x1xf32>
    %717 = arith.mulf %716, %715 : vector<8x1xf32>
    %718 = vector.broadcast %14 : vector<1x1xf32> to vector<8x1xf32>
    %719 = arith.addf %717, %718 : vector<8x1xf32>
    %720 = vector.extract_strided_slice %699 {offsets = [0, 1], sizes = [8, 1], strides = [1, 1]} : vector<8x2xf32> to vector<8x1xf32>
    %721 = vector.broadcast %11 : vector<1x1xf32> to vector<8x1xf32>
    %722 = arith.mulf %721, %720 : vector<8x1xf32>
    %723 = vector.broadcast %13 : vector<1x1xf32> to vector<8x1xf32>
    %724 = arith.addf %722, %723 : vector<8x1xf32>
    %725 = vector.extract_strided_slice %702 {offsets = [0, 1], sizes = [8, 1], strides = [1, 1]} : vector<8x2xf32> to vector<8x1xf32>
    %726 = vector.broadcast %11 : vector<1x1xf32> to vector<8x1xf32>
    %727 = arith.mulf %726, %725 : vector<8x1xf32>
    %728 = vector.broadcast %15 : vector<1x1xf32> to vector<8x1xf32>
    %729 = arith.addf %727, %728 : vector<8x1xf32>
    %730 = vector.broadcast %34 : vector<1x256xf32> to vector<8x256xf32>
    %731 = vector.broadcast %714 : vector<8x1xf32> to vector<8x256xf32>
    %732 = arith.subf %730, %731 : vector<8x256xf32>
    %733 = arith.mulf %732, %732 : vector<8x256xf32>
    %734 = vector.broadcast %35 : vector<1x256xf32> to vector<8x256xf32>
    %735 = vector.broadcast %719 : vector<8x1xf32> to vector<8x256xf32>
    %736 = arith.subf %734, %735 : vector<8x256xf32>
    %737 = arith.mulf %736, %736 : vector<8x256xf32>
    %738 = arith.addf %733, %737 : vector<8x256xf32>
    %739 = vector.broadcast %34 : vector<1x256xf32> to vector<8x256xf32>
    %740 = vector.broadcast %724 : vector<8x1xf32> to vector<8x256xf32>
    %741 = arith.subf %739, %740 : vector<8x256xf32>
    %742 = arith.mulf %741, %741 : vector<8x256xf32>
    %743 = vector.broadcast %35 : vector<1x256xf32> to vector<8x256xf32>
    %744 = vector.broadcast %729 : vector<8x1xf32> to vector<8x256xf32>
    %745 = arith.subf %743, %744 : vector<8x256xf32>
    %746 = arith.mulf %745, %745 : vector<8x256xf32>
    %747 = arith.addf %742, %746 : vector<8x256xf32>
    %748 = arith.minimumf %654, %738 : vector<8x256xf32>
    %749 = arith.minimumf %655, %747 : vector<8x256xf32>
    %750 = vector.extract_strided_slice %705 {offsets = [0, 0], sizes = [8, 1], strides = [1, 1]} : vector<8x2xf32> to vector<8x1xf32>
    %751 = vector.broadcast %10 : vector<1x1xf32> to vector<8x1xf32>
    %752 = arith.mulf %751, %750 : vector<8x1xf32>
    %753 = vector.broadcast %12 : vector<1x1xf32> to vector<8x1xf32>
    %754 = arith.addf %752, %753 : vector<8x1xf32>
    %755 = vector.extract_strided_slice %709 {offsets = [0, 0], sizes = [8, 1], strides = [1, 1]} : vector<8x2xf32> to vector<8x1xf32>
    %756 = vector.broadcast %10 : vector<1x1xf32> to vector<8x1xf32>
    %757 = arith.mulf %756, %755 : vector<8x1xf32>
    %758 = vector.broadcast %14 : vector<1x1xf32> to vector<8x1xf32>
    %759 = arith.addf %757, %758 : vector<8x1xf32>
    %760 = vector.extract_strided_slice %705 {offsets = [0, 1], sizes = [8, 1], strides = [1, 1]} : vector<8x2xf32> to vector<8x1xf32>
    %761 = vector.broadcast %11 : vector<1x1xf32> to vector<8x1xf32>
    %762 = arith.mulf %761, %760 : vector<8x1xf32>
    %763 = vector.broadcast %13 : vector<1x1xf32> to vector<8x1xf32>
    %764 = arith.addf %762, %763 : vector<8x1xf32>
    %765 = vector.extract_strided_slice %709 {offsets = [0, 1], sizes = [8, 1], strides = [1, 1]} : vector<8x2xf32> to vector<8x1xf32>
    %766 = vector.broadcast %11 : vector<1x1xf32> to vector<8x1xf32>
    %767 = arith.mulf %766, %765 : vector<8x1xf32>
    %768 = vector.broadcast %15 : vector<1x1xf32> to vector<8x1xf32>
    %769 = arith.addf %767, %768 : vector<8x1xf32>
    %770 = vector.broadcast %34 : vector<1x256xf32> to vector<8x256xf32>
    %771 = vector.broadcast %754 : vector<8x1xf32> to vector<8x256xf32>
    %772 = arith.subf %770, %771 : vector<8x256xf32>
    %773 = arith.mulf %772, %772 : vector<8x256xf32>
    %774 = vector.broadcast %35 : vector<1x256xf32> to vector<8x256xf32>
    %775 = vector.broadcast %759 : vector<8x1xf32> to vector<8x256xf32>
    %776 = arith.subf %774, %775 : vector<8x256xf32>
    %777 = arith.mulf %776, %776 : vector<8x256xf32>
    %778 = arith.addf %773, %777 : vector<8x256xf32>
    %779 = vector.broadcast %34 : vector<1x256xf32> to vector<8x256xf32>
    %780 = vector.broadcast %764 : vector<8x1xf32> to vector<8x256xf32>
    %781 = arith.subf %779, %780 : vector<8x256xf32>
    %782 = arith.mulf %781, %781 : vector<8x256xf32>
    %783 = vector.broadcast %35 : vector<1x256xf32> to vector<8x256xf32>
    %784 = vector.broadcast %769 : vector<8x1xf32> to vector<8x256xf32>
    %785 = arith.subf %783, %784 : vector<8x256xf32>
    %786 = arith.mulf %785, %785 : vector<8x256xf32>
    %787 = arith.addf %782, %786 : vector<8x256xf32>
    %788 = arith.minimumf %694, %778 : vector<8x256xf32>
    %789 = arith.minimumf %695, %787 : vector<8x256xf32>
    %c8_i32_94 = arith.constant 8 : i32
    %cst_95 = arith.constant dense<0x7F800000> : vector<256xf32>
    %790 = vector.multi_reduction <minimumf>, %748, %cst_95 [0] : vector<8x256xf32> to vector<256xf32>
    %791 = vector.shape_cast %790 : vector<256xf32> to vector<1x256xf32>
    %cst_96 = arith.constant dense<0x7F800000> : vector<256xf32>
    %792 = vector.multi_reduction <minimumf>, %788, %cst_96 [0] : vector<8x256xf32> to vector<256xf32>
    %793 = vector.shape_cast %792 : vector<256xf32> to vector<1x256xf32>
    %cst_97 = arith.constant dense<0x7F800000> : vector<256xf32>
    %794 = vector.multi_reduction <minimumf>, %749, %cst_97 [0] : vector<8x256xf32> to vector<256xf32>
    %795 = vector.shape_cast %794 : vector<256xf32> to vector<1x256xf32>
    %cst_98 = arith.constant dense<0x7F800000> : vector<256xf32>
    %796 = vector.multi_reduction <minimumf>, %789, %cst_98 [0] : vector<8x256xf32> to vector<256xf32>
    %797 = vector.shape_cast %796 : vector<256xf32> to vector<1x256xf32>
    %cst_99 = arith.constant -2.000000e+01 : f32
    %798 = vector.broadcast %cst_99 : f32 to vector<1x256xf32>
    %799 = arith.mulf %791, %798 : vector<1x256xf32>
    %800 = math.exp %799 : vector<1x256xf32>
    %cst_100 = arith.constant -2.000000e+01 : f32
    %801 = vector.broadcast %cst_100 : f32 to vector<1x256xf32>
    %802 = arith.mulf %793, %801 : vector<1x256xf32>
    %803 = math.exp %802 : vector<1x256xf32>
    %cst_101 = arith.constant -2.000000e+01 : f32
    %804 = vector.broadcast %cst_101 : f32 to vector<1x256xf32>
    %805 = arith.mulf %795, %804 : vector<1x256xf32>
    %806 = math.exp %805 : vector<1x256xf32>
    %cst_102 = arith.constant -2.000000e+01 : f32
    %807 = vector.broadcast %cst_102 : f32 to vector<1x256xf32>
    %808 = arith.mulf %797, %807 : vector<1x256xf32>
    %809 = math.exp %808 : vector<1x256xf32>
    %810 = arith.minimumf %791, %793 : vector<1x256xf32>
    %cst_103 = arith.constant 0.0346573591 : f32
    %811 = vector.broadcast %cst_103 : f32 to vector<1x256xf32>
    %812 = arith.cmpf ogt, %810, %811 : vector<1x256xf32>
    %813 = arith.extui %812 : vector<1x256xi1> to vector<1x256xi32>
    %814 = arith.sitofp %813 : vector<1x256xi32> to vector<1x256xf32>
    %815 = arith.minimumf %795, %797 : vector<1x256xf32>
    %cst_104 = arith.constant 0.0346573591 : f32
    %816 = vector.broadcast %cst_104 : f32 to vector<1x256xf32>
    %817 = arith.cmpf ogt, %815, %816 : vector<1x256xf32>
    %818 = arith.extui %817 : vector<1x256xi1> to vector<1x256xi32>
    %819 = arith.sitofp %818 : vector<1x256xi32> to vector<1x256xf32>
    %c1_i32_105 = arith.constant 1 : i32
    %820 = tpu.dynamic_rotate %814 by %c1_i32_105 dim 1 : vector<1x256xf32>, i32 -> vector<1x256xf32>
    %c1_i32_106 = arith.constant 1 : i32
    %821 = tpu.dynamic_rotate %36 by %c1_i32_106 dim 1 : vector<1x256xf32>, i32 -> vector<1x256xf32>
    %822 = arith.cmpf oeq, %821, %36 : vector<1x256xf32>
    %cst_107 = arith.constant 1.000000e+00 : f32
    %823 = vector.broadcast %cst_107 : f32 to vector<1x256xf32>
    %824 = arith.select %822, %820, %823 : vector<1x256xi1>, vector<1x256xf32>
    %825 = arith.minimumf %814, %824 : vector<1x256xf32>
    %c255_i32 = arith.constant 255 : i32
    %826 = tpu.dynamic_rotate %825 by %c255_i32 dim 1 : vector<1x256xf32>, i32 -> vector<1x256xf32>
    %c255_i32_108 = arith.constant 255 : i32
    %827 = tpu.dynamic_rotate %36 by %c255_i32_108 dim 1 : vector<1x256xf32>, i32 -> vector<1x256xf32>
    %828 = arith.cmpf oeq, %827, %36 : vector<1x256xf32>
    %cst_109 = arith.constant 1.000000e+00 : f32
    %829 = vector.broadcast %cst_109 : f32 to vector<1x256xf32>
    %830 = arith.select %828, %826, %829 : vector<1x256xi1>, vector<1x256xf32>
    %831 = arith.minimumf %825, %830 : vector<1x256xf32>
    %c2_i32_110 = arith.constant 2 : i32
    %832 = tpu.dynamic_rotate %831 by %c2_i32_110 dim 1 : vector<1x256xf32>, i32 -> vector<1x256xf32>
    %c2_i32_111 = arith.constant 2 : i32
    %833 = tpu.dynamic_rotate %36 by %c2_i32_111 dim 1 : vector<1x256xf32>, i32 -> vector<1x256xf32>
    %834 = arith.cmpf oeq, %833, %36 : vector<1x256xf32>
    %cst_112 = arith.constant 1.000000e+00 : f32
    %835 = vector.broadcast %cst_112 : f32 to vector<1x256xf32>
    %836 = arith.select %834, %832, %835 : vector<1x256xi1>, vector<1x256xf32>
    %837 = arith.minimumf %831, %836 : vector<1x256xf32>
    %c254_i32 = arith.constant 254 : i32
    %838 = tpu.dynamic_rotate %837 by %c254_i32 dim 1 : vector<1x256xf32>, i32 -> vector<1x256xf32>
    %c254_i32_113 = arith.constant 254 : i32
    %839 = tpu.dynamic_rotate %36 by %c254_i32_113 dim 1 : vector<1x256xf32>, i32 -> vector<1x256xf32>
    %840 = arith.cmpf oeq, %839, %36 : vector<1x256xf32>
    %cst_114 = arith.constant 1.000000e+00 : f32
    %841 = vector.broadcast %cst_114 : f32 to vector<1x256xf32>
    %842 = arith.select %840, %838, %841 : vector<1x256xi1>, vector<1x256xf32>
    %843 = arith.minimumf %837, %842 : vector<1x256xf32>
    %c4_i32_115 = arith.constant 4 : i32
    %844 = tpu.dynamic_rotate %843 by %c4_i32_115 dim 1 : vector<1x256xf32>, i32 -> vector<1x256xf32>
    %c4_i32_116 = arith.constant 4 : i32
    %845 = tpu.dynamic_rotate %36 by %c4_i32_116 dim 1 : vector<1x256xf32>, i32 -> vector<1x256xf32>
    %846 = arith.cmpf oeq, %845, %36 : vector<1x256xf32>
    %cst_117 = arith.constant 1.000000e+00 : f32
    %847 = vector.broadcast %cst_117 : f32 to vector<1x256xf32>
    %848 = arith.select %846, %844, %847 : vector<1x256xi1>, vector<1x256xf32>
    %849 = arith.minimumf %843, %848 : vector<1x256xf32>
    %c252_i32 = arith.constant 252 : i32
    %850 = tpu.dynamic_rotate %849 by %c252_i32 dim 1 : vector<1x256xf32>, i32 -> vector<1x256xf32>
    %c252_i32_118 = arith.constant 252 : i32
    %851 = tpu.dynamic_rotate %36 by %c252_i32_118 dim 1 : vector<1x256xf32>, i32 -> vector<1x256xf32>
    %852 = arith.cmpf oeq, %851, %36 : vector<1x256xf32>
    %cst_119 = arith.constant 1.000000e+00 : f32
    %853 = vector.broadcast %cst_119 : f32 to vector<1x256xf32>
    %854 = arith.select %852, %850, %853 : vector<1x256xi1>, vector<1x256xf32>
    %855 = arith.minimumf %849, %854 : vector<1x256xf32>
    %c16_i32 = arith.constant 16 : i32
    %856 = tpu.dynamic_rotate %855 by %c16_i32 dim 1 : vector<1x256xf32>, i32 -> vector<1x256xf32>
    %c16_i32_120 = arith.constant 16 : i32
    %857 = tpu.dynamic_rotate %36 by %c16_i32_120 dim 1 : vector<1x256xf32>, i32 -> vector<1x256xf32>
    %858 = arith.subf %857, %36 : vector<1x256xf32>
    %859 = math.absf %858 : vector<1x256xf32>
    %cst_121 = arith.constant 1.000000e+00 : f32
    %860 = vector.broadcast %cst_121 : f32 to vector<1x256xf32>
    %861 = arith.cmpf oeq, %859, %860 : vector<1x256xf32>
    %cst_122 = arith.constant 1.000000e+00 : f32
    %862 = vector.broadcast %cst_122 : f32 to vector<1x256xf32>
    %863 = arith.select %861, %856, %862 : vector<1x256xi1>, vector<1x256xf32>
    %864 = arith.minimumf %855, %863 : vector<1x256xf32>
    %c240_i32 = arith.constant 240 : i32
    %865 = tpu.dynamic_rotate %864 by %c240_i32 dim 1 : vector<1x256xf32>, i32 -> vector<1x256xf32>
    %c240_i32_123 = arith.constant 240 : i32
    %866 = tpu.dynamic_rotate %36 by %c240_i32_123 dim 1 : vector<1x256xf32>, i32 -> vector<1x256xf32>
    %867 = arith.subf %866, %36 : vector<1x256xf32>
    %868 = math.absf %867 : vector<1x256xf32>
    %cst_124 = arith.constant 1.000000e+00 : f32
    %869 = vector.broadcast %cst_124 : f32 to vector<1x256xf32>
    %870 = arith.cmpf oeq, %868, %869 : vector<1x256xf32>
    %cst_125 = arith.constant 1.000000e+00 : f32
    %871 = vector.broadcast %cst_125 : f32 to vector<1x256xf32>
    %872 = arith.select %870, %865, %871 : vector<1x256xi1>, vector<1x256xf32>
    %873 = arith.minimumf %864, %872 : vector<1x256xf32>
    %c32_i32 = arith.constant 32 : i32
    %874 = tpu.dynamic_rotate %873 by %c32_i32 dim 1 : vector<1x256xf32>, i32 -> vector<1x256xf32>
    %c32_i32_126 = arith.constant 32 : i32
    %875 = tpu.dynamic_rotate %36 by %c32_i32_126 dim 1 : vector<1x256xf32>, i32 -> vector<1x256xf32>
    %876 = arith.subf %875, %36 : vector<1x256xf32>
    %877 = math.absf %876 : vector<1x256xf32>
    %cst_127 = arith.constant 2.000000e+00 : f32
    %878 = vector.broadcast %cst_127 : f32 to vector<1x256xf32>
    %879 = arith.cmpf oeq, %877, %878 : vector<1x256xf32>
    %cst_128 = arith.constant 1.000000e+00 : f32
    %880 = vector.broadcast %cst_128 : f32 to vector<1x256xf32>
    %881 = arith.select %879, %874, %880 : vector<1x256xi1>, vector<1x256xf32>
    %882 = arith.minimumf %873, %881 : vector<1x256xf32>
    %c224_i32 = arith.constant 224 : i32
    %883 = tpu.dynamic_rotate %882 by %c224_i32 dim 1 : vector<1x256xf32>, i32 -> vector<1x256xf32>
    %c224_i32_129 = arith.constant 224 : i32
    %884 = tpu.dynamic_rotate %36 by %c224_i32_129 dim 1 : vector<1x256xf32>, i32 -> vector<1x256xf32>
    %885 = arith.subf %884, %36 : vector<1x256xf32>
    %886 = math.absf %885 : vector<1x256xf32>
    %cst_130 = arith.constant 2.000000e+00 : f32
    %887 = vector.broadcast %cst_130 : f32 to vector<1x256xf32>
    %888 = arith.cmpf oeq, %886, %887 : vector<1x256xf32>
    %cst_131 = arith.constant 1.000000e+00 : f32
    %889 = vector.broadcast %cst_131 : f32 to vector<1x256xf32>
    %890 = arith.select %888, %883, %889 : vector<1x256xi1>, vector<1x256xf32>
    %891 = arith.minimumf %882, %890 : vector<1x256xf32>
    %c64_i32_132 = arith.constant 64 : i32
    %892 = tpu.dynamic_rotate %891 by %c64_i32_132 dim 1 : vector<1x256xf32>, i32 -> vector<1x256xf32>
    %c64_i32_133 = arith.constant 64 : i32
    %893 = tpu.dynamic_rotate %36 by %c64_i32_133 dim 1 : vector<1x256xf32>, i32 -> vector<1x256xf32>
    %894 = arith.subf %893, %36 : vector<1x256xf32>
    %895 = math.absf %894 : vector<1x256xf32>
    %cst_134 = arith.constant 4.000000e+00 : f32
    %896 = vector.broadcast %cst_134 : f32 to vector<1x256xf32>
    %897 = arith.cmpf oeq, %895, %896 : vector<1x256xf32>
    %cst_135 = arith.constant 1.000000e+00 : f32
    %898 = vector.broadcast %cst_135 : f32 to vector<1x256xf32>
    %899 = arith.select %897, %892, %898 : vector<1x256xi1>, vector<1x256xf32>
    %900 = arith.minimumf %891, %899 : vector<1x256xf32>
    %c192_i32 = arith.constant 192 : i32
    %901 = tpu.dynamic_rotate %900 by %c192_i32 dim 1 : vector<1x256xf32>, i32 -> vector<1x256xf32>
    %c192_i32_136 = arith.constant 192 : i32
    %902 = tpu.dynamic_rotate %36 by %c192_i32_136 dim 1 : vector<1x256xf32>, i32 -> vector<1x256xf32>
    %903 = arith.subf %902, %36 : vector<1x256xf32>
    %904 = math.absf %903 : vector<1x256xf32>
    %cst_137 = arith.constant 4.000000e+00 : f32
    %905 = vector.broadcast %cst_137 : f32 to vector<1x256xf32>
    %906 = arith.cmpf oeq, %904, %905 : vector<1x256xf32>
    %cst_138 = arith.constant 1.000000e+00 : f32
    %907 = vector.broadcast %cst_138 : f32 to vector<1x256xf32>
    %908 = arith.select %906, %901, %907 : vector<1x256xi1>, vector<1x256xf32>
    %909 = arith.minimumf %900, %908 : vector<1x256xf32>
    %c1_i32_139 = arith.constant 1 : i32
    %910 = tpu.dynamic_rotate %814 by %c1_i32_139 dim 1 : vector<1x256xf32>, i32 -> vector<1x256xf32>
    %c1_i32_140 = arith.constant 1 : i32
    %911 = tpu.dynamic_rotate %36 by %c1_i32_140 dim 1 : vector<1x256xf32>, i32 -> vector<1x256xf32>
    %912 = arith.cmpf oeq, %911, %36 : vector<1x256xf32>
    %cst_141 = arith.constant 1.000000e+00 : f32
    %913 = vector.broadcast %cst_141 : f32 to vector<1x256xf32>
    %914 = arith.select %912, %910, %913 : vector<1x256xi1>, vector<1x256xf32>
    %915 = arith.minimumf %814, %914 : vector<1x256xf32>
    %c255_i32_142 = arith.constant 255 : i32
    %916 = tpu.dynamic_rotate %915 by %c255_i32_142 dim 1 : vector<1x256xf32>, i32 -> vector<1x256xf32>
    %c255_i32_143 = arith.constant 255 : i32
    %917 = tpu.dynamic_rotate %36 by %c255_i32_143 dim 1 : vector<1x256xf32>, i32 -> vector<1x256xf32>
    %918 = arith.cmpf oeq, %917, %36 : vector<1x256xf32>
    %cst_144 = arith.constant 1.000000e+00 : f32
    %919 = vector.broadcast %cst_144 : f32 to vector<1x256xf32>
    %920 = arith.select %918, %916, %919 : vector<1x256xi1>, vector<1x256xf32>
    %921 = arith.minimumf %915, %920 : vector<1x256xf32>
    %c16_i32_145 = arith.constant 16 : i32
    %922 = tpu.dynamic_rotate %921 by %c16_i32_145 dim 1 : vector<1x256xf32>, i32 -> vector<1x256xf32>
    %c16_i32_146 = arith.constant 16 : i32
    %923 = tpu.dynamic_rotate %36 by %c16_i32_146 dim 1 : vector<1x256xf32>, i32 -> vector<1x256xf32>
    %924 = arith.subf %923, %36 : vector<1x256xf32>
    %925 = math.absf %924 : vector<1x256xf32>
    %cst_147 = arith.constant 1.000000e+00 : f32
    %926 = vector.broadcast %cst_147 : f32 to vector<1x256xf32>
    %927 = arith.cmpf oeq, %925, %926 : vector<1x256xf32>
    %cst_148 = arith.constant 1.000000e+00 : f32
    %928 = vector.broadcast %cst_148 : f32 to vector<1x256xf32>
    %929 = arith.select %927, %922, %928 : vector<1x256xi1>, vector<1x256xf32>
    %930 = arith.minimumf %921, %929 : vector<1x256xf32>
    %c240_i32_149 = arith.constant 240 : i32
    %931 = tpu.dynamic_rotate %930 by %c240_i32_149 dim 1 : vector<1x256xf32>, i32 -> vector<1x256xf32>
    %c240_i32_150 = arith.constant 240 : i32
    %932 = tpu.dynamic_rotate %36 by %c240_i32_150 dim 1 : vector<1x256xf32>, i32 -> vector<1x256xf32>
    %933 = arith.subf %932, %36 : vector<1x256xf32>
    %934 = math.absf %933 : vector<1x256xf32>
    %cst_151 = arith.constant 1.000000e+00 : f32
    %935 = vector.broadcast %cst_151 : f32 to vector<1x256xf32>
    %936 = arith.cmpf oeq, %934, %935 : vector<1x256xf32>
    %cst_152 = arith.constant 1.000000e+00 : f32
    %937 = vector.broadcast %cst_152 : f32 to vector<1x256xf32>
    %938 = arith.select %936, %931, %937 : vector<1x256xi1>, vector<1x256xf32>
    %939 = arith.minimumf %930, %938 : vector<1x256xf32>
    %c1_i32_153 = arith.constant 1 : i32
    %940 = tpu.dynamic_rotate %819 by %c1_i32_153 dim 1 : vector<1x256xf32>, i32 -> vector<1x256xf32>
    %c1_i32_154 = arith.constant 1 : i32
    %941 = tpu.dynamic_rotate %36 by %c1_i32_154 dim 1 : vector<1x256xf32>, i32 -> vector<1x256xf32>
    %942 = arith.cmpf oeq, %941, %36 : vector<1x256xf32>
    %cst_155 = arith.constant 1.000000e+00 : f32
    %943 = vector.broadcast %cst_155 : f32 to vector<1x256xf32>
    %944 = arith.select %942, %940, %943 : vector<1x256xi1>, vector<1x256xf32>
    %945 = arith.minimumf %819, %944 : vector<1x256xf32>
    %c255_i32_156 = arith.constant 255 : i32
    %946 = tpu.dynamic_rotate %945 by %c255_i32_156 dim 1 : vector<1x256xf32>, i32 -> vector<1x256xf32>
    %c255_i32_157 = arith.constant 255 : i32
    %947 = tpu.dynamic_rotate %36 by %c255_i32_157 dim 1 : vector<1x256xf32>, i32 -> vector<1x256xf32>
    %948 = arith.cmpf oeq, %947, %36 : vector<1x256xf32>
    %cst_158 = arith.constant 1.000000e+00 : f32
    %949 = vector.broadcast %cst_158 : f32 to vector<1x256xf32>
    %950 = arith.select %948, %946, %949 : vector<1x256xi1>, vector<1x256xf32>
    %951 = arith.minimumf %945, %950 : vector<1x256xf32>
    %c16_i32_159 = arith.constant 16 : i32
    %952 = tpu.dynamic_rotate %951 by %c16_i32_159 dim 1 : vector<1x256xf32>, i32 -> vector<1x256xf32>
    %c16_i32_160 = arith.constant 16 : i32
    %953 = tpu.dynamic_rotate %36 by %c16_i32_160 dim 1 : vector<1x256xf32>, i32 -> vector<1x256xf32>
    %954 = arith.subf %953, %36 : vector<1x256xf32>
    %955 = math.absf %954 : vector<1x256xf32>
    %cst_161 = arith.constant 1.000000e+00 : f32
    %956 = vector.broadcast %cst_161 : f32 to vector<1x256xf32>
    %957 = arith.cmpf oeq, %955, %956 : vector<1x256xf32>
    %cst_162 = arith.constant 1.000000e+00 : f32
    %958 = vector.broadcast %cst_162 : f32 to vector<1x256xf32>
    %959 = arith.select %957, %952, %958 : vector<1x256xi1>, vector<1x256xf32>
    %960 = arith.minimumf %951, %959 : vector<1x256xf32>
    %c240_i32_163 = arith.constant 240 : i32
    %961 = tpu.dynamic_rotate %960 by %c240_i32_163 dim 1 : vector<1x256xf32>, i32 -> vector<1x256xf32>
    %c240_i32_164 = arith.constant 240 : i32
    %962 = tpu.dynamic_rotate %36 by %c240_i32_164 dim 1 : vector<1x256xf32>, i32 -> vector<1x256xf32>
    %963 = arith.subf %962, %36 : vector<1x256xf32>
    %964 = math.absf %963 : vector<1x256xf32>
    %cst_165 = arith.constant 1.000000e+00 : f32
    %965 = vector.broadcast %cst_165 : f32 to vector<1x256xf32>
    %966 = arith.cmpf oeq, %964, %965 : vector<1x256xf32>
    %cst_166 = arith.constant 1.000000e+00 : f32
    %967 = vector.broadcast %cst_166 : f32 to vector<1x256xf32>
    %968 = arith.select %966, %961, %967 : vector<1x256xi1>, vector<1x256xf32>
    %969 = arith.minimumf %960, %968 : vector<1x256xf32>
    %970 = arith.divf %10, %11 : vector<1x1xf32>
    %971 = vector.broadcast %13 : vector<1x1xf32> to vector<1x256xf32>
    %972 = arith.subf %34, %971 : vector<1x256xf32>
    %973 = vector.broadcast %970 : vector<1x1xf32> to vector<1x256xf32>
    %974 = arith.mulf %972, %973 : vector<1x256xf32>
    %975 = vector.broadcast %12 : vector<1x1xf32> to vector<1x256xf32>
    %976 = arith.addf %974, %975 : vector<1x256xf32>
    %977 = vector.broadcast %15 : vector<1x1xf32> to vector<1x256xf32>
    %978 = arith.subf %35, %977 : vector<1x256xf32>
    %979 = vector.broadcast %970 : vector<1x1xf32> to vector<1x256xf32>
    %980 = arith.mulf %978, %979 : vector<1x256xf32>
    %981 = vector.broadcast %14 : vector<1x1xf32> to vector<1x256xf32>
    %982 = arith.addf %980, %981 : vector<1x256xf32>
    %c0_167 = arith.constant 0 : index
    %c6 = arith.constant 6 : index
    %c0_168 = arith.constant 0 : index
    %983 = vector.load %arg10[%c0_167, %c6, %c0_168] : memref<1x29x256xf32, #tpu.memory_space<vmem>>, vector<1x1x256xf32>
    %984 = vector.shape_cast %983 : vector<1x1x256xf32> to vector<1x256xf32>
    %985 = vector.shape_cast %909 : vector<1x256xf32> to vector<1x1x256xf32>
    tpu.vector_store %arg10[%c0_167, %c6, %c0_168], %985 {strides = array<i32>} : memref<1x29x256xf32, #tpu.memory_space<vmem>>, vector<1x1x256xf32>,
    %c0_169 = arith.constant 0 : index
    %c10 = arith.constant 10 : index
    %c0_170 = arith.constant 0 : index
    %986 = vector.load %arg10[%c0_169, %c10, %c0_170] : memref<1x29x256xf32, #tpu.memory_space<vmem>>, vector<1x1x256xf32>
    %987 = vector.shape_cast %986 : vector<1x1x256xf32> to vector<1x256xf32>
    %988 = vector.shape_cast %800 : vector<1x256xf32> to vector<1x1x256xf32>
    tpu.vector_store %arg10[%c0_169, %c10, %c0_170], %988 {strides = array<i32>} : memref<1x29x256xf32, #tpu.memory_space<vmem>>, vector<1x1x256xf32>,
    %c0_171 = arith.constant 0 : index
    %c11 = arith.constant 11 : index
    %c0_172 = arith.constant 0 : index
    %989 = vector.load %arg10[%c0_171, %c11, %c0_172] : memref<1x29x256xf32, #tpu.memory_space<vmem>>, vector<1x1x256xf32>
    %990 = vector.shape_cast %989 : vector<1x1x256xf32> to vector<1x256xf32>
    %991 = vector.shape_cast %803 : vector<1x256xf32> to vector<1x1x256xf32>
    tpu.vector_store %arg10[%c0_171, %c11, %c0_172], %991 {strides = array<i32>} : memref<1x29x256xf32, #tpu.memory_space<vmem>>, vector<1x1x256xf32>,
    %c0_173 = arith.constant 0 : index
    %c12 = arith.constant 12 : index
    %c0_174 = arith.constant 0 : index
    %992 = vector.load %arg10[%c0_173, %c12, %c0_174] : memref<1x29x256xf32, #tpu.memory_space<vmem>>, vector<1x1x256xf32>
    %993 = vector.shape_cast %992 : vector<1x1x256xf32> to vector<1x256xf32>
    %994 = vector.shape_cast %814 : vector<1x256xf32> to vector<1x1x256xf32>
    tpu.vector_store %arg10[%c0_173, %c12, %c0_174], %994 {strides = array<i32>} : memref<1x29x256xf32, #tpu.memory_space<vmem>>, vector<1x1x256xf32>,
    %c0_175 = arith.constant 0 : index
    %c16 = arith.constant 16 : index
    %c0_176 = arith.constant 0 : index
    %995 = vector.load %arg10[%c0_175, %c16, %c0_176] : memref<1x29x256xf32, #tpu.memory_space<vmem>>, vector<1x1x256xf32>
    %996 = vector.shape_cast %995 : vector<1x1x256xf32> to vector<1x256xf32>
    %997 = vector.shape_cast %806 : vector<1x256xf32> to vector<1x1x256xf32>
    tpu.vector_store %arg10[%c0_175, %c16, %c0_176], %997 {strides = array<i32>} : memref<1x29x256xf32, #tpu.memory_space<vmem>>, vector<1x1x256xf32>,
    %c0_177 = arith.constant 0 : index
    %c17 = arith.constant 17 : index
    %c0_178 = arith.constant 0 : index
    %998 = vector.load %arg10[%c0_177, %c17, %c0_178] : memref<1x29x256xf32, #tpu.memory_space<vmem>>, vector<1x1x256xf32>
    %999 = vector.shape_cast %998 : vector<1x1x256xf32> to vector<1x256xf32>
    %1000 = vector.shape_cast %809 : vector<1x256xf32> to vector<1x1x256xf32>
    tpu.vector_store %arg10[%c0_177, %c17, %c0_178], %1000 {strides = array<i32>} : memref<1x29x256xf32, #tpu.memory_space<vmem>>, vector<1x1x256xf32>,
    %c0_179 = arith.constant 0 : index
    %c18 = arith.constant 18 : index
    %c0_180 = arith.constant 0 : index
    %1001 = vector.load %arg10[%c0_179, %c18, %c0_180] : memref<1x29x256xf32, #tpu.memory_space<vmem>>, vector<1x1x256xf32>
    %1002 = vector.shape_cast %1001 : vector<1x1x256xf32> to vector<1x256xf32>
    %1003 = vector.shape_cast %819 : vector<1x256xf32> to vector<1x1x256xf32>
    tpu.vector_store %arg10[%c0_179, %c18, %c0_180], %1003 {strides = array<i32>} : memref<1x29x256xf32, #tpu.memory_space<vmem>>, vector<1x1x256xf32>,
    %c0_181 = arith.constant 0 : index
    %c19 = arith.constant 19 : index
    %c0_182 = arith.constant 0 : index
    %1004 = vector.load %arg10[%c0_181, %c19, %c0_182] : memref<1x29x256xf32, #tpu.memory_space<vmem>>, vector<1x1x256xf32>
    %1005 = vector.shape_cast %1004 : vector<1x1x256xf32> to vector<1x256xf32>
    %1006 = vector.shape_cast %800 : vector<1x256xf32> to vector<1x1x256xf32>
    tpu.vector_store %arg10[%c0_181, %c19, %c0_182], %1006 {strides = array<i32>} : memref<1x29x256xf32, #tpu.memory_space<vmem>>, vector<1x1x256xf32>,
    %c0_183 = arith.constant 0 : index
    %c20 = arith.constant 20 : index
    %c0_184 = arith.constant 0 : index
    %1007 = vector.load %arg10[%c0_183, %c20, %c0_184] : memref<1x29x256xf32, #tpu.memory_space<vmem>>, vector<1x1x256xf32>
    %1008 = vector.shape_cast %1007 : vector<1x1x256xf32> to vector<1x256xf32>
    %1009 = vector.shape_cast %803 : vector<1x256xf32> to vector<1x1x256xf32>
    tpu.vector_store %arg10[%c0_183, %c20, %c0_184], %1009 {strides = array<i32>} : memref<1x29x256xf32, #tpu.memory_space<vmem>>, vector<1x1x256xf32>,
    %c0_185 = arith.constant 0 : index
    %c21 = arith.constant 21 : index
    %c0_186 = arith.constant 0 : index
    %1010 = vector.load %arg10[%c0_185, %c21, %c0_186] : memref<1x29x256xf32, #tpu.memory_space<vmem>>, vector<1x1x256xf32>
    %1011 = vector.shape_cast %1010 : vector<1x1x256xf32> to vector<1x256xf32>
    %1012 = vector.shape_cast %814 : vector<1x256xf32> to vector<1x1x256xf32>
    tpu.vector_store %arg10[%c0_185, %c21, %c0_186], %1012 {strides = array<i32>} : memref<1x29x256xf32, #tpu.memory_space<vmem>>, vector<1x1x256xf32>,
    %c0_187 = arith.constant 0 : index
    %c22 = arith.constant 22 : index
    %c0_188 = arith.constant 0 : index
    %1013 = vector.load %arg10[%c0_187, %c22, %c0_188] : memref<1x29x256xf32, #tpu.memory_space<vmem>>, vector<1x1x256xf32>
    %1014 = vector.shape_cast %1013 : vector<1x1x256xf32> to vector<1x256xf32>
    %1015 = vector.shape_cast %806 : vector<1x256xf32> to vector<1x1x256xf32>
    tpu.vector_store %arg10[%c0_187, %c22, %c0_188], %1015 {strides = array<i32>} : memref<1x29x256xf32, #tpu.memory_space<vmem>>, vector<1x1x256xf32>,
    %c0_189 = arith.constant 0 : index
    %c23 = arith.constant 23 : index
    %c0_190 = arith.constant 0 : index
    %1016 = vector.load %arg10[%c0_189, %c23, %c0_190] : memref<1x29x256xf32, #tpu.memory_space<vmem>>, vector<1x1x256xf32>
    %1017 = vector.shape_cast %1016 : vector<1x1x256xf32> to vector<1x256xf32>
    %1018 = vector.shape_cast %809 : vector<1x256xf32> to vector<1x1x256xf32>
    tpu.vector_store %arg10[%c0_189, %c23, %c0_190], %1018 {strides = array<i32>} : memref<1x29x256xf32, #tpu.memory_space<vmem>>, vector<1x1x256xf32>,
    %c0_191 = arith.constant 0 : index
    %c24 = arith.constant 24 : index
    %c0_192 = arith.constant 0 : index
    %1019 = vector.load %arg10[%c0_191, %c24, %c0_192] : memref<1x29x256xf32, #tpu.memory_space<vmem>>, vector<1x1x256xf32>
    %1020 = vector.shape_cast %1019 : vector<1x1x256xf32> to vector<1x256xf32>
    %1021 = vector.shape_cast %819 : vector<1x256xf32> to vector<1x1x256xf32>
    tpu.vector_store %arg10[%c0_191, %c24, %c0_192], %1021 {strides = array<i32>} : memref<1x29x256xf32, #tpu.memory_space<vmem>>, vector<1x1x256xf32>,
    %c0_193 = arith.constant 0 : index
    %c25 = arith.constant 25 : index
    %c0_194 = arith.constant 0 : index
    %1022 = vector.load %arg10[%c0_193, %c25, %c0_194] : memref<1x29x256xf32, #tpu.memory_space<vmem>>, vector<1x1x256xf32>
    %1023 = vector.shape_cast %1022 : vector<1x1x256xf32> to vector<1x256xf32>
    %1024 = vector.shape_cast %939 : vector<1x256xf32> to vector<1x1x256xf32>
    tpu.vector_store %arg10[%c0_193, %c25, %c0_194], %1024 {strides = array<i32>} : memref<1x29x256xf32, #tpu.memory_space<vmem>>, vector<1x1x256xf32>,
    %c0_195 = arith.constant 0 : index
    %c26 = arith.constant 26 : index
    %c0_196 = arith.constant 0 : index
    %1025 = vector.load %arg10[%c0_195, %c26, %c0_196] : memref<1x29x256xf32, #tpu.memory_space<vmem>>, vector<1x1x256xf32>
    %1026 = vector.shape_cast %1025 : vector<1x1x256xf32> to vector<1x256xf32>
    %1027 = vector.shape_cast %969 : vector<1x256xf32> to vector<1x1x256xf32>
    tpu.vector_store %arg10[%c0_195, %c26, %c0_196], %1027 {strides = array<i32>} : memref<1x29x256xf32, #tpu.memory_space<vmem>>, vector<1x1x256xf32>,
    %c0_197 = arith.constant 0 : index
    %c27 = arith.constant 27 : index
    %c0_198 = arith.constant 0 : index
    %1028 = vector.load %arg10[%c0_197, %c27, %c0_198] : memref<1x29x256xf32, #tpu.memory_space<vmem>>, vector<1x1x256xf32>
    %1029 = vector.shape_cast %1028 : vector<1x1x256xf32> to vector<1x256xf32>
    %1030 = vector.shape_cast %976 : vector<1x256xf32> to vector<1x1x256xf32>
    tpu.vector_store %arg10[%c0_197, %c27, %c0_198], %1030 {strides = array<i32>} : memref<1x29x256xf32, #tpu.memory_space<vmem>>, vector<1x1x256xf32>,
    %c0_199 = arith.constant 0 : index
    %c28 = arith.constant 28 : index
    %c0_200 = arith.constant 0 : index
    %1031 = vector.load %arg10[%c0_199, %c28, %c0_200] : memref<1x29x256xf32, #tpu.memory_space<vmem>>, vector<1x1x256xf32>
    %1032 = vector.shape_cast %1031 : vector<1x1x256xf32> to vector<1x256xf32>
    %1033 = vector.shape_cast %982 : vector<1x256xf32> to vector<1x1x256xf32>
    tpu.vector_store %arg10[%c0_199, %c28, %c0_200], %1033 {strides = array<i32>} : memref<1x29x256xf32, #tpu.memory_space<vmem>>, vector<1x1x256xf32>,
    %cst_201 = arith.constant 1.000000e+00 : f32
    %1034 = vector.broadcast %cst_201 : f32 to vector<1x256xf32>
    %1035 = arith.addf %976, %1034 : vector<1x256xf32>
    %cst_202 = arith.constant 8.000000e+00 : f32
    %1036 = vector.broadcast %cst_202 : f32 to vector<1x256xf32>
    %1037 = arith.mulf %1035, %1036 : vector<1x256xf32>
    %cst_203 = arith.constant 5.000000e-01 : f32
    %1038 = vector.broadcast %cst_203 : f32 to vector<1x256xf32>
    %1039 = arith.subf %1037, %1038 : vector<1x256xf32>
    %cst_204 = arith.constant 1.000000e+00 : f32
    %1040 = vector.broadcast %cst_204 : f32 to vector<1x256xf32>
    %1041 = arith.addf %982, %1040 : vector<1x256xf32>
    %cst_205 = arith.constant 8.000000e+00 : f32
    %1042 = vector.broadcast %cst_205 : f32 to vector<1x256xf32>
    %1043 = arith.mulf %1041, %1042 : vector<1x256xf32>
    %cst_206 = arith.constant 5.000000e-01 : f32
    %1044 = vector.broadcast %cst_206 : f32 to vector<1x256xf32>
    %1045 = arith.subf %1043, %1044 : vector<1x256xf32>
    %1046 = math.floor %1039 : vector<1x256xf32>
    %1047 = math.floor %1045 : vector<1x256xf32>
    %1048 = arith.subf %1039, %1046 : vector<1x256xf32>
    %1049 = arith.subf %1045, %1047 : vector<1x256xf32>
    %1050 = arith.fptosi %1046 : vector<1x256xf32> to vector<1x256xi32>
    %1051 = arith.fptosi %1047 : vector<1x256xf32> to vector<1x256xi32>
    %1052 = tpu.iota {dimensions = array<i32: 0>} : vector<16x1xi32>
    %1053 = tpu.iota {dimensions = array<i32: 0>} : vector<16x1xi32>
    %1054 = vector.broadcast %1052 : vector<16x1xi32> to vector<16x256xi32>
    %1055 = vector.broadcast %1050 : vector<1x256xi32> to vector<16x256xi32>
    %1056 = arith.cmpi eq, %1054, %1055 : vector<16x256xi32>
    %cst_207 = arith.constant 1.000000e+00 : f32
    %1057 = vector.broadcast %cst_207 : f32 to vector<1x256xf32>
    %1058 = arith.subf %1057, %1048 : vector<1x256xf32>
    %cst_208 = arith.constant 0.000000e+00 : f32
    %1059 = vector.shape_cast %1058 : vector<1x256xf32> to vector<1x256xf32>
    %1060 = vector.broadcast %1059 : vector<1x256xf32> to vector<16x256xf32>
    %1061 = vector.broadcast %cst_208 : f32 to vector<16x256xf32>
    %1062 = arith.select %1056, %1060, %1061 : vector<16x256xi1>, vector<16x256xf32>
    %c1_i32_209 = arith.constant 1 : i32
    %1063 = vector.broadcast %c1_i32_209 : i32 to vector<1x256xi32>
    %1064 = arith.addi %1050, %1063 : vector<1x256xi32>
    %1065 = vector.broadcast %1052 : vector<16x1xi32> to vector<16x256xi32>
    %1066 = vector.broadcast %1064 : vector<1x256xi32> to vector<16x256xi32>
    %1067 = arith.cmpi eq, %1065, %1066 : vector<16x256xi32>
    %cst_210 = arith.constant 0.000000e+00 : f32
    %1068 = vector.shape_cast %1048 : vector<1x256xf32> to vector<1x256xf32>
    %1069 = vector.broadcast %1068 : vector<1x256xf32> to vector<16x256xf32>
    %1070 = vector.broadcast %cst_210 : f32 to vector<16x256xf32>
    %1071 = arith.select %1067, %1069, %1070 : vector<16x256xi1>, vector<16x256xf32>
    %1072 = arith.addf %1062, %1071 : vector<16x256xf32>
    %1073 = vector.broadcast %1053 : vector<16x1xi32> to vector<16x256xi32>
    %1074 = vector.broadcast %1051 : vector<1x256xi32> to vector<16x256xi32>
    %1075 = arith.cmpi eq, %1073, %1074 : vector<16x256xi32>
    %cst_211 = arith.constant 1.000000e+00 : f32
    %1076 = vector.broadcast %cst_211 : f32 to vector<1x256xf32>
    %1077 = arith.subf %1076, %1049 : vector<1x256xf32>
    %cst_212 = arith.constant 0.000000e+00 : f32
    %1078 = vector.shape_cast %1077 : vector<1x256xf32> to vector<1x256xf32>
    %1079 = vector.broadcast %1078 : vector<1x256xf32> to vector<16x256xf32>
    %1080 = vector.broadcast %cst_212 : f32 to vector<16x256xf32>
    %1081 = arith.select %1075, %1079, %1080 : vector<16x256xi1>, vector<16x256xf32>
    %c1_i32_213 = arith.constant 1 : i32
    %1082 = vector.broadcast %c1_i32_213 : i32 to vector<1x256xi32>
    %1083 = arith.addi %1051, %1082 : vector<1x256xi32>
    %1084 = vector.broadcast %1053 : vector<16x1xi32> to vector<16x256xi32>
    %1085 = vector.broadcast %1083 : vector<1x256xi32> to vector<16x256xi32>
    %1086 = arith.cmpi eq, %1084, %1085 : vector<16x256xi32>
    %cst_214 = arith.constant 0.000000e+00 : f32
    %1087 = vector.shape_cast %1049 : vector<1x256xf32> to vector<1x256xf32>
    %1088 = vector.broadcast %1087 : vector<1x256xf32> to vector<16x256xf32>
    %1089 = vector.broadcast %cst_214 : f32 to vector<16x256xf32>
    %1090 = arith.select %1086, %1088, %1089 : vector<16x256xi1>, vector<16x256xf32>
    %1091 = arith.addf %1081, %1090 : vector<16x256xf32>
    %c0_215 = arith.constant 0 : index
    %c0_216 = arith.constant 0 : index
    %1092 = vector.load %arg5[%c0_215, %c0_216] : memref<16x256xf32, #tpu.memory_space<vmem>>, vector<16x256xf32>
    %1093 = tpu.concatenate %1092, %1072 in 1 : vector<16x256xf32>, vector<16x256xf32> -> vector<16x512xf32>
    %c0_217 = arith.constant 0 : index
    %c0_218 = arith.constant 0 : index
    %1094 = vector.load %arg6[%c0_217, %c0_218] : memref<16x256xf32, #tpu.memory_space<vmem>>, vector<16x256xf32>
    %1095 = tpu.concatenate %1094, %1091 in 1 : vector<16x256xf32>, vector<16x256xf32> -> vector<16x512xf32>
    %c0_219 = arith.constant 0 : index
    %c0_220 = arith.constant 0 : index
    %c0_221 = arith.constant 0 : index
    %1096 = vector.load %arg3[%c0_219, %c0_220, %c0_221] : memref<1x48x16xf32, #tpu.memory_space<vmem>>, vector<1x48x16xf32>
    %1097 = vector.shape_cast %1096 : vector<1x48x16xf32> to vector<48x16xf32>
    %cst_222 = arith.constant dense<0.000000e+00> : vector<48x512xf32>
    %1098 = tpu.matmul %1097, %1093, %cst_222 {dimension_numbers = #tpu.dot_dimension_numbers<[1], [0], [0], [1], [0, 0, 1, 1], [], []>} : vector<48x16xf32>, vector<16x512xf32>, vector<48x512xf32> -> vector<48x512xf32>
    %cst_223 = arith.constant 1.000000e+00 : f32
    %1099 = vector.broadcast %cst_223 : f32 to vector<1x256xf32>
    %1100 = arith.subf %1099, %939 : vector<1x256xf32>
    %1101 = vector.extract_strided_slice %1098 {offsets = [0, 0], sizes = [16, 512], strides = [1, 1]} : vector<48x512xf32> to vector<16x512xf32>
    %1102 = arith.mulf %1095, %1101 : vector<16x512xf32>
    %cst_224 = arith.constant dense<0.000000e+00> : vector<512xf32>
    %1103 = vector.multi_reduction <add>, %1102, %cst_224 [0] : vector<16x512xf32> to vector<512xf32>
    %1104 = vector.shape_cast %1103 : vector<512xf32> to vector<1x512xf32>
    %1105 = vector.extract_strided_slice %1104 {offsets = [0, 0], sizes = [1, 256], strides = [1, 1]} : vector<1x512xf32> to vector<1x256xf32>
    %1106 = vector.extract_strided_slice %1104 {offsets = [0, 256], sizes = [1, 256], strides = [1, 1]} : vector<1x512xf32> to vector<1x256xf32>
    %c0_225 = arith.constant 0 : index
    %c0_226 = arith.constant 0 : index
    %c0_227 = arith.constant 0 : index
    %1107 = vector.load %arg10[%c0_225, %c0_226, %c0_227] : memref<1x29x256xf32, #tpu.memory_space<vmem>>, vector<1x1x256xf32>
    %1108 = vector.shape_cast %1107 : vector<1x1x256xf32> to vector<1x256xf32>
    %1109 = vector.shape_cast %1106 : vector<1x256xf32> to vector<1x1x256xf32>
    tpu.vector_store %arg10[%c0_225, %c0_226, %c0_227], %1109 {strides = array<i32>} : memref<1x29x256xf32, #tpu.memory_space<vmem>>, vector<1x1x256xf32>,
    %c0_228 = arith.constant 0 : index
    %c13 = arith.constant 13 : index
    %c0_229 = arith.constant 0 : index
    %1110 = vector.load %arg10[%c0_228, %c13, %c0_229] : memref<1x29x256xf32, #tpu.memory_space<vmem>>, vector<1x1x256xf32>
    %1111 = vector.shape_cast %1110 : vector<1x1x256xf32> to vector<1x256xf32>
    %1112 = vector.shape_cast %1106 : vector<1x256xf32> to vector<1x1x256xf32>
    tpu.vector_store %arg10[%c0_228, %c13, %c0_229], %1112 {strides = array<i32>} : memref<1x29x256xf32, #tpu.memory_space<vmem>>, vector<1x1x256xf32>,
    %1113 = arith.mulf %1105, %909 : vector<1x256xf32>
    %c0_230 = arith.constant 0 : index
    %c3 = arith.constant 3 : index
    %c0_231 = arith.constant 0 : index
    %1114 = vector.load %arg10[%c0_230, %c3, %c0_231] : memref<1x29x256xf32, #tpu.memory_space<vmem>>, vector<1x1x256xf32>
    %1115 = vector.shape_cast %1114 : vector<1x1x256xf32> to vector<1x256xf32>
    %1116 = vector.shape_cast %1113 : vector<1x256xf32> to vector<1x1x256xf32>
    tpu.vector_store %arg10[%c0_230, %c3, %c0_231], %1116 {strides = array<i32>} : memref<1x29x256xf32, #tpu.memory_space<vmem>>, vector<1x1x256xf32>,
    %1117 = arith.mulf %1105, %1100 : vector<1x256xf32>
    %c0_232 = arith.constant 0 : index
    %c7 = arith.constant 7 : index
    %c0_233 = arith.constant 0 : index
    %1118 = vector.load %arg10[%c0_232, %c7, %c0_233] : memref<1x29x256xf32, #tpu.memory_space<vmem>>, vector<1x1x256xf32>
    %1119 = vector.shape_cast %1118 : vector<1x1x256xf32> to vector<1x256xf32>
    %1120 = vector.shape_cast %1117 : vector<1x256xf32> to vector<1x1x256xf32>
    tpu.vector_store %arg10[%c0_232, %c7, %c0_233], %1120 {strides = array<i32>} : memref<1x29x256xf32, #tpu.memory_space<vmem>>, vector<1x1x256xf32>,
    %1121 = vector.extract_strided_slice %1098 {offsets = [16, 0], sizes = [16, 512], strides = [1, 1]} : vector<48x512xf32> to vector<16x512xf32>
    %1122 = arith.mulf %1095, %1121 : vector<16x512xf32>
    %cst_234 = arith.constant dense<0.000000e+00> : vector<512xf32>
    %1123 = vector.multi_reduction <add>, %1122, %cst_234 [0] : vector<16x512xf32> to vector<512xf32>
    %1124 = vector.shape_cast %1123 : vector<512xf32> to vector<1x512xf32>
    %1125 = vector.extract_strided_slice %1124 {offsets = [0, 0], sizes = [1, 256], strides = [1, 1]} : vector<1x512xf32> to vector<1x256xf32>
    %1126 = vector.extract_strided_slice %1124 {offsets = [0, 256], sizes = [1, 256], strides = [1, 1]} : vector<1x512xf32> to vector<1x256xf32>
    %c0_235 = arith.constant 0 : index
    %c1_236 = arith.constant 1 : index
    %c0_237 = arith.constant 0 : index
    %1127 = vector.load %arg10[%c0_235, %c1_236, %c0_237] : memref<1x29x256xf32, #tpu.memory_space<vmem>>, vector<1x1x256xf32>
    %1128 = vector.shape_cast %1127 : vector<1x1x256xf32> to vector<1x256xf32>
    %1129 = vector.shape_cast %1126 : vector<1x256xf32> to vector<1x1x256xf32>
    tpu.vector_store %arg10[%c0_235, %c1_236, %c0_237], %1129 {strides = array<i32>} : memref<1x29x256xf32, #tpu.memory_space<vmem>>, vector<1x1x256xf32>,
    %c0_238 = arith.constant 0 : index
    %c14 = arith.constant 14 : index
    %c0_239 = arith.constant 0 : index
    %1130 = vector.load %arg10[%c0_238, %c14, %c0_239] : memref<1x29x256xf32, #tpu.memory_space<vmem>>, vector<1x1x256xf32>
    %1131 = vector.shape_cast %1130 : vector<1x1x256xf32> to vector<1x256xf32>
    %1132 = vector.shape_cast %1126 : vector<1x256xf32> to vector<1x1x256xf32>
    tpu.vector_store %arg10[%c0_238, %c14, %c0_239], %1132 {strides = array<i32>} : memref<1x29x256xf32, #tpu.memory_space<vmem>>, vector<1x1x256xf32>,
    %1133 = arith.mulf %1125, %909 : vector<1x256xf32>
    %c0_240 = arith.constant 0 : index
    %c4 = arith.constant 4 : index
    %c0_241 = arith.constant 0 : index
    %1134 = vector.load %arg10[%c0_240, %c4, %c0_241] : memref<1x29x256xf32, #tpu.memory_space<vmem>>, vector<1x1x256xf32>
    %1135 = vector.shape_cast %1134 : vector<1x1x256xf32> to vector<1x256xf32>
    %1136 = vector.shape_cast %1133 : vector<1x256xf32> to vector<1x1x256xf32>
    tpu.vector_store %arg10[%c0_240, %c4, %c0_241], %1136 {strides = array<i32>} : memref<1x29x256xf32, #tpu.memory_space<vmem>>, vector<1x1x256xf32>,
    %1137 = arith.mulf %1125, %1100 : vector<1x256xf32>
    %c0_242 = arith.constant 0 : index
    %c8 = arith.constant 8 : index
    %c0_243 = arith.constant 0 : index
    %1138 = vector.load %arg10[%c0_242, %c8, %c0_243] : memref<1x29x256xf32, #tpu.memory_space<vmem>>, vector<1x1x256xf32>
    %1139 = vector.shape_cast %1138 : vector<1x1x256xf32> to vector<1x256xf32>
    %1140 = vector.shape_cast %1137 : vector<1x256xf32> to vector<1x1x256xf32>
    tpu.vector_store %arg10[%c0_242, %c8, %c0_243], %1140 {strides = array<i32>} : memref<1x29x256xf32, #tpu.memory_space<vmem>>, vector<1x1x256xf32>,
    %1141 = vector.extract_strided_slice %1098 {offsets = [32, 0], sizes = [16, 512], strides = [1, 1]} : vector<48x512xf32> to vector<16x512xf32>
    %1142 = arith.mulf %1095, %1141 : vector<16x512xf32>
    %cst_244 = arith.constant dense<0.000000e+00> : vector<512xf32>
    %1143 = vector.multi_reduction <add>, %1142, %cst_244 [0] : vector<16x512xf32> to vector<512xf32>
    %1144 = vector.shape_cast %1143 : vector<512xf32> to vector<1x512xf32>
    %1145 = vector.extract_strided_slice %1144 {offsets = [0, 0], sizes = [1, 256], strides = [1, 1]} : vector<1x512xf32> to vector<1x256xf32>
    %1146 = vector.extract_strided_slice %1144 {offsets = [0, 256], sizes = [1, 256], strides = [1, 1]} : vector<1x512xf32> to vector<1x256xf32>
    %c0_245 = arith.constant 0 : index
    %c2_246 = arith.constant 2 : index
    %c0_247 = arith.constant 0 : index
    %1147 = vector.load %arg10[%c0_245, %c2_246, %c0_247] : memref<1x29x256xf32, #tpu.memory_space<vmem>>, vector<1x1x256xf32>
    %1148 = vector.shape_cast %1147 : vector<1x1x256xf32> to vector<1x256xf32>
    %1149 = vector.shape_cast %1146 : vector<1x256xf32> to vector<1x1x256xf32>
    tpu.vector_store %arg10[%c0_245, %c2_246, %c0_247], %1149 {strides = array<i32>} : memref<1x29x256xf32, #tpu.memory_space<vmem>>, vector<1x1x256xf32>,
    %c0_248 = arith.constant 0 : index
    %c15 = arith.constant 15 : index
    %c0_249 = arith.constant 0 : index
    %1150 = vector.load %arg10[%c0_248, %c15, %c0_249] : memref<1x29x256xf32, #tpu.memory_space<vmem>>, vector<1x1x256xf32>
    %1151 = vector.shape_cast %1150 : vector<1x1x256xf32> to vector<1x256xf32>
    %1152 = vector.shape_cast %1146 : vector<1x256xf32> to vector<1x1x256xf32>
    tpu.vector_store %arg10[%c0_248, %c15, %c0_249], %1152 {strides = array<i32>} : memref<1x29x256xf32, #tpu.memory_space<vmem>>, vector<1x1x256xf32>,
    %1153 = arith.mulf %1145, %909 : vector<1x256xf32>
    %c0_250 = arith.constant 0 : index
    %c5 = arith.constant 5 : index
    %c0_251 = arith.constant 0 : index
    %1154 = vector.load %arg10[%c0_250, %c5, %c0_251] : memref<1x29x256xf32, #tpu.memory_space<vmem>>, vector<1x1x256xf32>
    %1155 = vector.shape_cast %1154 : vector<1x1x256xf32> to vector<1x256xf32>
    %1156 = vector.shape_cast %1153 : vector<1x256xf32> to vector<1x1x256xf32>
    tpu.vector_store %arg10[%c0_250, %c5, %c0_251], %1156 {strides = array<i32>} : memref<1x29x256xf32, #tpu.memory_space<vmem>>, vector<1x1x256xf32>,
    %1157 = arith.mulf %1145, %1100 : vector<1x256xf32>
    %c0_252 = arith.constant 0 : index
    %c9 = arith.constant 9 : index
    %c0_253 = arith.constant 0 : index
    %1158 = vector.load %arg10[%c0_252, %c9, %c0_253] : memref<1x29x256xf32, #tpu.memory_space<vmem>>, vector<1x1x256xf32>
    %1159 = vector.shape_cast %1158 : vector<1x1x256xf32> to vector<1x256xf32>
    %1160 = vector.shape_cast %1157 : vector<1x256xf32> to vector<1x1x256xf32>
    tpu.vector_store %arg10[%c0_252, %c9, %c0_253], %1160 {strides = array<i32>} : memref<1x29x256xf32, #tpu.memory_space<vmem>>, vector<1x1x256xf32>,
    return
  }
  func.func @transform_0(%arg0: i32) -> (i32, i32, i32) {
    %c0_i32 = arith.constant 0 : i32
    %c0_i32_0 = arith.constant 0 : i32
    %c0_i32_1 = arith.constant 0 : i32
    return %arg0, %c0_i32, %c0_i32_0 : i32, i32, i32
  }
  func.func @transform_1(%arg0: i32) -> (i32, i32, i32) {
    %c0_i32 = arith.constant 0 : i32
    %c0_i32_0 = arith.constant 0 : i32
    %c0_i32_1 = arith.constant 0 : i32
    return %arg0, %c0_i32, %c0_i32_0 : i32, i32, i32
  }
  func.func @transform_2(%arg0: i32) -> (i32, i32, i32) {
    %c0_i32 = arith.constant 0 : i32
    %c0_i32_0 = arith.constant 0 : i32
    %c0_i32_1 = arith.constant 0 : i32
    return %arg0, %c0_i32, %c0_i32_0 : i32, i32, i32
  }
  func.func @transform_3(%arg0: i32) -> (i32, i32) {
    %c0_i32 = arith.constant 0 : i32
    %c0_i32_0 = arith.constant 0 : i32
    %c0_i32_1 = arith.constant 0 : i32
    return %c0_i32, %c0_i32_0 : i32, i32
  }
  func.func @transform_4(%arg0: i32) -> (i32, i32) {
    %c0_i32 = arith.constant 0 : i32
    %c0_i32_0 = arith.constant 0 : i32
    %c0_i32_1 = arith.constant 0 : i32
    return %c0_i32, %c0_i32_0 : i32, i32
  }
  func.func @transform_5(%arg0: i32) -> (i32, i32) {
    %c0_i32 = arith.constant 0 : i32
    %c0_i32_0 = arith.constant 0 : i32
    %c0_i32_1 = arith.constant 0 : i32
    return %c0_i32, %c0_i32_0 : i32, i32
  }
  func.func @transform_6(%arg0: i32) -> (i32, i32) {
    %c0_i32 = arith.constant 0 : i32
    %c0_i32_0 = arith.constant 0 : i32
    %c0_i32_1 = arith.constant 0 : i32
    return %c0_i32, %c0_i32_0 : i32, i32
  }
  func.func @transform_7(%arg0: i32) -> (i32, i32) {
    %c0_i32 = arith.constant 0 : i32
    %c0_i32_0 = arith.constant 0 : i32
    %c0_i32_1 = arith.constant 0 : i32
    return %c0_i32, %c0_i32_0 : i32, i32
  }
  func.func @transform_8(%arg0: i32) -> (i32, i32) {
    %c0_i32 = arith.constant 0 : i32
    %c0_i32_0 = arith.constant 0 : i32
    %c0_i32_1 = arith.constant 0 : i32
    return %c0_i32, %c0_i32_0 : i32, i32
  }
  func.func @transform_9(%arg0: i32) -> (i32, i32, i32) {
    %c0_i32 = arith.constant 0 : i32
    %c0_i32_0 = arith.constant 0 : i32
    %c0_i32_1 = arith.constant 0 : i32
    return %arg0, %c0_i32, %c0_i32_0 : i32, i32, i32
  }
  func.func @transform_10(%arg0: i32) -> (i32, i32, i32) {
    %c0_i32 = arith.constant 0 : i32
    %c0_i32_0 = arith.constant 0 : i32
    %c0_i32_1 = arith.constant 0 : i32
    return %arg0, %c0_i32, %c0_i32_0 : i32, i32, i32
  }
}

</mosaic_0001>

<bundles_post_ra>
// kernel: body_recovery_flow.1
= control target key start
LH: loop header
LB: loop body
LE: loop exit
PB: predicated region body
PF: predicated region fallthrough
CT: control target
= control target key end

     0   :  { %s3296_s13 = smov 0   ;;  %s5056_s0 = inlined_call_operand.vmem [shape: f32[2,3,2], index: 0, kind: input, shape index: {}]   ;;  %s5057_s1 = inlined_call_operand.vmem [shape: f32[2,82,2], index: 1, kind: input, shape index: {}]   ;;  %s5058_s2 = inlined_call_operand.vmem [shape: f32[2,48,16], index: 2, kind: input, shape index: {}]   ;;  %s5059_s3 = inlined_call_operand.vmem [shape: f32[3,256], index: 3, kind: input, shape index: {}]   ;;  %s5060_s4 = inlined_call_operand.vmem [shape: f32[16,256], index: 4, kind: input, shape index: {}]   ;;  %s5061_s5 = inlined_call_operand.vmem [shape: f32[16,256], index: 5, kind: input, shape index: {}]   ;;  %s5062_s6 = inlined_call_operand.vmem [shape: f32[256,82], index: 6, kind: input, shape index: {}]   ;;  %s5063_s7 = inlined_call_operand.vmem [shape: f32[256,1], index: 7, kind: input, shape index: {}]   ;;  %s5064_s8 = inlined_call_operand.vmem [shape: f32[16,256], index: 8, kind: input, shape index: {}]   ;;  %s5065_s9 = inlined_call_operand.vmem [shape: f32[2,29,256], index: 9, kind: output, shape index: {0}]   ;;  %s5066_s10 = inlined_call_operand.vmem [shape: f32[2,8,2], index: 10, kind: output, shape index: {1}]  }
   0x1 LB: > { %s2936_s14 = sadd.s32 4294967295, %s3225_s13   ;;  %p2940_p0 = scmp.ge.s32.totalorder %s3225_s13, 1  ;;  %s3225_s13 = sphi %s3296_s13, %s21_s13  }
   0x2   : > { %p334_p1 = scmp.lt.s32.totalorder %s3225_s13, 3 }
   0x4   : > { %p335_p2 = pnand %p2940_p0, %p334_p1 }
   0x6   : > { %338 = sbr.rel (%p335_p2) target bundleno = 1903 (0x76f), region = 56 }
   0xb   : > { %v456_v0 = vld [vmem:[%s5063_s7 + $0x20] sm:$0xff]  ;;  %v454_v1 = vld [vmem:[%s5063_s7 + $0x10] sm:$0xff]  ;;  %p385_p3 = scmp.lt.s32.totalorder %s2936_s14, 1  ;;  %v5069_v3 = vmov 0   ;;  %vm741_vm0 = vcmask 1041408   ;;  %v457_v5 = vld [vmem:[%s5063_s7 + $0x28] sm:$0xff] }
   0xc   : > { %v452_v2 = vld [vmem:[%s5063_s7] sm:$0xff]  ;;  %3097 = vset.pattern.permute.xlu2 %v5069_v3  ;;  %3096 = vset.pattern.permute.xlu1 %v5069_v3  ;;  %v455_v7 = vld [vmem:[%s5063_s7 + $0x18] sm:$0xff]  ;;  %v453_v8 = vld [vmem:[%s5063_s7 + $0x8] sm:$0xff]  ;;  %vm644_vm1 = vcmask 670720   ;;  %vm858_vm2 = vcmask 15360   ;;  %s3229_s12 = smov 127  }
   0xd   : > { %3095 = vset.pattern.permute.xlu0 %v5069_v3  ;;  %506 = vperm.xlu2 %3097, %v456_v0   ;;  %s5190_s14 = smov (!%p385_p3, %s2936_s14), 1  ;;  %v460_v12 = vld [vmem:[%s5063_s7 + $0x40] sm:$0xff]  ;;  %v459_v13 = vld [vmem:[%s5063_s7 + $0x38] sm:$0xff]  ;;  %v458_v14 = vld [vmem:[%s5063_s7 + $0x30] sm:$0xff]  ;;  %s3231_s15 = smov 2   ;;  %vm2242_vm5 = vcmask 1040384  }
   0xe   : > { %496 = vperm.xlu1 %3096, %v454_v1   ;;  %486 = vperm.xlu0 %3095, %v452_v2   ;;  %s3067_s21 = smul.u32 88, %s5190_s14  ;;  %v463_v19 = vld [vmem:[%s5063_s7 + $0x58] sm:$0xff]  ;;  %v462_v20 = vld [vmem:[%s5063_s7 + $0x50] sm:$0xff]  ;;  %v461_v21 = vld [vmem:[%s5063_s7 + $0x48] sm:$0xff]  ;;  %s3232_s20 = smov 126   ;;  %vm949_vm15 = vcmask 7168  }
   0xf   : > { %v420_v24 = vld [vmem:[%s5062_s6] sm:$0xff]  ;;  %v435_v25 = vld [vmem:[%s5062_s6 + $0x78] sm:$0xff]  ;;  %v442_v26 = vld [vmem:[%s5062_s6 + $0xb0] sm:$0xff]  ;;  %s3042_s22 = sshll.u32 %s5190_s14, 6  ;;  %s3235_s28 = smov 124  }
  0x10   : > { %s3322_s24 = scalar_lea.vmem %s5057_s1, %s3067_s21  ;;  %v466_v27 = vld [vmem:[%s5063_s7 + $0x70] sm:$0xff]  ;;  %v465_v28 = vld [vmem:[%s5063_s7 + $0x68] sm:$0xff]  ;;  %v464_v29 = vld [vmem:[%s5063_s7 + $0x60] sm:$0xff]  ;;  %s2941_s21 = sshll.u32 %s5190_s14, 2 }
  0x11   : > { %v419_v4 = vld [vmem:[%s3322_s24 + $0x50] sm:$0x3]  ;;  %v418_v6 = vld [vmem:[%s3322_s24 + $0x48] sm:$0xff]  ;;  %v417_v9 = vld [vmem:[%s3322_s24 + $0x40] sm:$0xff]  ;;  %s3574_s25 = scalar_lea.vmem %s5056_s0, %s2941_s21  ;;  %s3233_s21 = smov 4  }
  0x12   : > { %2947 = vmatpush.msk.msra.mxu0 %vm741_vm0, %v419_v4  ;;  %3043 = vmatpush.msk.msra.mxu1 %vm741_vm0, %v419_v4  ;;  %v416_v10 = vld [vmem:[%s3322_s24 + $0x38] sm:$0xff]  ;;  %v415_v11 = vld [vmem:[%s3322_s24 + $0x30] sm:$0xff]  ;;  %v414_v15 = vld [vmem:[%s3322_s24 + $0x28] sm:$0xff]  ;;  %s4094_s27 = scalar_lea.vmem %s5065_s9, %s3042_s22  ;;  %s2946_s29 = sshll.u32 %s5190_s14, 3 }
  0x13   : > { %3044 = vmatpush.msk.msra.mxu2 %vm741_vm0, %v419_v4  ;;  %v413_v16 = vld [vmem:[%s3322_s24 + $0x20] sm:$0xff]  ;;  %v412_v17 = vld [vmem:[%s3322_s24 + $0x18] sm:$0xff]  ;;  %v411_v18 = vld [vmem:[%s3322_s24 + $0x10] sm:$0xff]  ;;  %s4186_s16 = scalar_lea.vmem %s5066_s10, %s2946_s29  ;;  %s3238_s17 = smov 32  }
  0x14   : > { %751 = vmatpush.msra.mxu0 %v418_v6  ;;  %3045 = vmatpush.msra.mxu1 %v418_v6  ;;  %v410_v22 = vld [vmem:[%s3322_s24 + $0x8] sm:$0xff]  ;;  %v409_v23 = vld [vmem:[%s3322_s24] sm:$0xff]  ;;  %v443_v32 = vld [vmem:[%s5062_s6 + $0xb8] sm:$0xff]  ;;  %s3228_s24 = smov 1   ;;  %s3239_s18 = smov 96  }
  0x15   : > { %511 = vperm.xlu2 %3097, %v457_v5   ;;  %3046 = vmatpush.msra.mxu2 %v418_v6  ;;  %v421_v30 = vld [vmem:[%s5062_s6 + $0x8] sm:$0xff]  ;;  %v436_v31 = vld [vmem:[%s5062_s6 + $0x80] sm:$0xff]  ;;  %v467_v35 = vld [vmem:[%s5063_s7 + $0x78] sm:$0xff]  ;;  %s3240_s26 = smov 64  }
  0x16   : > { %501 = vperm.xlu1 %3096, %v455_v7   ;;  %491 = vperm.xlu0 %3095, %v453_v8   ;;  %v469_v33 = vld [vmem:[%s5063_s7 + $0x88] sm:$0xff]  ;;  %v468_v34 = vld [vmem:[%s5063_s7 + $0x80] sm:$0xff]  ;;  %v422_v36 = vld [vmem:[%s5062_s6 + $0x10] sm:$0xff] }
  0x17   : > { %752 = vmatpush.msra.mxu0 %v417_v9  ;;  %3047 = vmatpush.msra.mxu1 %v417_v9  ;;  %v437_v37 = vld [vmem:[%s5062_s6 + $0x88] sm:$0xff]  ;;  %v444_v38 = vld [vmem:[%s5062_s6 + $0xc0] sm:$0xff]  ;;  %v471_v40 = vld [vmem:[%s5063_s7 + $0x98] sm:$0xff] }
  0x18   : > { %3048 = vmatpush.msra.mxu2 %v417_v9  ;;  %v472_v39 = vld [vmem:[%s5063_s7 + $0xa0] sm:$0xff]  ;;  %v470_v41 = vld [vmem:[%s5063_s7 + $0x90] sm:$0xff]  ;;  %v423_v42 = vld [vmem:[%s5062_s6 + $0x18] sm:$0xff] }
  0x19   : > { %753 = vmatpush.msra.mxu0 %v416_v10  ;;  %3049 = vmatpush.msra.mxu1 %v416_v10  ;;  %v438_v43 = vld [vmem:[%s5062_s6 + $0x90] sm:$0xff]  ;;  %v445_v44 = vld [vmem:[%s5062_s6 + $0xc8] sm:$0xff]  ;;  %v476_v47 = vld [vmem:[%s5063_s7 + $0xc0] sm:$0xff] }
  0x1a   : > { %3050 = vmatpush.msra.mxu2 %v416_v10  ;;  %v478_v45 = vld [vmem:[%s5063_s7 + $0xd0] sm:$0xff]  ;;  %v477_v46 = vld [vmem:[%s5063_s7 + $0xc8] sm:$0xff]  ;;  %v424_v48 = vld [vmem:[%s5062_s6 + $0x20] sm:$0xff] }
  0x1b   : > { %754 = vmatpush.msra.mxu0 %v415_v11  ;;  %3051 = vmatpush.msra.mxu1 %v415_v11  ;;  %v439_v49 = vld [vmem:[%s5062_s6 + $0x98] sm:$0xff]  ;;  %v446_v50 = vld [vmem:[%s5062_s6 + $0xd0] sm:$0xff]  ;;  %v473_v51 = vld [vmem:[%s5063_s7 + $0xa8] sm:$0xff] }
  0x1c   : > { %3052 = vmatpush.msra.mxu2 %v415_v11  ;;  %v480_v52 = vld [vmem:[%s5063_s7 + $0xe0] sm:$0xff]  ;;  %v479_v53 = vld [vmem:[%s5063_s7 + $0xd8] sm:$0xff]  ;;  %v425_v54 = vld [vmem:[%s5062_s6 + $0x28] sm:$0xff] }
  0x1d   : > { %526 = vperm.xlu2 %3097, %v460_v12   ;;  %755 = vmatpush.msra.mxu0 %v414_v15  ;;  %v440_v55 = vld [vmem:[%s5062_s6 + $0xa0] sm:$0xff]  ;;  %v447_v56 = vld [vmem:[%s5062_s6 + $0xd8] sm:$0xff]  ;;  %v482_v57 = vld [vmem:[%s5063_s7 + $0xf0] sm:$0xff] }
  0x1e   : > { %521 = vperm.xlu1 %3096, %v459_v13   ;;  %516 = vperm.xlu0 %3095, %v458_v14   ;;  %v474_v58 = vld [vmem:[%s5063_s7 + $0xb0] sm:$0xff]  ;;  %v481_v59 = vld [vmem:[%s5063_s7 + $0xe8] sm:$0xff]  ;;  %v448_v62 = vld [vmem:[%s5062_s6 + $0xe0] sm:$0xff] }
  0x1f   : > { %3053 = vmatpush.msra.mxu1 %v414_v15  ;;  %3054 = vmatpush.msra.mxu2 %v414_v15  ;;  %v426_v60 = vld [vmem:[%s5062_s6 + $0x30] sm:$0xff]  ;;  %v441_v61 = vld [vmem:[%s5062_s6 + $0xa8] sm:$0xff]  ;;  %v483_v63 = vld [vmem:[%s5063_s7 + $0xf8] sm:$0xff] }
  0x20   : > { %756 = vmatpush.msra.mxu0 %v413_v16  ;;  %v475_v0 = vld [vmem:[%s5063_s7 + $0xb8] sm:$0xff]  ;;  %v449_v2 = vld [vmem:[%s5062_s6 + $0xe8] sm:$0xff]  ;;  %v428_v4 = vld [vmem:[%s5062_s6 + $0x40] sm:$0xff] }
  0x21   : > { %3055 = vmatpush.msra.mxu1 %v413_v16  ;;  %3056 = vmatpush.msra.mxu2 %v413_v16  ;;  %v427_v1 = vld [vmem:[%s5062_s6 + $0x38] sm:$0xff]  ;;  %v450_v5 = vld [vmem:[%s5062_s6 + $0xf0] sm:$0xff]  ;;  %v429_v6 = vld [vmem:[%s5062_s6 + $0x48] sm:$0xff] }
  0x22   : > { %757 = vmatpush.msra.mxu0 %v412_v17  ;;  %v451_v7 = vld [vmem:[%s5062_s6 + $0xf8] sm:$0xff]  ;;  %v430_v8 = vld [vmem:[%s5062_s6 + $0x50] sm:$0xff]  ;;  %v432_v15 = vld [vmem:[%s5062_s6 + $0x60] sm:$0xff] }
  0x23   : > { %3057 = vmatpush.msra.mxu1 %v412_v17  ;;  %3058 = vmatpush.msra.mxu2 %v412_v17  ;;  %v431_v11 = vld [vmem:[%s5062_s6 + $0x58] sm:$0xff] }
  0x24   : > { %758 = vmatpush.msra.mxu0 %v411_v18 }
  0x25   : > { %3059 = vmatpush.msra.mxu1 %v411_v18  ;;  %3060 = vmatpush.msra.mxu2 %v411_v18 }
  0x26   : > { %541 = vperm.xlu2 %3097, %v463_v19   ;;  %536 = vperm.xlu1 %3096, %v462_v20   ;;  %v433_v19 = vld [vmem:[%s5062_s6 + $0x68] sm:$0xff] }
  0x27   : > { %531 = vperm.xlu0 %3095, %v461_v21   ;;  %759 = vmatpush.msra.mxu0 %v410_v22  ;;  %v434_v21 = vld [vmem:[%s5062_s6 + $0x70] sm:$0xff] }
  0x28   : > { %3061 = vmatpush.msra.mxu1 %v410_v22  ;;  %3062 = vmatpush.msra.mxu2 %v410_v22 }
  0x29   : > { %760 = vmatpush.msra.mxu0 %v409_v23 }
  0x2a   : > { %3063 = vmatpush.msra.mxu1 %v409_v23  ;;  %3064 = vmatpush.msra.mxu2 %v409_v23 }
  0x2b   : > { %2948 = vmatmul.msk.f32.vlgmr.msra.gmra.mxu0 %vm644_vm1, %v420_v24  ;;  %2963 = vmatmul.msk.f32.vlgmr.msra.gmra.mxu1 %vm644_vm1, %v435_v25 }
  0x2c   : > { %2970 = vmatmul.msk.f32.vlgmr.msra.gmra.mxu2 %vm644_vm1, %v442_v26 }
  0x2e   : > { %556 = vperm.xlu2 %3097, %v466_v27   ;;  %551 = vperm.xlu1 %3096, %v465_v28  }
  0x2f   : > { %546 = vperm.xlu0 %3095, %v464_v29  }
  0x33   : > { %2949 = vmatmul.msk.f32.gmra.mxu0 %vm644_vm1, %v421_v30  ;;  %2964 = vmatmul.msk.f32.gmra.mxu1 %vm644_vm1, %v436_v31 }
  0x34   : > { %2971 = vmatmul.msk.f32.gmra.mxu2 %vm644_vm1, %v443_v32 }
  0x36   : > { %571 = vperm.xlu2 %3097, %v469_v33   ;;  %566 = vperm.xlu1 %3096, %v468_v34   ;;  %v3581_v33 = vld [vmem:[%s3574_s25] sm:$0x7] }
  0x37   : > { %561 = vperm.xlu0 %3095, %v467_v35   ;;  %v3587_v35 = vperm.slane %v3581_v33, 0 }
  0x39   : > { %5104 = vst [vmem:[#allocation3_spill] sm:$0xff] %v3587_v35 }
  0x3b   : > { %2950 = vmatmul.msk.f32.gmra.mxu0 %vm644_vm1, %v422_v36  ;;  %2965 = vmatmul.msk.f32.gmra.mxu1 %vm644_vm1, %v437_v37 }
  0x3c   : > { %2972 = vmatmul.msk.f32.gmra.mxu2 %vm644_vm1, %v444_v38 }
  0x3e   : > { %586 = vperm.xlu2 %3097, %v472_v39   ;;  %581 = vperm.xlu1 %3096, %v471_v40   ;;  %v3590_v39 = vperm.slane %v3581_v33, 1 }
  0x3f   : > { %576 = vperm.xlu0 %3095, %v470_v41  }
  0x43   : > { %2951 = vmatmul.msk.f32.gmra.mxu0 %vm644_vm1, %v423_v42  ;;  %2966 = vmatmul.msk.f32.gmra.mxu1 %vm644_vm1, %v438_v43 }
  0x44   : > { %2973 = vmatmul.msk.f32.gmra.mxu2 %vm644_vm1, %v445_v44 }
  0x46   : > { %616 = vperm.xlu2 %3097, %v478_v45   ;;  %611 = vperm.xlu1 %3096, %v477_v46  }
  0x47   : > { %606 = vperm.xlu0 %3095, %v476_v47  }
  0x4b   : > { %2952 = vmatmul.msk.f32.gmra.mxu0 %vm644_vm1, %v424_v48  ;;  %2967 = vmatmul.msk.f32.gmra.mxu1 %vm644_vm1, %v439_v49 }
  0x4c   : > { %2974 = vmatmul.msk.f32.gmra.mxu2 %vm644_vm1, %v446_v50 }
  0x4e   : > { %591 = vperm.xlu2 %3097, %v473_v51   ;;  %626 = vperm.xlu1 %3096, %v480_v52  }
  0x4f   : > { %621 = vperm.xlu0 %3095, %v479_v53  }
  0x53   : > { %2953 = vmatmul.msk.f32.gmra.mxu0 %vm644_vm1, %v425_v54  ;;  %2968 = vmatmul.msk.f32.gmra.mxu1 %vm644_vm1, %v440_v55 }
  0x54   : > { %2975 = vmatmul.msk.f32.gmra.mxu2 %vm644_vm1, %v447_v56 }
  0x56   : > { %636 = vperm.xlu2 %3097, %v482_v57   ;;  %596 = vperm.xlu1 %3096, %v474_v58  }
  0x57   : > { %631 = vperm.xlu0 %3095, %v481_v59  }
  0x5b   : > { %2954 = vmatmul.msk.f32.gmra.mxu0 %vm644_vm1, %v426_v60  ;;  %2969 = vmatmul.msk.f32.gmra.mxu1 %vm644_vm1, %v441_v61 }
  0x5c   : > { %2976 = vmatmul.msk.f32.gmra.mxu2 %vm644_vm1, %v448_v62 }
  0x5e   : > { %641 = vperm.xlu1 %3096, %v483_v63  }
  0x5f   : > { %601 = vperm.xlu0 %3095, %v475_v0  }
  0x63   : > { %2955 = vmatmul.msk.f32.gmra.mxu0 %vm644_vm1, %v427_v1  ;;  %v3626_v1 = vperm.slane %v3581_v33, 2 }
  0x64   : > { %2977 = vmatmul.msk.f32.gmra.mxu2 %vm644_vm1, %v449_v2 }
  0x65   : > { %5105 = vst [vmem:[#allocation4_spill] sm:$0xff] %v3626_v1 }
  0x67   : > { %v3538_v12 = vpop.permute.xlu2 %506 }
  0x6b   : > { %2956 = vmatmul.msk.f32.gmra.mxu0 %vm644_vm1, %v428_v4 }
  0x6c   : > { %2978 = vmatmul.msk.f32.gmra.mxu2 %vm644_vm1, %v450_v5 }
  0x6f   : > { %v3544_v16 = vpop.permute.xlu2 %511 }
  0x73   : > { %2957 = vmatmul.msk.f32.gmra.mxu0 %vm644_vm1, %v429_v6 }
  0x74   : > { %2979 = vmatmul.msk.f32.gmra.mxu2 %vm644_vm1, %v451_v7 }
  0x77   : > { %v3559_v22 = vpop.permute.xlu2 %526 }
  0x7b   : > { %2958 = vmatmul.msk.f32.gmra.mxu0 %vm644_vm1, %v430_v8 }
  0x80   : > { %v497_v9 = vpop.permute.xlu1 %496  ;;  %v487_v10 = vpop.permute.xlu0 %486 }
  0x81   : > { %v3568_v26 = vpop.permute.xlu2 %541 }
  0x83   : > { %2959 = vmatmul.msk.f32.gmra.mxu0 %vm644_vm1, %v431_v11 }
  0x88   : > { %v502_v13 = vpop.permute.xlu1 %501  ;;  %v492_v14 = vpop.permute.xlu0 %491 }
  0x89   : > { %v3583_v34 = vpop.permute.xlu2 %556 }
  0x8b   : > { %2960 = vmatmul.msk.f32.gmra.mxu0 %vm644_vm1, %v432_v15 }
  0x90   : > { %v3546_v17 = vpop.permute.xlu1 %521  ;;  %v3548_v18 = vpop.permute.xlu0 %516 }
  0x91   : > { %v572_v47 = vpop.permute.xlu2 %571 }
  0x93   : > { %2961 = vmatmul.msk.f32.gmra.mxu0 %vm644_vm1, %v433_v19 }
  0x98   : > { %v3554_v20 = vpop.permute.xlu1 %536 }
  0x99   : > { %v3561_v23 = vpop.permute.xlu0 %531  ;;  %v587_v63 = vpop.permute.xlu2 %586 }
  0x9b   : > { %2962 = vmatmul.msk.f32.gmra.mxu0 %vm644_vm1, %v434_v21 }
  0xa0   : > { %v3564_v24 = vpop.permute.xlu1 %551 }
  0xa1   : > { %v3566_v25 = vpop.permute.xlu0 %546 }
  0xa8   : > { %v762_v27 = vpop.f32.mrf.mxu0  ;;  %v807_v28 = vpop.f32.mrf.mxu1 }
  0xa9   : > { %v3576_v29 = vadd.f32 %v762_v27, %v487_v10  ;;  %v567_v30 = vpop.permute.xlu1 %566  ;;  %v562_v31 = vpop.permute.xlu0 %561 }
  0xaa   : > { %v808_v32 = vadd.f32 %v807_v28, %v562_v31  ;;  %v617_v28 = vpop.permute.xlu2 %616 }
  0xab   : > { %859 = vst.msk [vmem:[#allocation2] sm:$0xff] %vm858_vm2, %v3576_v29 }
  0xac   : > { %874 = vst.msk [vmem:[#allocation2 + $0x78] sm:$0xff] %vm858_vm2, %v808_v32  ;;  %895 = vmatpush.msrb.mxu1 %v808_v32 }
  0xaf   : > { %v828_v36 = vpop.f32.mrf.mxu2 }
  0xb0   : > { %v765_v37 = vpop.f32.mrf.mxu0  ;;  %v810_v38 = vpop.f32.mrf.mxu1 }
  0xb1   : > { %v3592_v40 = vadd.f32 %v765_v37, %v492_v14  ;;  %v3594_v41 = vadd.f32 %v810_v38, %v567_v30  ;;  %v582_v42 = vpop.permute.xlu1 %581  ;;  %v577_v43 = vpop.permute.xlu0 %576 }
  0xb2   : > { %v961_v44 = vld [vmem:[#allocation2] sm:$0xff] }
  0xb3   : > { %860 = vst.msk [vmem:[#allocation2 + $0x8] sm:$0xff] %vm858_vm2, %v3592_v40  ;;  %v971_v45 = vmul.f32 %v961_v44, %v3587_v35 }
  0xb4   : > { %875 = vst.msk [vmem:[#allocation2 + $0x80] sm:$0xff] %vm858_vm2, %v3594_v41 }
  0xb5   : > { %v3602_v46 = vadd.f32 %v971_v45, %v3590_v39 }
  0xb7   : > { %v831_v48 = vpop.f32.mrf.mxu2  ;;  %982 = vperm.xlu2 %3097, %v3602_v46  }
  0xb8   : > { %v768_v49 = vpop.f32.mrf.mxu0  ;;  %v813_v50 = vpop.f32.mrf.mxu1 }
  0xb9   : > { %v3605_v51 = vadd.f32 %v768_v49, %v497_v9  ;;  %v3607_v52 = vadd.f32 %v813_v50, %v572_v47  ;;  %v612_v53 = vpop.permute.xlu1 %611  ;;  %v607_v54 = vpop.permute.xlu0 %606 }
  0xbb   : > { %861 = vst.msk [vmem:[#allocation2 + $0x10] sm:$0xff] %vm858_vm2, %v3605_v51 }
  0xbc   : > { %876 = vst.msk [vmem:[#allocation2 + $0x88] sm:$0xff] %vm858_vm2, %v3607_v52 }
  0xbf   : > { %v834_v55 = vpop.f32.mrf.mxu2 }
  0xc0   : > { %v3613_v56 = vadd.f32 %v834_v55, %v607_v54  ;;  %v771_v57 = vpop.f32.mrf.mxu0  ;;  %v816_v58 = vpop.f32.mrf.mxu1 }
  0xc1   : > { %v3615_v59 = vadd.f32 %v771_v57, %v502_v13  ;;  %v3617_v60 = vadd.f32 %v816_v58, %v577_v43  ;;  %v3619_v61 = vpop.permute.xlu1 %626  ;;  %v622_v62 = vpop.permute.xlu0 %621 }
  0xc2   : > { %883 = vst.msk [vmem:[#allocation2 + $0xc0] sm:$0xff] %vm858_vm2, %v3613_v56  ;;  %v1177_v6 = vld [vmem:[#allocation2 + $0x10] sm:$0xff]  ;;  %v592_v54 = vpop.permute.xlu2 %591 }
  0xc3   : > { %862 = vst.msk [vmem:[#allocation2 + $0x18] sm:$0xff] %vm858_vm2, %v3615_v59  ;;  %v1077_v0 = vld [vmem:[#allocation2 + $0x88] sm:$0xff]  ;;  %v1187_v27 = vmul.f32 %v1177_v6, %v3587_v35 }
  0xc4   : > { %877 = vst.msk [vmem:[#allocation2 + $0x90] sm:$0xff] %vm858_vm2, %v3617_v60  ;;  %v1086_v2 = vmul.f32 %v1077_v0, %v3587_v35 }
  0xc5   : > { %v3661_v31 = vadd.f32 %v1187_v27, %v3590_v39 }
  0xc6   : > { %v3632_v4 = vadd.f32 %v1086_v2, %v3626_v1  ;;  %v964_v2 = vld [vmem:[#allocation2 + $0x80] sm:$0xff] }
  0xc7   : > { %v837_v5 = vpop.f32.mrf.mxu2 }
  0xc8   : > { %v3634_v7 = vadd.f32 %v837_v5, %v612_v53  ;;  %1099 = vperm.xlu1 %3096, %v3632_v4   ;;  %v774_v8 = vpop.f32.mrf.mxu0  ;;  %v819_v9 = vpop.f32.mrf.mxu1 }
  0xc9   : > { %v3638_v10 = vadd.f32 %v774_v8, %v3538_v12  ;;  %v3640_v11 = vadd.f32 %v819_v9, %v582_v42  ;;  %v597_v13 = vpop.permute.xlu1 %596  ;;  %v970_v14 = vld [vmem:[#allocation2 + $0xc0] sm:$0xff]  ;;  %v3646_v19 = vpop.permute.xlu0 %631 }
  0xca   : > { %884 = vst.msk [vmem:[#allocation2 + $0xc8] sm:$0xff] %vm858_vm2, %v3634_v7  ;;  %v3644_v15 = vadd.f32 %v828_v36, %v597_v13  ;;  %v1029_v21 = vmul.f32 %v970_v14, %v3587_v35  ;;  %v1280_v53 = vld [vmem:[#allocation2 + $0x18] sm:$0xff] }
  0xcb   : > { %863 = vst.msk [vmem:[#allocation2 + $0x20] sm:$0xff] %vm858_vm2, %v3638_v10  ;;  %v1180_v30 = vld [vmem:[#allocation2 + $0x90] sm:$0xff]  ;;  %v1290_v0 = vmul.f32 %v1280_v53, %v3587_v35 }
  0xcc   : > { %878 = vst.msk [vmem:[#allocation2 + $0x98] sm:$0xff] %vm858_vm2, %v3640_v11  ;;  %v3655_v12 = vadd.f32 %v1029_v21, %v3626_v1  ;;  %v1189_v42 = vmul.f32 %v1180_v30, %v3587_v35 }
  0xcd   : > { %881 = vst.msk [vmem:[#allocation2 + $0xb0] sm:$0xff] %vm858_vm2, %v3644_v15  ;;  %v3711_v13 = vadd.f32 %v1290_v0, %v3590_v39 }
  0xce   : > { %1042 = vperm.xlu2 %3097, %v3655_v12   ;;  %v3681_v49 = vadd.f32 %v1189_v42, %v3626_v1 }
  0xcf   : > { %v840_v32 = vpop.f32.mrf.mxu2  ;;  %5107 = vst [vmem:[#allocation6_spill] sm:$0xff] %v3711_v13 }
  0xd0   : > { %v3663_v36 = vadd.f32 %v840_v32, %v617_v28  ;;  %1193 = vperm.xlu1 %3096, %v3661_v31   ;;  %v777_v37 = vpop.f32.mrf.mxu0  ;;  %v822_v38 = vpop.f32.mrf.mxu1 }
  0xd1   : > { %v3668_v43 = vadd.f32 %v777_v37, %v3544_v16  ;;  %v3670_v44 = vadd.f32 %v822_v38, %v587_v63  ;;  %v602_v45 = vpop.permute.xlu0 %601  ;;  %v1074_v37 = vld [vmem:[#allocation2 + $0x8] sm:$0xff] }
  0xd2   : > { %885 = vst.msk [vmem:[#allocation2 + $0xd0] sm:$0xff] %vm858_vm2, %v3663_v36  ;;  %v3676_v47 = vadd.f32 %v831_v48, %v602_v45 }
  0xd3   : > { %864 = vst.msk [vmem:[#allocation2 + $0x28] sm:$0xff] %vm858_vm2, %v3668_v43 }
  0xd4   : > { %879 = vst.msk [vmem:[#allocation2 + $0xa0] sm:$0xff] %vm858_vm2, %v3670_v44  ;;  %v1592_v50 = vld [vmem:[#allocation2 + $0xb0] sm:$0xff] }
  0xd5   : > { %882 = vst.msk [vmem:[#allocation2 + $0xb8] sm:$0xff] %vm858_vm2, %v3676_v47  ;;  %v1601_v16 = vmul.f32 %v1592_v50, %v3587_v35 }
  0xd6   : > { %1202 = vperm.xlu2 %3097, %v3681_v49  }
  0xd7   : > { %v843_v55 = vpop.f32.mrf.mxu2  ;;  %v3688_v48 = vadd.f32 %v1601_v16, %v3626_v1 }
  0xd8   : > { %v3690_v57 = vadd.f32 %v843_v55, %v622_v62  ;;  %v780_v58 = vpop.f32.mrf.mxu0  ;;  %v825_v63 = vpop.f32.mrf.mxu1  ;;  %v973_v62 = vmul.f32 %v964_v2, %v3587_v35 }
  0xd9   : > { %5106 = vst [vmem:[#allocation5_spill] sm:$0xff] %v3688_v48  ;;  %v3694_v5 = vadd.f32 %v780_v58, %v3548_v18  ;;  %v3696_v6 = vadd.f32 %v825_v63, %v592_v54  ;;  %1614 = vperm.xlu0 %3095, %v3688_v48   ;;  %v1186_v8 = vld [vmem:[#allocation2 + $0xd0] sm:$0xff] }
  0xda   : > { %886 = vst.msk [vmem:[#allocation2 + $0xd8] sm:$0xff] %vm858_vm2, %v3690_v57  ;;  %v1235_v9 = vmul.f32 %v1186_v8, %v3587_v35  ;;  %v3716_v27 = vadd.f32 %v973_v62, %v3626_v1  ;;  %v1083_v8 = vld [vmem:[#allocation2 + $0xc8] sm:$0xff] }
  0xdb   : > { %865 = vst.msk [vmem:[#allocation2 + $0x30] sm:$0xff] %vm858_vm2, %v3694_v5  ;;  %v1386_v14 = vld [vmem:[#allocation2 + $0xa0] sm:$0xff]  ;;  %v1132_v62 = vmul.f32 %v1083_v8, %v3587_v35  ;;  %v642_v8 = vpop.permute.xlu1 %641 }
  0xdc   : > { %880 = vst.msk [vmem:[#allocation2 + $0xa8] sm:$0xff] %vm858_vm2, %v3696_v6  ;;  %v3708_v18 = vadd.f32 %v1235_v9, %v3626_v1  ;;  %v1395_v32 = vmul.f32 %v1386_v14, %v3587_v35 }
  0xde   : > { %1248 = vperm.xlu1 %3096, %v3708_v18   ;;  %1296 = vperm.xlu2 %3097, %v3711_v13   ;;  %v3733_v50 = vadd.f32 %v1395_v32, %v3626_v1  ;;  %v3763_v32 = vadd.f32 %v1132_v62, %v3626_v1 }
  0xdf   : > { %v846_v21 = vpop.f32.mrf.mxu2 }
  0xe0   : > { %v3719_v28 = vadd.f32 %v846_v21, %v3619_v61  ;;  %v783_v30 = vpop.f32.mrf.mxu0  ;;  %v1084_v61 = vmul.f32 %v1074_v37, %v3587_v35  ;;  %5110 = vst [vmem:[#allocation9_spill] sm:$0xff] %v3763_v32 }
  0xe1   : > { %v3723_v38 = vadd.f32 %v783_v30, %v3546_v17  ;;  %996 = vperm.xlu0 %3095, %v3716_v27   ;;  %v1289_v42 = vld [vmem:[#allocation2 + $0xd8] sm:$0xff]  ;;  %v1486_v17 = vld [vmem:[#allocation2 + $0x28] sm:$0xff] }
  0xe2   : > { %887 = vst.msk [vmem:[#allocation2 + $0xe0] sm:$0xff] %vm858_vm2, %v3719_v28  ;;  %v1338_v45 = vmul.f32 %v1289_v42, %v3587_v35  ;;  %v3741_v55 = vadd.f32 %v1084_v61, %v3590_v39  ;;  %v1496_v0 = vmul.f32 %v1486_v17, %v3587_v35  ;;  %v1589_v21 = vld [vmem:[#allocation2 + $0x30] sm:$0xff]  ;;  %v1283_v61 = vld [vmem:[#allocation2 + $0x98] sm:$0xff] }
  0xe3   : > { %866 = vst.msk [vmem:[#allocation2 + $0x38] sm:$0xff] %vm858_vm2, %v3723_v38  ;;  %v1489_v53 = vld [vmem:[#allocation2 + $0xa8] sm:$0xff] }
  0xe4   : > { %v3736_v16 = vadd.f32 %v1338_v45, %v3626_v1  ;;  %v1498_v2 = vmul.f32 %v1489_v53, %v3587_v35  ;;  %v1599_v45 = vmul.f32 %v1589_v21, %v3587_v35 }
  0xe6   : > { %5108 = vst [vmem:[#allocation7_spill] sm:$0xff] %v3736_v16  ;;  %1408 = vperm.xlu1 %3096, %v3733_v50   ;;  %1351 = vperm.xlu2 %3097, %v3736_v16   ;;  %v3758_v14 = vadd.f32 %v1498_v2, %v3626_v1  ;;  %v3779_v2 = vadd.f32 %v1599_v45, %v3590_v39 }
  0xe7   : > { %v849_v54 = vpop.f32.mrf.mxu2 }
  0xe8   : > { %v850_v58 = vadd.f32 %v849_v54, %v3646_v19  ;;  %v786_v63 = vpop.f32.mrf.mxu0  ;;  %v3755_v19 = vadd.f32 %v1496_v0, %v3590_v39  ;;  %5109 = vst [vmem:[#allocation8_spill] sm:$0xff] %v3758_v14 }
  0xe9   : > { %v3747_v9 = vadd.f32 %v786_v63, %v3559_v22  ;;  %1090 = vperm.xlu0 %3095, %v3741_v55   ;;  %v637_v22 = vpop.permute.xlu2 %636  ;;  %v1292_v63 = vmul.f32 %v1283_v61, %v3587_v35  ;;  %5111 = vst [vmem:[#allocation10_spill] sm:$0xff] %v3779_v2  ;;  %v1383_v61 = vld [vmem:[#allocation2 + $0x20] sm:$0xff] }
  0xea   : > { %888 = vst.msk [vmem:[#allocation2 + $0xe8] sm:$0xff] %vm858_vm2, %v850_v58 }
  0xeb   : > { %867 = vst.msk [vmem:[#allocation2 + $0x40] sm:$0xff] %vm858_vm2, %v3747_v9  ;;  %v3784_v21 = vadd.f32 %v1292_v63, %v3626_v1  ;;  %v1393_v63 = vmul.f32 %v1383_v61, %v3587_v35 }
  0xed   : > { %5112 = vst [vmem:[#allocation11_spill] sm:$0xff] %v3784_v21 }
  0xee   : > { %1502 = vperm.xlu1 %3096, %v3755_v19   ;;  %1511 = vperm.xlu2 %3097, %v3758_v14  }
  0xef   : > { %v852_v30 = vpop.f32.mrf.mxu2 }
  0xf0   : > { %v853_v37 = vadd.f32 %v852_v30, %v637_v22  ;;  %v789_v42 = vpop.f32.mrf.mxu0 }
  0xf1   : > { %v3767_v17 = vadd.f32 %v789_v42, %v3561_v23  ;;  %1145 = vperm.xlu0 %3095, %v3763_v32   ;;  %v1495_v53 = vld [vmem:[#allocation2 + $0xe8] sm:$0xff] }
  0xf2   : > { %889 = vst.msk [vmem:[#allocation2 + $0xf0] sm:$0xff] %vm858_vm2, %v853_v37  ;;  %v1544_v54 = vmul.f32 %v1495_v53, %v3587_v35  ;;  %v967_v23 = vld [vmem:[#allocation2 + $0x40] sm:$0xff] }
  0xf3   : > { %868 = vst.msk [vmem:[#allocation2 + $0x48] sm:$0xff] %vm858_vm2, %v3767_v17  ;;  %v1027_v42 = vmul.f32 %v967_v23, %v3587_v35 }
  0xf4   : > { %v3776_v0 = vadd.f32 %v1544_v54, %v3626_v1 }
  0xf5   : > { %v3797_v23 = vadd.f32 %v1027_v42, %v3590_v39 }
  0xf6   : > { %1557 = vperm.xlu1 %3096, %v3776_v0   ;;  %1605 = vperm.xlu2 %3097, %v3779_v2  }
  0xf7   : > { %v855_v62 = vpop.f32.mrf.mxu2 }
  0xf8   : > { %v856_v22 = vadd.f32 %v855_v62, %v642_v8  ;;  %v792_v30 = vpop.f32.mrf.mxu0  ;;  %v3805_v62 = vadd.f32 %v1393_v63, %v3590_v39 }
  0xf9   : > { %v3788_v53 = vadd.f32 %v792_v30, %v3554_v20  ;;  %1305 = vperm.xlu0 %3095, %v3784_v21   ;;  %v1598_v45 = vld [vmem:[#allocation2 + $0xf0] sm:$0xff]  ;;  %v1392_v30 = vld [vmem:[#allocation2 + $0xe0] sm:$0xff] }
  0xfa   : > { %890 = vst.msk [vmem:[#allocation2 + $0xf8] sm:$0xff] %vm858_vm2, %v856_v22  ;;  %918 = vmatpush.msrb.mxu2 %v856_v22  ;;  %v1647_v54 = vmul.f32 %v1598_v45, %v3587_v35  ;;  %v1080_v8 = vld [vmem:[#allocation2 + $0x48] sm:$0xff] }
  0xfb   : > { %869 = vst.msk [vmem:[#allocation2 + $0x50] sm:$0xff] %vm858_vm2, %v3788_v53  ;;  %v1130_v42 = vmul.f32 %v1080_v8, %v3587_v35 }
  0xfc   : > { %919 = vmatpush.msrb.mxu2 %v853_v37  ;;  %v3800_v20 = vadd.f32 %v1647_v54, %v3626_v1  ;;  %5114 = vst [vmem:[#allocation13_spill] sm:$0xff] %v3805_v62 }
  0xfd   : > { %v3816_v61 = vadd.f32 %v1130_v42, %v3590_v39 }
  0xfe   : > { %5113 = vst [vmem:[#allocation12_spill] sm:$0xff] %v3800_v20  ;;  %920 = vmatpush.msrb.mxu2 %v850_v58  ;;  %1033 = vperm.xlu1 %3096, %v3797_v23   ;;  %v1441_v58 = vmul.f32 %v1392_v30, %v3587_v35 }
  0xff   : > { %1660 = vperm.xlu2 %3097, %v3800_v20  }
 0x100   : > { %921 = vmatpush.msrb.mxu2 %v3719_v28  ;;  %v795_v22 = vpop.f32.mrf.mxu0 }
 0x101   : > { %v796_v37 = vadd.f32 %v795_v22, %v3568_v26  ;;  %1399 = vperm.xlu0 %3095, %v3805_v62   ;;  %v3821_v26 = vadd.f32 %v1441_v58, %v3626_v1 }
 0x102   : > { %922 = vmatpush.msrb.mxu2 %v3690_v57  ;;  %v1692_v57 = vld [vmem:[#allocation2 + $0x38] sm:$0xff] }
 0x103   : > { %870 = vst.msk [vmem:[#allocation2 + $0x58] sm:$0xff] %vm858_vm2, %v796_v37  ;;  %v1702_v54 = vmul.f32 %v1692_v57, %v3587_v35 }
 0x104   : > { %923 = vmatpush.msrb.mxu2 %v3663_v36  ;;  %5115 = vst [vmem:[#allocation14_spill] sm:$0xff] %v3821_v26 }
 0x106   : > { %924 = vmatpush.msrb.mxu2 %v3634_v7 }
 0x107   : > { %1136 = vperm.xlu2 %3097, %v3816_v61  }
 0x108   : > { %925 = vmatpush.msrb.mxu2 %v3613_v56  ;;  %v798_v28 = vpop.f32.mrf.mxu0 }
 0x109   : > { %v799_v45 = vadd.f32 %v798_v28, %v3566_v25  ;;  %1454 = vperm.xlu0 %3095, %v3821_v26   ;;  %v3837_v25 = vadd.f32 %v1702_v54, %v3590_v39 }
 0x10a   : > { %926 = vmatpush.msrb.mxu2 %v3676_v47  ;;  %v1286_v36 = vld [vmem:[#allocation2 + $0x58] sm:$0xff]  ;;  %v1183_v47 = vld [vmem:[#allocation2 + $0x50] sm:$0xff] }
 0x10b   : > { %871 = vst.msk [vmem:[#allocation2 + $0x60] sm:$0xff] %vm858_vm2, %v799_v45  ;;  %v1336_v7 = vmul.f32 %v1286_v36, %v3587_v35  ;;  %v1233_v22 = vmul.f32 %v1183_v47, %v3587_v35 }
 0x10c   : > { %927 = vmatpush.msrb.mxu2 %v3644_v15  ;;  %5116 = vst [vmem:[#allocation15_spill] sm:$0xff] %v3837_v25 }
 0x10d   : > { %v3832_v63 = vadd.f32 %v1336_v7, %v3590_v39 }
 0x10e   : > { %928 = vmatpush.msrb.mxu2 %v3696_v6 }
 0x10f   : > { %1342 = vperm.xlu1 %3096, %v3832_v63  }
 0x110   : > { %929 = vmatpush.msrb.mxu2 %v3670_v44  ;;  %v801_v56 = vpop.f32.mrf.mxu0  ;;  %v1698_v44 = vld [vmem:[#allocation2 + $0x78] sm:$0xff] }
 0x111   : > { %v802_v8 = vadd.f32 %v801_v56, %v3564_v24  ;;  %1708 = vperm.xlu0 %3095, %v3837_v25   ;;  %v892_v24 = vld [vmem:[%s5064_s8 + $0x8] sm:$0xff]  ;;  %v1748_v58 = vmul.f32 %v1698_v44, %v3587_v35  ;;  %v1695_v56 = vld [vmem:[#allocation2 + $0xb8] sm:$0xff] }
 0x112   : > { %930 = vmatpush.msrb.mxu2 %v3640_v11  ;;  %v1389_v15 = vld [vmem:[#allocation2 + $0x60] sm:$0xff]  ;;  %v3856_v11 = vadd.f32 %v1233_v22, %v3590_v39 }
 0x113   : > { %872 = vst.msk [vmem:[#allocation2 + $0x68] sm:$0xff] %vm858_vm2, %v802_v8  ;;  %v1439_v6 = vmul.f32 %v1389_v15, %v3587_v35  ;;  %v3865_v57 = vadd.f32 %v1748_v58, %v3590_v39  ;;  %v3935_v22 = vld [vmem:[%s5059_s3 + $0x1] ss:$4 sm:$0x3] }
 0x114   : > { %931 = vmatpush.msrb.mxu2 %v3617_v60  ;;  %5122 = vst [vmem:[#allocation21_spill] sm:$0xff] %v3935_v22  ;;  %v3945_v58 = vperm.slane %v3935_v22, 1 }
 0x115   : > { %v3848_v30 = vadd.f32 %v1439_v6, %v3590_v39  ;;  %5118 = vst [vmem:[#allocation17_spill] sm:$0xff] %v3865_v57 }
 0x116   : > { %932 = vmatpush.msrb.mxu2 %v3607_v52 }
 0x117   : > { %5117 = vst [vmem:[#allocation16_spill] sm:$0xff] %v3848_v30  ;;  %1445 = vperm.xlu2 %3097, %v3848_v30  }
 0x118   : > { %933 = vmatpush.msrb.mxu2 %v3594_v41  ;;  %v804_v42 = vpop.f32.mrf.mxu0  ;;  %v1701_v41 = vld [vmem:[#allocation2 + $0xf8] sm:$0xff] }
 0x119   : > { %v805_v60 = vadd.f32 %v804_v42, %v3583_v34  ;;  %1239 = vperm.xlu0 %3095, %v3856_v11   ;;  %934 = vmatmul.f32.vlgmr.msrb.gmra.mxu2 %v892_v24  ;;  %v1750_v54 = vmul.f32 %v1701_v41, %v3587_v35 }
 0x11a   : > { %v1492_v52 = vld [vmem:[#allocation2 + $0x68] sm:$0xff] }
 0x11b   : > { %873 = vst.msk [vmem:[#allocation2 + $0x70] sm:$0xff] %vm858_vm2, %v805_v60  ;;  %896 = vmatpush.msrb.mxu1 %v805_v60  ;;  %v1542_v28 = vmul.f32 %v1492_v52, %v3587_v35  ;;  %v3942_v60 = vperm.slane %v3935_v22, 0 }
 0x11d   : > { %897 = vmatpush.msrb.mxu1 %v802_v8  ;;  %v3869_v34 = vadd.f32 %v1542_v28, %v3590_v39 }
 0x11f   : > { %898 = vmatpush.msrb.mxu1 %v799_v45  ;;  %1754 = vperm.xlu2 %3097, %v3865_v57   ;;  %5119 = vst [vmem:[#allocation18_spill] sm:$0xff] %v3869_v34 }
 0x121   : > { %899 = vmatpush.msrb.mxu1 %v796_v37  ;;  %1548 = vperm.xlu0 %3095, %v3869_v34   ;;  %v3882_v37 = vadd.f32 %v1750_v54, %v3626_v1 }
 0x122   : > { %v1595_v36 = vld [vmem:[#allocation2 + $0x70] sm:$0xff] }
 0x123   : > { %900 = vmatpush.msrb.mxu1 %v3788_v53  ;;  %v1645_v7 = vmul.f32 %v1595_v36, %v3587_v35  ;;  %5120 = vst [vmem:[#allocation19_spill] sm:$0xff] %v3882_v37  ;;  %v1704_v53 = vmul.f32 %v1695_v56, %v3587_v35 }
 0x125   : > { %901 = vmatpush.msrb.mxu1 %v3767_v17  ;;  %v3877_v45 = vadd.f32 %v1645_v7, %v3590_v39  ;;  %v3890_v17 = vadd.f32 %v1704_v53, %v3626_v1 }
 0x127   : > { %902 = vmatpush.msrb.mxu1 %v3747_v9  ;;  %1651 = vperm.xlu1 %3096, %v3877_v45   ;;  %v3897_v9 = vld [vmem:[%s5059_s3 + $0x2] ss:$4 sm:$0x3] }
 0x129   : > { %903 = vmatpush.msrb.mxu1 %v3723_v38  ;;  %1763 = vperm.xlu0 %3095, %v3882_v37  }
 0x12b   : > { %904 = vmatpush.msrb.mxu1 %v3694_v5  ;;  %v3902_v5 = vperm.slane %v3897_v9, 0 }
 0x12d   : > { %905 = vmatpush.msrb.mxu1 %v3668_v43  ;;  %v983_v43 = vpop.permute.xlu2 %982 }
 0x12f   : > { %906 = vmatpush.msrb.mxu1 %v3638_v10  ;;  %1717 = vperm.xlu1 %3096, %v3890_v17   ;;  %v891_v10 = vld [vmem:[%s5064_s8] sm:$0xff] }
 0x131   : > { %907 = vmatpush.msrb.mxu1 %v3615_v59 }
 0x133   : > { %908 = vmatpush.msrb.mxu1 %v3605_v51  ;;  %v5067_v51 = vmov 1  }
 0x134   : > { %3119 = vset.pattern.permute.xlu2 %v5067_v51 }
 0x135   : > { %909 = vmatpush.msrb.mxu1 %v3592_v40  ;;  %v3911_v59 = vpop.permute.xlu2 %1042 }
 0x137   : > { %910 = vmatpush.msrb.mxu1 %v3576_v29  ;;  %1896 = vrot.lane.b32.xlu1 %v3902_v5, %s3228_s24  ;;  %v3922_v29 = vld [vmem:[%s5059_s3] ss:$4 sm:$0x3] }
 0x138   : > { %911 = vmatmul.f32.vlgmr.msrb.gmra.mxu1 %v891_v10  ;;  %3118 = vset.pattern.permute.xlu1 %v5067_v51  ;;  %5121 = vst [vmem:[#allocation20_spill] sm:$0xff] %v3922_v29  ;;  %v3927_v15 = vperm.slane %v3922_v29, 0  ;;  %v3930_v6 = vperm.slane %v3922_v29, 1 }
 0x13a   : > { %v1100_v40 = vpop.permute.xlu1 %1099  ;;  %v985_v24 = vsub.f32 %v3927_v15, %v983_v43  ;;  %v986_v42 = vsub.f32 %v3930_v6, %v983_v43 }
 0x13c   : > { %v987_v7 = vmul.f32 %v985_v24, %v985_v24  ;;  %v988_v54 = vmul.f32 %v986_v42, %v986_v42 }
 0x13d   : > { %v1203_v38 = vpop.permute.xlu2 %1202 }
 0x13f   : > { %1915 = vrot.lane.b32.xlu1 %v3902_v5, %s3229_s12 }
 0x142   : > { %v1194_v8 = vpop.permute.xlu1 %1193 }
 0x143   : > { %v1196_v42 = vsub.f32 %v3927_v15, %v1194_v8 }
 0x145   : > { %v1297_v44 = vpop.permute.xlu2 %1296 }
 0x146   : > { %v1300_v14 = vsub.f32 %v3930_v6, %v1297_v44 }
 0x147   : > { %1934 = vrot.lane.b32.xlu1 %v3902_v5, %s3231_s15 }
 0x148   : > { %v1302_v48 = vmul.f32 %v1300_v14, %v1300_v14 }
 0x14b   : > { %v3924_v47 = vpop.permute.xlu0 %1614 }
 0x14c   : > { %v1617_v14 = vsub.f32 %v3942_v60, %v3924_v47 }
 0x14d   : > { %v3953_v51 = vpop.permute.xlu2 %1351 }
 0x14f   : > { %1953 = vrot.lane.b32.xlu1 %v3902_v5, %s3232_s20 }
 0x150   : > { %v3949_v36 = vpop.permute.xlu1 %1248 }
 0x153   : > { %v997_v52 = vpop.permute.xlu0 %996 }
 0x154   : > { %v999_v28 = vsub.f32 %v3942_v60, %v997_v52  ;;  %v1000_v41 = vsub.f32 %v3945_v58, %v997_v52 }
 0x155   : > { %v1512_v52 = vpop.permute.xlu2 %1511 }
 0x156   : > { %v1001_v56 = vmul.f32 %v999_v28, %v999_v28  ;;  %v1002_v53 = vmul.f32 %v1000_v41, %v1000_v41  ;;  %v1197_v28 = vsub.f32 %v3930_v6, %v1194_v8  ;;  %v1103_v41 = vsub.f32 %v3945_v58, %v1100_v40 }
 0x157   : > { %2195 = vrot.lane.b32.xlu1 %v3581_v33, %s3229_s12  ;;  %v1102_v33 = vsub.f32 %v3942_v60, %v1100_v40 }
 0x158   : > { %v1003_v43 = vadd.f32 %v1001_v56, %v987_v7  ;;  %v1004_v10 = vadd.f32 %v1002_v53, %v988_v54  ;;  %v1409_v1 = vpop.permute.xlu1 %1408  ;;  %v1205_v7 = vsub.f32 %v3942_v60, %v1203_v38  ;;  %v1206_v54 = vsub.f32 %v3945_v58, %v1203_v38 }
 0x159   : > { %v1299_v56 = vsub.f32 %v3927_v15, %v1297_v44  ;;  %v1199_v30 = vmul.f32 %v1197_v28, %v1197_v28  ;;  %v1104_v13 = vmul.f32 %v1102_v33, %v1102_v33  ;;  %v1105_v8 = vmul.f32 %v1103_v41, %v1103_v41 }
 0x15a   : > { %v1207_v29 = vmul.f32 %v1205_v7, %v1205_v7  ;;  %v1208_v32 = vmul.f32 %v1206_v54, %v1206_v54  ;;  %v1411_v44 = vsub.f32 %v3942_v60, %v1409_v1  ;;  %v1024_v28 = vmin.f32 %v1004_v10, 1e+30 }
 0x15b   : > { %v1091_v3 = vpop.permute.xlu0 %1090  ;;  %v1301_v37 = vmul.f32 %v1299_v56, %v1299_v56  ;;  %v1514_v41 = vsub.f32 %v3942_v60, %v1512_v52  ;;  %v1412_v62 = vsub.f32 %v3945_v58, %v1409_v1 }
 0x15c   : > { %v1093_v20 = vsub.f32 %v3927_v15, %v1091_v3  ;;  %v1094_v24 = vsub.f32 %v3930_v6, %v1091_v3  ;;  %v1198_v3 = vmul.f32 %v1196_v42, %v1196_v42  ;;  %v1023_v42 = vmin.f32 %v1003_v43, 1e+30 }
 0x15d   : > { %v1413_v43 = vmul.f32 %v1411_v44, %v1411_v44  ;;  %v1516_v44 = vmul.f32 %v1514_v41, %v1514_v41 }
 0x15e   : > { %v1095_v53 = vmul.f32 %v1093_v20, %v1093_v20  ;;  %v1096_v2 = vmul.f32 %v1094_v24, %v1094_v24  ;;  %v1209_v34 = vadd.f32 %v1207_v29, %v1198_v3  ;;  %v1210_v20 = vadd.f32 %v1208_v32, %v1199_v30  ;;  %v1606_v24 = vpop.permute.xlu2 %1605 }
 0x15f   : > { %1014 = vperm.xlu1 %3118, %v3716_v27   ;;  %v1618_v30 = vsub.f32 %v3945_v58, %v3924_v47  ;;  %v1608_v29 = vsub.f32 %v3927_v15, %v1606_v24 }
 0x160   : > { %v1503_v27 = vpop.permute.xlu1 %1502  ;;  %v1106_v38 = vadd.f32 %v1104_v13, %v1095_v53  ;;  %v1107_v25 = vadd.f32 %v1105_v8, %v1096_v2  ;;  %v1515_v13 = vsub.f32 %v3945_v58, %v1512_v52  ;;  %v1414_v53 = vmul.f32 %v1412_v62, %v1412_v62 }
 0x161   : > { %v1506_v7 = vsub.f32 %v3930_v6, %v1503_v27  ;;  %v3987_v8 = vperm.slane %v3897_v9, 1 }
 0x162   : > { %v1126_v32 = vmin.f32 %v1023_v42, %v1106_v38  ;;  %v1127_v2 = vmin.f32 %v1024_v28, %v1107_v25  ;;  %v1517_v42 = vmul.f32 %v1515_v13, %v1515_v13  ;;  %v1610_v28 = vmul.f32 %v1608_v29, %v1608_v29 }
 0x163   : > { %v3956_v57 = vpop.permute.xlu0 %1145  ;;  %v1508_v25 = vmul.f32 %v1506_v7, %v1506_v7  ;;  %5123 = vst [vmem:[#allocation22_spill] sm:$0xff] %v3987_v8  ;;  %1898 = vrot.lane.b32.xlu2 %v3987_v8, %s3228_s24 }
 0x164   : > { %v1229_v47 = vmin.f32 %v1126_v32, %v1209_v34 }
 0x165   : > { %v1519_v34 = vadd.f32 %v1517_v42, %v1508_v25 }
 0x166   : > { %v3991_v7 = vpop.permute.xlu2 %1660 }
 0x168   : > { %v3982_v1 = vpop.permute.xlu1 %1557 }
 0x16b   : > { %v1306_v16 = vpop.permute.xlu0 %1305  ;;  %1917 = vrot.lane.b32.xlu2 %v3987_v8, %s3229_s12 }
 0x16c   : > { %v1308_v22 = vsub.f32 %v3942_v60, %v1306_v16  ;;  %v1309_v40 = vsub.f32 %v3945_v58, %v1306_v16  ;;  %v1505_v16 = vsub.f32 %v3927_v15, %v1503_v27 }
 0x16e   : > { %v1310_v26 = vmul.f32 %v1308_v22, %v1308_v22  ;;  %v1311_v33 = vmul.f32 %v1309_v40, %v1309_v40  ;;  %v1609_v22 = vsub.f32 %v3930_v6, %v1606_v24  ;;  %v1507_v3 = vmul.f32 %v1505_v16, %v1505_v16 }
 0x16f   : > { %v1230_v40 = vmin.f32 %v1127_v2, %v1210_v20  ;;  %v1620_v16 = vmul.f32 %v1618_v30, %v1618_v30 }
 0x170   : > { %v1312_v54 = vadd.f32 %v1310_v26, %v1301_v37  ;;  %v1313_v27 = vadd.f32 %v1311_v33, %v1302_v48  ;;  %v1611_v21 = vmul.f32 %v1609_v22, %v1609_v22  ;;  %v1619_v33 = vmul.f32 %v1617_v14, %v1617_v14 }
 0x171   : > { %v1518_v9 = vadd.f32 %v1516_v44, %v1507_v3 }
 0x172   : > { %v1332_v48 = vmin.f32 %v1229_v47, %v1312_v54  ;;  %v1333_v26 = vmin.f32 %v1230_v40, %v1313_v27  ;;  %v3993_v41 = vadd.f32 %v1619_v33, %v1610_v28  ;;  %v3995_v13 = vadd.f32 %v1620_v16, %v1611_v21 }
 0x173   : > { %v1400_v10 = vpop.permute.xlu0 %1399  ;;  %v1045_v21 = vsub.f32 %v3942_v60, %v3911_v59  ;;  %v1046_v27 = vsub.f32 %v3945_v58, %v3911_v59  ;;  %v1148_v40 = vsub.f32 %v3942_v60, %v3956_v57  ;;  %1936 = vrot.lane.b32.xlu2 %v3987_v8, %s3231_s15  ;;  %v1251_v28 = vsub.f32 %v3942_v60, %v3949_v36 }
 0x174   : > { %v1402_v52 = vsub.f32 %v3927_v15, %v1400_v10  ;;  %v1403_v56 = vsub.f32 %v3930_v6, %v1400_v10  ;;  %v1034_v10 = vpop.permute.xlu1 %1033  ;;  %v1355_v33 = vsub.f32 %v3945_v58, %v3953_v51 }
 0x175   : > { %v1037_v54 = vsub.f32 %v3930_v6, %v1034_v10  ;;  %v1047_v25 = vmul.f32 %v1045_v21, %v1045_v21  ;;  %v1048_v47 = vmul.f32 %v1046_v27, %v1046_v27 }
 0x176   : > { %v1404_v38 = vmul.f32 %v1402_v52, %v1402_v52  ;;  %v1405_v24 = vmul.f32 %v1403_v56, %v1403_v56  ;;  %v1137_v52 = vpop.permute.xlu2 %1136 }
 0x177   : > { %v1039_v3 = vmul.f32 %v1037_v54, %v1037_v54  ;;  %v1140_v44 = vsub.f32 %v3930_v6, %v1137_v52 }
 0x178   : > { %v1415_v37 = vadd.f32 %v1413_v43, %v1404_v38  ;;  %v1416_v62 = vadd.f32 %v1414_v53, %v1405_v24  ;;  %v1036_v43 = vsub.f32 %v3927_v15, %v1034_v10  ;;  %v1149_v38 = vsub.f32 %v3945_v58, %v3956_v57 }
 0x179   : > { %v1139_v24 = vsub.f32 %v3927_v15, %v1137_v52  ;;  %v1050_v42 = vadd.f32 %v1048_v47, %v1039_v3  ;;  %v1354_v57 = vsub.f32 %v3942_v60, %v3953_v51 }
 0x17a   : > { %v1435_v20 = vmin.f32 %v1332_v48, %v1415_v37  ;;  %v1436_v32 = vmin.f32 %v1333_v26, %v1416_v62  ;;  %v1038_v53 = vmul.f32 %v1036_v43, %v1036_v43  ;;  %v1252_v48 = vsub.f32 %v3945_v58, %v3949_v36 }
 0x17b   : > { %v1455_v2 = vpop.permute.xlu0 %1454  ;;  %v1150_v26 = vmul.f32 %v1148_v40, %v1148_v40  ;;  %v1151_v37 = vmul.f32 %v1149_v38, %v1149_v38  ;;  %v1141_v16 = vmul.f32 %v1139_v24, %v1139_v24  ;;  %v1070_v10 = vmin.f32 %v1050_v42, 1e+30  ;;  %1955 = vrot.lane.b32.xlu2 %v3987_v8, %s3232_s20 }
 0x17c   : > { %v3997_v29 = vmin.f32 %v1435_v20, %v1518_v9  ;;  %v3999_v22 = vmin.f32 %v1436_v32, %v1519_v34  ;;  %v1049_v59 = vadd.f32 %v1047_v25, %v1038_v53  ;;  %v1142_v9 = vmul.f32 %v1140_v44, %v1140_v44 }
 0x17d   : > { %v1253_v36 = vmul.f32 %v1251_v28, %v1251_v28  ;;  %v1254_v21 = vmul.f32 %v1252_v48, %v1252_v48  ;;  %v1152_v53 = vadd.f32 %v1150_v26, %v1141_v16  ;;  %v1457_v44 = vsub.f32 %v3942_v60, %v1455_v2 }
 0x17e   : > { %v1641_v14 = vmin.f32 %v3997_v29, %v3993_v41  ;;  %v1642_v30 = vmin.f32 %v3999_v22, %v3995_v13  ;;  %v1446_v34 = vpop.permute.xlu2 %1445  ;;  %v1069_v32 = vmin.f32 %v1049_v59, 1e+30  ;;  %v1153_v3 = vadd.f32 %v1151_v37, %v1142_v9 }
 0x17f   : > { %v1458_v59 = vsub.f32 %v3945_v58, %v1455_v2  ;;  %v1356_v48 = vmul.f32 %v1354_v57, %v1354_v57  ;;  %v1560_v26 = vsub.f32 %v3942_v60, %v3982_v1  ;;  %v1561_v37 = vsub.f32 %v3945_v58, %v3982_v1 }
 0x180   : > { %v1172_v47 = vmin.f32 %v1069_v32, %v1152_v53  ;;  %v1173_v40 = vmin.f32 %v1070_v10, %v1153_v3  ;;  %v1449_v16 = vsub.f32 %v3930_v6, %v1446_v34  ;;  %v1663_v2 = vsub.f32 %v3942_v60, %v3991_v7 }
 0x181   : > { %v1343_v62 = vpop.permute.xlu1 %1342  ;;  %v1664_v57 = vsub.f32 %v3945_v58, %v3991_v7  ;;  %v1460_v1 = vmul.f32 %v1458_v59, %v1458_v59 }
 0x182   : > { %v1345_v27 = vsub.f32 %v3927_v15, %v1343_v62  ;;  %v1346_v52 = vsub.f32 %v3930_v6, %v1343_v62  ;;  %v1448_v62 = vsub.f32 %v3927_v15, %v1446_v34  ;;  %v1563_v34 = vmul.f32 %v1561_v37, %v1561_v37 }
 0x183   : > { %v4013_v56 = vpop.permute.xlu0 %1708  ;;  %1972 = vrot.lane.b32.xlu2 %v3902_v5, %s3233_s21  ;;  %v1666_v37 = vmul.f32 %v1664_v57, %v1664_v57 }
 0x184   : > { %v1347_v42 = vmul.f32 %v1345_v27, %v1345_v27  ;;  %v1348_v28 = vmul.f32 %v1346_v52, %v1346_v52  ;;  %v1562_v52 = vmul.f32 %v1560_v26, %v1560_v26  ;;  %v1665_v26 = vmul.f32 %v1663_v2, %v1663_v2 }
 0x185   : > { %v1711_v2 = vsub.f32 %v3927_v15, %v4013_v56  ;;  %v1712_v57 = vsub.f32 %v3930_v6, %v4013_v56 }
 0x18b   : > { %v1240_v20 = vpop.permute.xlu0 %1239 }
 0x18c   : > { %v1242_v43 = vsub.f32 %v3927_v15, %v1240_v20  ;;  %v1243_v54 = vsub.f32 %v3930_v6, %v1240_v20  ;;  %v1357_v20 = vmul.f32 %v1355_v33, %v1355_v33 }
 0x18e   : > { %v1244_v25 = vmul.f32 %v1242_v43, %v1242_v43  ;;  %v1245_v51 = vmul.f32 %v1243_v54, %v1243_v54  ;;  %v1755_v54 = vpop.permute.xlu2 %1754  ;;  %v1359_v27 = vadd.f32 %v1357_v20, %v1348_v28 }
 0x18f   : > { %v1757_v7 = vsub.f32 %v3927_v15, %v1755_v54 }
 0x190   : > { %v1255_v38 = vadd.f32 %v1253_v36, %v1244_v25  ;;  %v1256_v24 = vadd.f32 %v1254_v21, %v1245_v51  ;;  %v1459_v36 = vmul.f32 %v1457_v44, %v1457_v44  ;;  %v1358_v21 = vadd.f32 %v1356_v48, %v1347_v42 }
 0x191   : > { %v1450_v25 = vmul.f32 %v1448_v62, %v1448_v62  ;;  %v1451_v51 = vmul.f32 %v1449_v16, %v1449_v16 }
 0x192   : > { %v1275_v9 = vmin.f32 %v1172_v47, %v1255_v38  ;;  %v1276_v32 = vmin.f32 %v1173_v40, %v1256_v24  ;;  %v1758_v38 = vsub.f32 %v3930_v6, %v1755_v54  ;;  %v1759_v54 = vmul.f32 %v1757_v7, %v1757_v7 }
 0x193   : > { %v1549_v10 = vpop.permute.xlu0 %1548  ;;  %v1461_v24 = vadd.f32 %v1459_v36, %v1450_v25  ;;  %v1462_v44 = vadd.f32 %v1460_v1, %v1451_v51 }
 0x194   : > { %v1551_v33 = vsub.f32 %v3927_v15, %v1549_v10  ;;  %v1552_v43 = vsub.f32 %v3930_v6, %v1549_v10  ;;  %v1378_v47 = vmin.f32 %v1275_v9, %v1358_v21  ;;  %v1379_v40 = vmin.f32 %v1276_v32, %v1359_v27 }
 0x195   : > { %v1760_v36 = vmul.f32 %v1758_v38, %v1758_v38 }
 0x196   : > { %v1553_v53 = vmul.f32 %v1551_v33, %v1551_v33  ;;  %v1554_v3 = vmul.f32 %v1552_v43, %v1552_v43  ;;  %v1481_v62 = vmin.f32 %v1378_v47, %v1461_v24  ;;  %v1482_v16 = vmin.f32 %v1379_v40, %v1462_v44 }
 0x198   : > { %v1564_v59 = vadd.f32 %v1562_v52, %v1553_v53  ;;  %v1565_v42 = vadd.f32 %v1563_v34, %v1554_v3 }
 0x199   : > { %v1652_v28 = vpop.permute.xlu1 %1651 }
 0x19a   : > { %v1654_v48 = vsub.f32 %v3927_v15, %v1652_v28  ;;  %v1655_v20 = vsub.f32 %v3930_v6, %v1652_v28  ;;  %v1584_v1 = vmin.f32 %v1481_v62, %v1564_v59  ;;  %v1585_v21 = vmin.f32 %v1482_v16, %v1565_v42 }
 0x19b   : > { %v1764_v9 = vpop.permute.xlu0 %1763  ;;  %v1713_v59 = vmul.f32 %v1711_v2, %v1711_v2  ;;  %v1714_v42 = vmul.f32 %v1712_v57, %v1712_v57 }
 0x19c   : > { %v1656_v32 = vmul.f32 %v1654_v48, %v1654_v48  ;;  %v1657_v10 = vmul.f32 %v1655_v20, %v1655_v20  ;;  %v1766_v33 = vsub.f32 %v3942_v60, %v1764_v9  ;;  %v1767_v43 = vsub.f32 %v3945_v58, %v1764_v9 }
 0x19e   : > { %v1667_v27 = vadd.f32 %v1665_v26, %v1656_v32  ;;  %v1668_v52 = vadd.f32 %v1666_v37, %v1657_v10  ;;  %v1768_v34 = vmul.f32 %v1766_v33, %v1766_v33  ;;  %v1769_v53 = vmul.f32 %v1767_v43, %v1767_v43 }
 0x1a0   : > { %v1687_v3 = vmin.f32 %v1584_v1, %v1667_v27  ;;  %v1688_v25 = vmin.f32 %v1585_v21, %v1668_v52  ;;  %v1770_v51 = vadd.f32 %v1768_v34, %v1759_v54  ;;  %v1771_v47 = vadd.f32 %v1769_v53, %v1760_v36 }
 0x1a1   : > { %v1718_v40 = vpop.permute.xlu1 %1717 }
 0x1a2   : > { %v1790_v24 = vmin.f32 %v1687_v3, %v1770_v51  ;;  %v1791_v7 = vmin.f32 %v1688_v25, %v1771_v47  ;;  %v1720_v38 = vsub.f32 %v3942_v60, %v1718_v40  ;;  %v1721_v44 = vsub.f32 %v3945_v58, %v1718_v40 }
 0x1a4   : > { %v1806_v28 = vrot.slane %v1790_v24, 4  ;;  %v1812_v48 = vrot.slane %v1791_v7, 4  ;;  %v1722_v20 = vmul.f32 %v1720_v38, %v1720_v38  ;;  %v1723_v26 = vmul.f32 %v1721_v44, %v1721_v44 }
 0x1a6   : > { %v1807_v37 = vmin.f32 %v1790_v24, %v1806_v28  ;;  %v1813_v62 = vmin.f32 %v1791_v7, %v1812_v48  ;;  %v1724_v56 = vadd.f32 %v1722_v20, %v1713_v59  ;;  %v1725_v16 = vadd.f32 %v1723_v26, %v1714_v42  ;;  %v935_v24 = vpop.f32.mrf.mxu2 }
 0x1a7   : > { %v1886_v59 = vlaneseq }
 0x1a8   : > { %v1808_v9 = vrot.slane %v1807_v37, 2  ;;  %v1814_v32 = vrot.slane %v1813_v62, 2  ;;  %v1744_v10 = vmin.f32 %v1641_v14, %v1724_v56  ;;  %v1745_v33 = vmin.f32 %v1642_v30, %v1725_v16 }
 0x1a9   : > { %v4071_v43 = vpop.permute.xlu1 %1896  ;;  %vm4086_vm6 = vcmp.lt.s32.totalorder %v1886_v59, 256 }
 0x1aa   : > { %v1809_v54 = vmin.f32 %v1807_v37, %v1808_v9  ;;  %v1815_v36 = vmin.f32 %v1813_v62, %v1814_v32  ;;  %v1794_v1 = vrot.slane %v1744_v10, 4  ;;  %v1800_v21 = vrot.slane %v1745_v33, 4 }
 0x1ab   : > { %v5089_v9 = vmov 0.0  }
 0x1ac   : > { %v1795_v27 = vmin.f32 %v1744_v10, %v1794_v1  ;;  %v1801_v52 = vmin.f32 %v1745_v33, %v1800_v21  ;;  %v1810_v34 = vrot.slane %v1809_v54, 1  ;;  %v1816_v53 = vrot.slane %v1815_v36, 1 }
 0x1ae   : > { %v1796_v2 = vrot.slane %v1795_v27, 2  ;;  %v1802_v57 = vrot.slane %v1801_v52, 2  ;;  %v1811_v3 = vmin.f32 %v1809_v54, %v1810_v34  ;;  %v1817_v25 = vmin.f32 %v1815_v36, %v1816_v53 }
 0x1b0   : > { %v1797_v41 = vmin.f32 %v1795_v27, %v1796_v2  ;;  %v1803_v29 = vmin.f32 %v1801_v52, %v1802_v57  ;;  %v1849_v14 = vmul.f32 -20.0, %v1817_v25  ;;  %v1848_v51 = vmul.f32 -20.0, %v1811_v3 }
 0x1b1   : > { %v4073_v13 = vpop.permute.xlu1 %1915 }
 0x1b2   : > { %v1798_v22 = vrot.slane %v1797_v41, 1  ;;  %v1804_v30 = vrot.slane %v1803_v29, 1  ;;  %v1852_v47 = vmul.f32 1.442695, %v1849_v14  ;;  %v1850_v40 = vmul.f32 1.442695, %v1848_v51 }
 0x1b3   : > { %v5126_v14 = vmov 0  }
 0x1b4   : > { %v1799_v7 = vmin.f32 %v1797_v41, %v1798_v22  ;;  %v1805_v38 = vmin.f32 %v1803_v29, %v1804_v30  ;;  %3194 = vpow2.f32 %v1852_v47  ;;  %v4125_v29 = vand.u32 127, %v1886_v59 }
 0x1b5   : > { %v912_v44 = vpop.f32.mrf.mxu1  ;;  %3196 = vpow2.f32 %v1850_v40 }
 0x1b6   : > { %v936_v42 = vadd.f32 %v935_v24, %v912_v44  ;;  %v1842_v28 = vmul.f32 -20.0, %v1799_v7  ;;  %v1843_v48 = vmul.f32 -20.0, %v1805_v38  ;;  %v1866_v20 = vmin.f32 %v1799_v7, %v1811_v3 }
 0x1b7   : > { %v1867_v26 = vmin.f32 %v1805_v38, %v1817_v25  ;;  %vm1888_vm7 = vcmp.lt.s32.totalorder %v4125_v29, 1  ;;  %vm1912_vm12 = vcmp.lt.s32.totalorder %v4125_v29, 127  ;;  %vm1931_vm13 = vcmp.lt.s32.totalorder %v4125_v29, 2 }
 0x1b8   : > { %v942_v37 = vmul.f32 %v3587_v35, %v936_v42  ;;  %v1846_v62 = vmul.f32 1.442695, %v1843_v48  ;;  %vm1868_vm3 = vcmp.gt.f32.partialorder %v1866_v20, 0.03465736  ;;  %v1844_v16 = vmul.f32 1.442695, %v1842_v28 }
 0x1b9   : > { %v4077_v56 = vpop.permute.xlu1 %1934  ;;  %vm1869_vm4 = vcmp.gt.f32.partialorder %v1867_v26, 0.03465736  ;;  %v4080_v32 = vsel %vm1868_vm3, 1.0, %v5089_v9  ;;  %vm1950_vm14 = vcmp.lt.s32.totalorder %v4125_v29, 126 }
 0x1ba   : > { %v3195_v10 = vpop.eup %3194  ;;  %v4083_v33 = vsel %vm1869_vm4, 1.0, %v5089_v9  ;;  %v944_v36 = vadd.f32 %v3590_v39, %v942_v37  ;;  %3198 = vpow2.f32 %v1846_v62  ;;  %v4153_v37 = vld [vmem:[%s3574_s25] sm:$0x7]  ;;  %s3236_s25 = smov 16  }
 0x1bb   : > { %v3197_v1 = vpop.eup %3196  ;;  %v2262_v21 = vrot.slane %v3195_v10, 7  ;;  %v2270_v27 = vrot.slane %v4083_v33, 7  ;;  %v3098_v52 = vpack.i.bf16 %v4083_v33, %v4080_v32  ;;  %3200 = vpow2.f32 %v1844_v16 }
 0x1bc   : > { %946 = vrot.lane.b32.xlu2 %v944_v36, %s3229_s12 }
 0x1bd   : > { %3099 = vrot.lane.b32.xlu0 %v3098_v52, %s3228_s24  ;;  %v2263_v39 = vsel %vm2242_vm5, %v3197_v1, %v2262_v21  ;;  %v2271_v34 = vsel %vm2242_vm5, %v4080_v32, %v2270_v27  ;;  %v1899_v22 = vpop.permute.xlu2 %1898  ;;  %v5131_v1 = vmov 1  }
 0x1be   : > { %2988 = vst.msk [vmem:[%s4094_s27 + $0x13] ss:$8 sm:$0x3] %vm4086_vm6, %v2263_v39  ;;  %v4134_v47 = vsel %vm1888_vm7, %v4071_v43, %v1899_v22  ;;  %v4139_v40 = vsel %vm1888_vm7, %v1899_v22, %v4071_v43 }
 0x1bf   : > { %2989 = vst.msk [vmem:[%s4094_s27 + $0x14] ss:$8 sm:$0x3] %vm4086_vm6, %v2271_v34  ;;  %vm1902_vm0 = vcmp.eq.f32.partialorder %v4139_v40, %v3902_v5  ;;  %vm1903_vm1 = vcmp.eq.f32.partialorder %v4134_v47, %v3987_v8 }
 0x1c0   : > { %2994 = vst.msk [vmem:[%s4094_s27 + $0x24] ss:$8 sm:$0x3] %vm4086_vm6, %v2263_v39  ;;  %v3199_v53 = vpop.eup %3198 }
 0x1c1   : > { %2995 = vst.msk [vmem:[%s4094_s27 + $0x25] ss:$8 sm:$0x3] %vm4086_vm6, %v2271_v34  ;;  %v1954_v2 = vpop.permute.xlu1 %1953  ;;  %v2254_v57 = vrot.slane %v3199_v53, 7  ;;  %v3201_v3 = vpop.eup %3200 }
 0x1c2   : > { %5127 = vst [vmem:[#allocation23_spill] sm:$0xff] %v4134_v47 }
 0x1c3   : > { %v2255_v25 = vsel %vm2242_vm5, %v3201_v3, %v2254_v57  ;;  %5128 = vst [vmem:[#allocation24_spill] sm:$0xff] %v4139_v40 }
 0x1c4   : > { %1052 = vperm.xlu2 %3119, %v3797_v23   ;;  %2987 = vst.msk [vmem:[%s4094_s27 + $0x12] ss:$8 sm:$0x3] %vm4086_vm6, %v2255_v25 }
 0x1c5   : > { %2993 = vst.msk [vmem:[%s4094_s27 + $0x23] ss:$8 sm:$0x3] %vm4086_vm6, %v2255_v25  ;;  %v1918_v48 = vpop.permute.xlu2 %1917 }
 0x1c6   : > { %v4145_v43 = vsel %vm1912_vm12, %v4073_v13, %v1918_v48  ;;  %v4150_v26 = vsel %vm1912_vm12, %v1918_v48, %v4073_v13 }
 0x1c7   : > { %5129 = vst [vmem:[#allocation25_spill] sm:$0xff] %v4145_v43  ;;  %vm1921_vm2 = vcmp.eq.f32.partialorder %v4145_v43, %v3902_v5  ;;  %vm1922_vm3 = vcmp.eq.f32.partialorder %v4150_v26, %v3987_v8 }
 0x1c8   : > { %5130 = vst [vmem:[#allocation26_spill] sm:$0xff] %v4150_v26 }
 0x1c9   : > { %v2196_v41 = vpop.permute.xlu1 %2195 }
 0x1ca   : > { %3202 = vrcp.f32 %v2196_v41  ;;  %v2209_v30 = vand.u32 2147483648, %v2196_v41  ;;  %vm2203_vm8 = vweird.f32 %v2196_v41  ;;  %v2207_v7 = vand.u32 2147483647, %v2196_v41 }
 0x1cc   : > { %1993 = vrot.lane.b32.xlu2 %v3987_v8, %s3235_s28  ;;  %v2210_v44 = vor.u32 1.1754944e-38, %v2209_v30  ;;  %vm2208_vm11 = vcmp.eq.f32.partialorder %v2207_v7, 8.507059e+37 }
 0x1cd   : > { %3125 = vset.pattern.permute.xlu2 %v5126_v14  ;;  %v1937_v16 = vpop.permute.xlu2 %1936 }
 0x1ce   : > { %v1938_v10 = vsel %vm1931_vm13, %v4077_v56, %v1937_v16  ;;  %v1939_v36 = vsel %vm1931_vm13, %v1937_v16, %v4077_v56 }
 0x1cf   : > { %vm1940_vm4 = vcmp.eq.f32.partialorder %v1939_v36, %v3902_v5 }
 0x1d0   : > { %v3203_v23 = vpop.eup %3202 }
 0x1d1   : > { %v2199_v51 = vmul.f32 %v3203_v23, %v2196_v41  ;;  %vm2204_vm9 = vweird.f32 %v3203_v23 }
 0x1d2   : > { %vm2205_vm10 = vmor %vm2203_vm8, %vm2204_vm9  ;;  %vm1941_vm8 = vcmp.eq.f32.partialorder %v1938_v10, %v3987_v8 }
 0x1d3   : > { %v2200_v24 = vsub.f32 1.0, %v2199_v51 }
 0x1d5   : > { %v2201_v38 = vmul.f32 %v3203_v23, %v2200_v24  ;;  %v1956_v13 = vpop.permute.xlu2 %1955 }
 0x1d6   : > { %v4168_v21 = vsel %vm1950_vm14, %v1954_v2, %v1956_v13  ;;  %v4172_v27 = vsel %vm1950_vm14, %v1956_v13, %v1954_v2 }
 0x1d7   : > { %v2202_v42 = vadd.f32 %v3203_v23, %v2201_v38  ;;  %vm1959_vm9 = vcmp.eq.f32.partialorder %v4168_v21, %v3902_v5  ;;  %v5135_v21 = vld [vmem:[#allocation11_spill] sm:$0xff] }
 0x1d9   : > { %v2206_v28 = vsel %vm2205_vm10, %v3203_v23, %v2202_v42  ;;  %vm1960_vm10 = vcmp.eq.f32.partialorder %v4172_v27, %v3987_v8 }
 0x1da   : > { %v2211_v20 = vsel %vm2208_vm11, %v2210_v44, %v2206_v28  ;;  %vm2441_vm11 = vcmask 130048  }
 0x1db   : > { %v2212_v62 = vmul.f32 %v4153_v37, %v2211_v20 }
 0x1dd   : > { %2221 = vperm.xlu2 %3125, %v2212_v62  }
 0x1e5   : > { %3127 = vset.pattern.permute.xlu2 %v5131_v1 }
 0x1e6   : > { %1109 = vperm.xlu2 %3127, %v3741_v55   ;;  %v4179_v55 = vpop.permute.xlu2 %1972 }
 0x1ee   : > { %2012 = vrot.lane.b32.xlu2 %v3987_v8, %s3236_s25 }
 0x1f6   : > { %1155 = vperm.xlu2 %3127, %v3816_v61  }
 0x1fe   : > { %1220 = vperm.xlu2 %3127, %v3681_v49  }
 0x206   : > { %1266 = vperm.xlu2 %3127, %v3708_v18  }
 0x20e   : > { %1361 = vperm.xlu2 %3127, %v3832_v63  }
 0x216   : > { %1426 = vperm.xlu2 %3127, %v3733_v50   ;;  %v947_v56 = vpop.permute.xlu2 %946 }
 0x217   : > { %950 = vst.msk [vmem:[%s4186_s16] sm:$0xff] %vm949_vm15, %v947_v56 }
 0x21e   : > { %1521 = vperm.xlu2 %3127, %v3755_v19  }
 0x226   : > { %1575 = vperm.xlu2 %3127, %v3776_v0  }
 0x22e   : > { %1670 = vperm.xlu2 %3127, %v3877_v45  }
 0x22f   : > { %v3100_v49 = vpop.permute.xlu0 %3099 }
 0x230   : > { %v3102_v18 = vunpack.i.h.bf16 %v3100_v49  ;;  %v3101_v61 = vunpack.i.l.bf16 %v3100_v49  ;;  %v5138_v49 = vld [vmem:[#allocation18_spill] sm:$0xff] }
 0x232   : > { %v1889_v50 = vsel %vm1888_vm7, %v3101_v61, %v3102_v18  ;;  %v1890_v63 = vsel %vm1888_vm7, %v3102_v18, %v3101_v61  ;;  %v5139_v61 = vld [vmem:[#allocation5_spill] sm:$0xff] }
 0x233   : > { %v1904_v19 = vsel %vm1902_vm0, %v1890_v63, 1.0  ;;  %v1905_v0 = vsel %vm1903_vm1, %v1889_v50, 1.0  ;;  %v5140_v50 = vld [vmem:[#allocation15_spill] sm:$0xff]  ;;  %v4300_v63 = vpop.permute.xlu1 %1014 }
 0x234   : > { %v1906_v45 = vmin.f32 %v4080_v32, %v1904_v19  ;;  %v1907_v52 = vmin.f32 %v4083_v33, %v1905_v0 }
 0x236   : > { %1735 = vperm.xlu2 %3127, %v3890_v17   ;;  %v3103_v39 = vpack.i.bf16 %v1907_v52, %v1906_v45 }
 0x238   : > { %3104 = vrot.lane.b32.xlu0 %v3103_v39, %s3229_s12 }
 0x2aa   : > { %v3105_v34 = vpop.permute.xlu0 %3104 }
 0x2ab   : > { %v3107_v53 = vunpack.i.h.bf16 %v3105_v34  ;;  %v3106_v2 = vunpack.i.l.bf16 %v3105_v34  ;;  %v5141_v34 = vld [vmem:[#allocation19_spill] sm:$0xff] }
 0x2ad   : > { %v1913_v57 = vsel %vm1912_vm12, %v3106_v2, %v3107_v53  ;;  %v1914_v32 = vsel %vm1912_vm12, %v3107_v53, %v3106_v2 }
 0x2ae   : > { %v1923_v17 = vsel %vm1921_vm2, %v1913_v57, 1.0  ;;  %v1924_v33 = vsel %vm1922_vm3, %v1914_v32, 1.0 }
 0x2af   : > { %v4225_v3 = vmin.f32 %v1906_v45, %v1923_v17  ;;  %v4227_v25 = vmin.f32 %v1907_v52, %v1924_v33  ;;  %v1053_v45 = vpop.permute.xlu2 %1052 }
 0x2b1   : > { %5132 = vst [vmem:[#allocation27_spill] sm:$0xff] %v4225_v3  ;;  %v4231_v41 = vpack.i.bf16 %v4227_v25, %v4225_v3 }
 0x2b2   : > { %5133 = vst [vmem:[#allocation28_spill] sm:$0xff] %v4227_v25 }
 0x2b3   : > { %5134 = vst [vmem:[#allocation29_spill] sm:$0xff] %v4231_v41  ;;  %3109 = vrot.lane.b32.xlu0 %v4231_v41, %s3231_s15  ;;  %s3068_s15 = smul.u32 48, %s5190_s14 }
 0x2b5   : > { %s4272_s19 = scalar_lea.vmem %s5058_s2, %s3068_s15  ;;  %s3237_s15 = smov 112  }
 0x2b6   : > { %v4288_v27 = vld [vmem:[%s4272_s19 + $0x8] sm:$0xff]  ;;  %v4294_v18 = vld [vmem:[%s4272_s19 + $0x10] sm:$0xff]  ;;  %v4303_v19 = vld [vmem:[%s4272_s19 + $0x18] sm:$0xff]  ;;  %2033 = vrot.lane.b32.xlu2 %v3902_v5, %s3237_s15 }
 0x2b7   : > { %v4312_v2 = vld [vmem:[%s4272_s19 + $0x20] sm:$0xff] }
 0x2be   : > { %2056 = vrot.lane.b32.xlu2 %v3902_v5, %s3238_s17 }
 0x325   : > { %v3110_v23 = vpop.permute.xlu0 %3109 }
 0x326   : > { %v3112_v51 = vunpack.i.h.bf16 %v3110_v23  ;;  %v3111_v22 = vunpack.i.l.bf16 %v3110_v23 }
 0x328   : > { %v1932_v30 = vsel %vm1931_vm13, %v3111_v22, %v3112_v51  ;;  %v1933_v24 = vsel %vm1931_vm13, %v3112_v51, %v3111_v22  ;;  %vm1969_vm13 = vcmp.lt.s32.totalorder %v4125_v29, 4 }
 0x329   : > { %v1942_v7 = vsel %vm1940_vm4, %v1933_v24, 1.0  ;;  %v1943_v38 = vsel %vm1941_vm8, %v1932_v30, 1.0  ;;  %v4322_v30 = vpop.permute.xlu2 %1993  ;;  %v894_v24 = vld [vmem:[%s5064_s8 + $0x18] sm:$0xff] }
 0x32a   : > { %v1944_v44 = vmin.f32 %v4225_v3, %v1942_v7  ;;  %v1945_v42 = vmin.f32 %v4227_v25, %v1943_v38  ;;  %v4328_v7 = vld [vmem:[%s4272_s19 + $0x28] sm:$0xff]  ;;  %937 = vmatmul.f32.gmra.mxu2 %v894_v24 }
 0x32c   : > { %v3113_v28 = vpack.i.bf16 %v1945_v42, %v1944_v44 }
 0x32e   : > { %3114 = vrot.lane.b32.xlu0 %v3113_v28, %s3232_s20 }
 0x336   : > { %1974 = vrot.lane.b32.xlu0 %v3987_v8, %s3233_s21 }
 0x33e   : > { %2227 = vperm.xlu0 %3095, %v4153_v37  }
 0x346   : > { %3126 = vset.pattern.permute.xlu0 %v5131_v1 }
 0x347   : > { %1006 = vperm.xlu0 %3126, %v3602_v46  }
 0x3a0   : > { %v3115_v48 = vpop.permute.xlu0 %3114 }
 0x3a1   : > { %v3117_v20 = vunpack.i.h.bf16 %v3115_v48  ;;  %v3116_v62 = vunpack.i.l.bf16 %v3115_v48 }
 0x3a3   : > { %v1951_v16 = vsel %vm1950_vm14, %v3116_v62, %v3117_v20  ;;  %v1952_v10 = vsel %vm1950_vm14, %v3117_v20, %v3116_v62 }
 0x3a4   : > { %v1961_v36 = vsel %vm1959_vm9, %v1951_v16, 1.0  ;;  %v1962_v1 = vsel %vm1960_vm10, %v1952_v10, 1.0  ;;  %v5142_v16 = vld [vmem:[#allocation9_spill] sm:$0xff] }
 0x3a5   : > { %v1963_v13 = vmin.f32 %v1944_v44, %v1961_v36  ;;  %v1964_v46 = vmin.f32 %v1945_v42, %v1962_v1  ;;  %v2222_v42 = vpop.permute.xlu2 %2221  ;;  %v5143_v36 = vld [vmem:[#allocation20_spill] sm:$0xff] }
 0x3a6   : > { %v2223_v48 = vperm.slane %v2222_v42, 0  ;;  %v4356_v42 = vshrl.u32 %v1886_v59, 7 }
 0x3a7   : > { %v3120_v56 = vpack.i.bf16 %v1964_v46, %v1963_v13 }
 0x3a8   : > { %v1975_v0 = vpop.permute.xlu0 %1974 }
 0x3a9   : > { %3121 = vrot.lane.b32.xlu1 %v3120_v56, %s3233_s21  ;;  %v1976_v52 = vsel %vm1969_vm13, %v4179_v55, %v1975_v0  ;;  %v1977_v39 = vsel %vm1969_vm13, %v1975_v0, %v4179_v55 }
 0x3aa   : > { %vm1978_vm14 = vcmp.eq.f32.partialorder %v1977_v39, %v3902_v5  ;;  %vm1979_vm15 = vcmp.eq.f32.partialorder %v1976_v52, %v3987_v8 }
 0x3b0   : > { %v2228_v10 = vpop.permute.xlu0 %2227 }
 0x3b1   : > { %1991 = vrot.lane.b32.xlu1 %v3902_v5, %s3235_s28  ;;  %v2229_v56 = vperm.slane %v2228_v10, 1 }
 0x3b9   : > { %2214 = vperm.xlu1 %3118, %v4153_v37   ;;  %v5136_v37 = vld [vmem:[#allocation13_spill] sm:$0xff] }
 0x3c1   : > { %1060 = vperm.xlu1 %3118, %v3655_v12   ;;  %v2427_v12 = vld [vmem:[%s5060_s4] sm:$0xff] }
 0x3c9   : > { %2010 = vrot.lane.b32.xlu1 %v3902_v5, %s3236_s25 }
 0x3d1   : > { %1117 = vperm.xlu1 %3118, %v3632_v4   ;;  %v2429_v4 = vld [vmem:[%s5060_s4 + $0x10] sm:$0xff] }
 0x3d2   : > { %2474 = vmatpush.msra.mxu3 %v2429_v4 }
 0x3d4   : > { %2475 = vmatpush.msra.mxu3 %v2427_v12  ;;  %v1055_v12 = vsub.f32 %v3927_v15, %v1053_v45 }
 0x3d9   : > { %1212 = vperm.xlu1 %3118, %v3661_v31   ;;  %v4282_v31 = vld [vmem:[%s4272_s19] sm:$0xff] }
 0x3da   : > { %3005 = vmatmul.msk.f32.vlgmr.msra.gmra.mxu3 %vm2441_vm11, %v4282_v31 }
 0x3e1   : > { %1258 = vperm.xlu1 %3118, %v3856_v11   ;;  %v5137_v11 = vld [vmem:[#allocation14_spill] sm:$0xff] }
 0x3e2   : > { %3006 = vmatmul.msk.f32.gmra.mxu3 %vm2441_vm11, %v4288_v27 }
 0x3e9   : > { %1323 = vperm.xlu1 %3118, %v5135_v21   ;;  %v2236_v21 = vperm.slane %v2228_v10, 2  ;;  %v4360_v10 = vadd.s32 8, %v4356_v42 }
 0x3ea   : > { %3007 = vmatmul.msk.f32.gmra.mxu3 %vm2441_vm11, %v4294_v18 }
 0x3f1   : > { %1418 = vperm.xlu1 %3118, %v5136_v37  }
 0x3f2   : > { %3008 = vmatmul.msk.f32.gmra.mxu3 %vm2441_vm11, %v4303_v19 }
 0x3f9   : > { %1472 = vperm.xlu1 %3118, %v5137_v11   ;;  %v1056_v11 = vsub.f32 %v3930_v6, %v1053_v45 }
 0x3fa   : > { %3009 = vmatmul.msk.f32.gmra.mxu3 %vm2441_vm11, %v4312_v2 }
 0x401   : > { %1567 = vperm.xlu1 %3118, %v5138_v49  }
 0x402   : > { %3010 = vmatmul.msk.f32.gmra.mxu3 %vm2441_vm11, %v4328_v7 }
 0x409   : > { %1632 = vperm.xlu1 %3118, %v5139_v61  }
 0x411   : > { %1727 = vperm.xlu1 %3118, %v5140_v50  }
 0x419   : > { %1781 = vperm.xlu1 %3118, %v5141_v34  }
 0x41b   : > { %v3122_v53 = vpop.permute.xlu1 %3121 }
 0x41c   : > { %v3124_v57 = vunpack.i.h.bf16 %v3122_v53  ;;  %v3123_v32 = vunpack.i.l.bf16 %v3122_v53  ;;  %v5145_v53 = vld [vmem:[#allocation6_spill] sm:$0xff] }
 0x41e   : > { %v1970_v17 = vsel %vm1969_vm13, %v3123_v32, %v3124_v57  ;;  %v1971_v33 = vsel %vm1969_vm13, %v3124_v57, %v3123_v32  ;;  %v1057_v57 = vmul.f32 %v1055_v12, %v1055_v12  ;;  %v1058_v32 = vmul.f32 %v1056_v11, %v1056_v11 }
 0x41f   : > { %v1980_v23 = vsel %vm1978_vm14, %v1971_v33, 1.0  ;;  %v1981_v51 = vsel %vm1979_vm15, %v1970_v17, 1.0 }
 0x420   : > { %v4318_v55 = vmin.f32 %v1963_v13, %v1980_v23  ;;  %v4320_v22 = vmin.f32 %v1964_v46, %v1981_v51  ;;  %v5144_v13 = vld [vmem:[#allocation21_spill] sm:$0xff] }
 0x422   : > { %v3128_v38 = vpack.i.bf16 %v4320_v22, %v4318_v55 }
 0x423   : > { %v4332_v44 = vpop.permute.xlu1 %1991 }
 0x424   : > { %3129 = vrot.lane.b32.xlu0 %v3128_v38, %s3235_s28 }
 0x42b   : > { %v2215_v28 = vpop.permute.xlu1 %2214 }
 0x42c   : > { %v2216_v20 = vperm.slane %v2215_v28, 1  ;;  %v2232_v62 = vperm.slane %v2215_v28, 2  ;;  %1163 = vperm.xlu0 %3126, %v5142_v16   ;;  %v5146_v16 = vld [vmem:[#allocation7_spill] sm:$0xff] }
 0x42e   : > { %v2218_v1 = vsub.f32 %v5143_v36, %v2216_v20  ;;  %v2234_v46 = vsub.f32 %v5144_v13, %v2232_v62 }
 0x430   : > { %v2225_v37 = vmul.f32 %v2223_v48, %v2218_v1  ;;  %v2235_v4 = vmul.f32 %v2234_v46, %v2223_v48 }
 0x432   : > { %v2231_v49 = vadd.f32 %v2229_v56, %v2225_v37  ;;  %v2238_v61 = vadd.f32 %v2236_v21, %v2235_v4 }
 0x433   : > { %v1061_v50 = vpop.permute.xlu1 %1060 }
 0x434   : > { %3001 = vst.msk [vmem:[%s4094_s27 + $0x33] ss:$8 sm:$0x3] %vm4086_vm6, %v2231_v49  ;;  %v2340_v0 = vadd.f32 1.0, %v2231_v49  ;;  %v2343_v52 = vadd.f32 1.0, %v2238_v61  ;;  %v1063_v39 = vsub.f32 %v3942_v60, %v1061_v50  ;;  %v1064_v34 = vsub.f32 %v3945_v58, %v1061_v50  ;;  %1315 = vperm.xlu0 %3126, %v5145_v53  }
 0x435   : > { %3002 = vst.msk [vmem:[%s4094_s27 + $0x34] ss:$8 sm:$0x3] %vm4086_vm6, %v2238_v61 }
 0x436   : > { %v2341_v45 = vmul.f32 8.0, %v2340_v0  ;;  %v2344_v17 = vmul.f32 8.0, %v2343_v52  ;;  %v1065_v33 = vmul.f32 %v1063_v39, %v1063_v39  ;;  %v1066_v23 = vmul.f32 %v1064_v34, %v1064_v34 }
 0x438   : > { %v3003_v51 = vadd.f32 -0.5, %v2341_v45  ;;  %v4351_v24 = vadd.f32 %v1065_v33, %v1057_v57  ;;  %v4353_v38 = vadd.f32 %v1066_v23, %v1058_v32  ;;  %v3004_v28 = vadd.f32 -0.5, %v2344_v17  ;;  %v5153_v57 = vld [vmem:[#allocation16_spill] sm:$0xff] }
 0x43a   : > { %v2346_v48 = vfloor.f32 %v3003_v51  ;;  %v2347_v36 = vfloor.f32 %v3004_v28 }
 0x43c   : > { %v2348_v20 = vsub.f32 %v3003_v51, %v2346_v48  ;;  %v3070_v62 = vcvt.f32.s32 %v2346_v48  ;;  %1369 = vperm.xlu0 %3126, %v5146_v16   ;;  %v3072_v61 = vcvt.f32.s32 %v2347_v36  ;;  %v2349_v0 = vsub.f32 %v3004_v28, %v2347_v36 }
 0x43e   : > { %v2355_v1 = vperm.slane %v3070_v62, 0  ;;  %v2361_v13 = vsub.f32 1.0, %v2348_v20  ;;  %v2371_v46 = vadd.s32 1, %v3070_v62  ;;  %v2356_v56 = vperm.slane %v3070_v62, 1 }
 0x43f   : > { %v2379_v12 = vperm.slane %v2348_v20, 0  ;;  %v2380_v17 = vperm.slane %v2348_v20, 1  ;;  %v2391_v23 = vperm.slane %v3072_v61, 0  ;;  %v2397_v16 = vsub.f32 1.0, %v2349_v0 }
 0x440   : > { %vm4363_vm4 = vcmp.eq.s32.totalorder %v4360_v10, %v2355_v1  ;;  %v2363_v59 = vperm.slane %v2361_v13, 0  ;;  %v2372_v37 = vperm.slane %v2371_v46, 0  ;;  %vm4368_vm8 = vcmp.eq.s32.totalorder %v4356_v42, %v2355_v1 }
 0x441   : > { %vm4373_vm9 = vcmp.eq.s32.totalorder %v4360_v10, %v2356_v56  ;;  %v2364_v49 = vperm.slane %v2361_v13, 1  ;;  %v2373_v53 = vperm.slane %v2371_v46, 1  ;;  %vm4388_vm15 = vcmp.eq.s32.totalorder %v4356_v42, %v2356_v56 }
 0x442   : > { %v2369_v50 = vsel %vm4363_vm4, %v2363_v59, 0.0  ;;  %vm2376_vm10 = vcmp.eq.s32.totalorder %v4360_v10, %v2372_v37  ;;  %vm2374_vm13 = vcmp.eq.s32.totalorder %v4356_v42, %v2372_v37  ;;  %v2367_v39 = vsel %vm4368_vm8, %v2363_v59, 0.0 }
 0x443   : > { %v2385_v52 = vsel %vm2376_vm10, %v2379_v12, 0.0  ;;  %v2383_v34 = vsel %vm2374_vm13, %v2379_v12, 0.0  ;;  %v2370_v45 = vsel %vm4373_vm9, %v2364_v49, 0.0  ;;  %vm2377_vm14 = vcmp.eq.s32.totalorder %v4360_v10, %v2373_v53 }
 0x444   : > { %1464 = vperm.xlu0 %3126, %v5153_v57   ;;  %v2389_v32 = vadd.f32 %v2385_v52, %v2369_v50  ;;  %vm2375_vm4 = vcmp.eq.s32.totalorder %v4356_v42, %v2373_v53  ;;  %v2387_v51 = vadd.f32 %v2383_v34, %v2367_v39  ;;  %v2386_v28 = vsel %vm2377_vm14, %v2380_v17, 0.0  ;;  %v5162_v52 = vld [vmem:[#allocation8_spill] sm:$0xff] }
 0x445   : > { %v2368_v48 = vsel %vm4388_vm15, %v2364_v49, 0.0  ;;  %v2384_v62 = vsel %vm2375_vm4, %v2380_v17, 0.0  ;;  %vm4396_vm8 = vcmp.eq.s32.totalorder %v4356_v42, %v2391_v23  ;;  %v2390_v36 = vadd.f32 %v2386_v28, %v2370_v45  ;;  %v2433_v28 = vld [vmem:[%s5061_s5 + $0x10] sm:$0xff] }
 0x446   : > { %2544 = vmatpush.msra.mxu2 %v2389_v32  ;;  %3065 = vmatpush.msrb.mxu3 %v2389_v32  ;;  %v2407_v1 = vadd.s32 1, %v3072_v61  ;;  %v2399_v13 = vperm.slane %v2397_v16, 0  ;;  %vm4405_vm9 = vcmp.eq.s32.totalorder %v4360_v10, %v2391_v23  ;;  %v2392_v56 = vperm.slane %v3072_v61, 1 }
 0x447   : > { %v2388_v21 = vadd.f32 %v2384_v62, %v2368_v48  ;;  %v2415_v37 = vperm.slane %v2349_v0, 0  ;;  %v2400_v4 = vperm.slane %v2397_v16, 1  ;;  %v2416_v34 = vperm.slane %v2349_v0, 1  ;;  %v4454_v62 = vpop.permute.xlu2 %1109 }
 0x448   : > { %2545 = vmatpush.msra.mxu2 %v2387_v51  ;;  %3066 = vmatpush.msrb.mxu3 %v2387_v51  ;;  %v2408_v59 = vperm.slane %v2407_v1, 0  ;;  %v2403_v12 = vsel %vm4396_vm8, %v2399_v13, 0.0  ;;  %v2405_v11 = vsel %vm4405_vm9, %v2399_v13, 0.0  ;;  %vm4414_vm10 = vcmp.eq.s32.totalorder %v4356_v42, %v2392_v56 }
 0x449   : > { %3017 = vmatmul.msk.f32.vlgmr.msra.gmra.mxu2 %vm2441_vm11, %v4282_v31  ;;  %3018 = vmatmul.msk.f32.vlgmr.msrb.gmra.mxu3 %vm2441_vm11, %v4288_v27  ;;  %v2409_v50 = vperm.slane %v2407_v1, 1  ;;  %v2404_v61 = vsel %vm4414_vm10, %v2400_v4, 0.0  ;;  %vm2396_vm4 = vcmp.eq.s32.totalorder %v4360_v10, %v2392_v56  ;;  %vm1988_vm9 = vcmp.lt.s32.totalorder %v4125_v29, 124 }
 0x44a   : > { %2579 = vmatpush.msra.mxu3 %v2390_v36  ;;  %vm2410_vm13 = vcmp.eq.s32.totalorder %v4356_v42, %v2408_v59  ;;  %vm2412_vm14 = vcmp.eq.s32.totalorder %v4360_v10, %v2408_v59  ;;  %v2406_v33 = vsel %vm2396_vm4, %v2400_v4, 0.0  ;;  %v1995_v36 = vsel %vm1988_vm9, %v4332_v44, %v4322_v30 }
 0x44b   : > { %v2419_v39 = vsel %vm2410_vm13, %v2415_v37, 0.0  ;;  %vm2411_vm15 = vcmp.eq.s32.totalorder %v4356_v42, %v2409_v50  ;;  %v2421_v57 = vsel %vm2412_vm14, %v2415_v37, 0.0  ;;  %vm2413_vm8 = vcmp.eq.s32.totalorder %v4360_v10, %v2409_v50  ;;  %v2431_v10 = vld [vmem:[%s5061_s5] sm:$0xff] }
 0x44c   : > { %2580 = vmatpush.msra.mxu3 %v2388_v21  ;;  %1529 = vperm.xlu0 %3126, %v5162_v52   ;;  %v4424_v53 = vadd.f32 %v2419_v39, %v2403_v12  ;;  %v4426_v32 = vadd.f32 %v2421_v57, %v2405_v11  ;;  %v2420_v45 = vsel %vm2411_vm15, %v2416_v34, 0.0  ;;  %v2422_v23 = vsel %vm2413_vm8, %v2416_v34, 0.0 }
 0x44d   : > { %v4430_v17 = vadd.f32 %v2420_v45, %v2404_v61  ;;  %v4434_v51 = vadd.f32 %v2422_v23, %v2406_v33  ;;  %v1996_v1 = vsel %vm1988_vm9, %v4322_v30, %v4332_v44  ;;  %vm1997_vm10 = vcmp.eq.f32.partialorder %v1995_v36, %v3902_v5 }
 0x44e   : > { %vm1998_vm13 = vcmp.eq.f32.partialorder %v1996_v1, %v3987_v8  ;;  %v1071_v23 = vmin.f32 %v4351_v24, 1e+30  ;;  %v5165_v1 = vld [vmem:[#allocation10_spill] sm:$0xff]  ;;  %vm2007_vm14 = vcmp.lt.s32.totalorder %v4125_v29, 16 }
 0x44f   : > { %v4462_v16 = vpop.permute.xlu2 %2012 }
 0x451   : > { %3019 = vmatmul.msk.f32.gmra.mxu3 %vm2441_vm11, %v4294_v18 }
 0x459   : > { %3020 = vmatmul.msk.f32.gmra.mxu3 %vm2441_vm11, %v4303_v19 }
 0x45d   : > { %v2477_v42 = vpop.f32.mrf.mxu3 }
 0x45e   : > { %v2602_v0 = vmul.f32 %v2477_v42, %v2431_v10  ;;  %v1072_v42 = vmin.f32 %v4353_v38, 1e+30 }
 0x461   : > { %3021 = vmatmul.msk.f32.gmra.mxu3 %vm2441_vm11, %v4312_v2 }
 0x465   : > { %v2480_v48 = vpop.f32.mrf.mxu3 }
 0x469   : > { %3022 = vmatmul.msk.f32.gmra.mxu3 %vm2441_vm11, %v4328_v7 }
 0x471   : > { %3023 = vmatmul.msk.f32.vlgmr.msra.gmra.mxu3 %vm2441_vm11, %v4282_v31  ;;  %v2606_v31 = vmul.f32 %v2480_v48, %v2433_v28 }
 0x473   : > { %v4456_v20 = vadd.f32 %v2606_v31, %v2602_v0 }
 0x475   : > { %5163 = vst [vmem:[#allocation11_spill] sm:$0xff] %v4456_v20 }
 0x479   : > { %3024 = vmatmul.msk.f32.gmra.mxu3 %vm2441_vm11, %v4288_v27  ;;  %v2483_v27 = vpop.f32.mrf.mxu3 }
 0x47a   : > { %v2668_v46 = vmul.f32 %v2483_v27, %v2431_v10 }
 0x481   : > { %3025 = vmatmul.msk.f32.gmra.mxu3 %vm2441_vm11, %v4294_v18  ;;  %v4460_v18 = vpop.permute.xlu0 %1006  ;;  %v2486_v21 = vpop.f32.mrf.mxu3 }
 0x482   : > { %v2672_v59 = vmul.f32 %v2486_v21, %v2433_v28  ;;  %v4502_v21 = vpop.permute.xlu1 %2010 }
 0x484   : > { %v4475_v49 = vadd.f32 %v2672_v59, %v2668_v46  ;;  %v5168_v59 = vld [vmem:[#allocation17_spill] sm:$0xff] }
 0x486   : > { %5164 = vst [vmem:[#allocation13_spill] sm:$0xff] %v4475_v49 }
 0x489   : > { %3026 = vmatmul.msk.f32.gmra.mxu3 %vm2441_vm11, %v4303_v19  ;;  %v2489_v57 = vpop.f32.mrf.mxu3 }
 0x48a   : > { %v2735_v36 = vmul.f32 %v2489_v57, %v2431_v10  ;;  %v4507_v38 = vpop.permute.xlu1 %1117 }
 0x48b   : > { %v1120_v49 = vsub.f32 %v3942_v60, %v4507_v38 }
 0x491   : > { %3027 = vmatmul.msk.f32.gmra.mxu3 %vm2441_vm11, %v4312_v2  ;;  %v1156_v2 = vpop.permute.xlu2 %1155 }
 0x492   : > { %v1158_v50 = vsub.f32 %v3927_v15, %v1156_v2  ;;  %v1159_v52 = vsub.f32 %v3930_v6, %v1156_v2 }
 0x494   : > { %v1161_v45 = vmul.f32 %v1159_v52, %v1159_v52 }
 0x496   : > { %v3130_v13 = vpop.permute.xlu0 %3129 }
 0x497   : > { %v3132_v19 = vunpack.i.h.bf16 %v3130_v13  ;;  %v3131_v56 = vunpack.i.l.bf16 %v3130_v13  ;;  %v2492_v13 = vpop.f32.mrf.mxu3 }
 0x498   : > { %v2739_v46 = vmul.f32 %v2492_v13, %v2433_v28  ;;  %v4512_v28 = vpop.f32.mrf.mxu2 }
 0x499   : > { %v1989_v37 = vsel %vm1988_vm9, %v3131_v56, %v3132_v19  ;;  %v1990_v4 = vsel %vm1988_vm9, %v3132_v19, %v3131_v56  ;;  %3028 = vmatmul.msk.f32.gmra.mxu3 %vm2441_vm11, %v4328_v7  ;;  %v5167_v56 = vld [vmem:[#allocation12_spill] sm:$0xff]  ;;  %v1221_v24 = vpop.permute.xlu2 %1220  ;;  %5169 = vst [vmem:[#allocation18_spill] sm:$0xff] %v4512_v28 }
 0x49a   : > { %v1999_v12 = vsel %vm1997_vm10, %v1989_v37, 1.0  ;;  %v2000_v11 = vsel %vm1998_vm13, %v1990_v4, 1.0  ;;  %v4499_v19 = vadd.f32 %v2739_v46, %v2735_v36  ;;  %v4514_v37 = vpop.permute.xlu1 %1212  ;;  %v1017_v46 = vsub.f32 %v3942_v60, %v4300_v63 }
 0x49b   : > { %v4478_v30 = vmin.f32 %v4318_v55, %v1999_v12  ;;  %v4481_v44 = vmin.f32 %v4320_v22, %v2000_v11  ;;  %v1160_v55 = vmul.f32 %v1158_v50, %v1158_v50  ;;  %vm2030_vm10 = vcmp.lt.s32.totalorder %v4125_v29, 112 }
 0x49c   : > { %5166 = vst [vmem:[#allocation14_spill] sm:$0xff] %v4499_v19 }
 0x49d   : > { %v3133_v61 = vpack.i.bf16 %v4481_v44, %v4478_v30 }
 0x49e   : > { %v1164_v39 = vpop.permute.xlu0 %1163 }
 0x49f   : > { %v1166_v7 = vsub.f32 %v3942_v60, %v1164_v39  ;;  %v1167_v34 = vsub.f32 %v3945_v58, %v1164_v39  ;;  %3134 = vrot.lane.b32.xlu0 %v3133_v61, %s3236_s25 }
 0x4a1   : > { %v1168_v33 = vmul.f32 %v1166_v7, %v1166_v7  ;;  %v1169_v22 = vmul.f32 %v1167_v34, %v1167_v34  ;;  %v1267_v10 = vpop.permute.xlu2 %1266 }
 0x4a2   : > { %v4522_v61 = vpop.permute.xlu1 %1258 }
 0x4a3   : > { %v1170_v0 = vadd.f32 %v1168_v33, %v1160_v55  ;;  %v1171_v48 = vadd.f32 %v1169_v22, %v1161_v45 }
 0x4a5   : > { %v4494_v31 = vmin.f32 %v1071_v23, %v1170_v0  ;;  %v4496_v27 = vmin.f32 %v1072_v42, %v1171_v48 }
 0x4a6   : > { %v4532_v0 = vpop.permute.xlu0 %1315 }
 0x4a7   : > { %1624 = vperm.xlu0 %3126, %v5165_v1  }
 0x4a9   : > { %v1362_v4 = vpop.permute.xlu2 %1361 }
 0x4aa   : > { %v4524_v7 = vpop.permute.xlu1 %1323 }
 0x4ae   : > { %v4557_v9 = vpop.permute.xlu0 %1369 }
 0x4af   : > { %1678 = vperm.xlu0 %3126, %v5167_v56  }
 0x4b1   : > { %v1427_v39 = vpop.permute.xlu2 %1426 }
 0x4b2   : > { %v4530_v22 = vpop.permute.xlu1 %1418 }
 0x4b7   : > { %1773 = vperm.xlu0 %3126, %v5168_v59   ;;  %v1018_v59 = vsub.f32 %v3945_v58, %v4300_v63  ;;  %v1364_v63 = vsub.f32 %v3927_v15, %v1362_v4 }
 0x4b9   : > { %v1522_v45 = vpop.permute.xlu2 %1521 }
 0x4ba   : > { %v4536_v13 = vpop.permute.xlu1 %1472 }
 0x4bf   : > { %2035 = vrot.lane.b32.xlu0 %v3987_v8, %s3237_s15 }
 0x4c0   : > { %3193 = vset.pattern.permute.xlu0 %v5126_v14 }
 0x4c1   : > { %v1576_v42 = vpop.permute.xlu2 %1575 }
 0x4c2   : > { %v4578_v20 = vpop.permute.xlu1 %1567 }
 0x4c7   : > { %2058 = vrot.lane.b32.xlu0 %v3987_v8, %s3238_s17 }
 0x4cc   : > { %v2547_v2 = vpop.f32.mrf.mxu2  ;;  %v2550_v12 = vpop.f32.mrf.mxu3 }
 0x4cd   : > { %v2604_v11 = vmul.f32 %v2547_v2, %v4424_v53  ;;  %v2608_v50 = vmul.f32 %v2550_v12, %v4426_v32  ;;  %v1112_v2 = vsub.f32 %v3927_v15, %v4454_v62  ;;  %v1113_v12 = vsub.f32 %v3930_v6, %v4454_v62 }
 0x4ce   : > { %v1365_v62 = vsub.f32 %v3930_v6, %v1362_v4  ;;  %v1010_v4 = vsub.f32 %v3930_v6, %v4460_v18 }
 0x4cf   : > { %v4520_v52 = vadd.f32 %v2608_v50, %v2604_v11  ;;  %v1671_v11 = vpop.permute.xlu2 %1670  ;;  %v1019_v50 = vmul.f32 %v1017_v46, %v1017_v46  ;;  %v1430_v46 = vsub.f32 %v3945_v58, %v1427_v39  ;;  %2079 = vrot.lane.b32.xlu0 %v3902_v5, %s3239_s18 }
 0x4d0   : > { %v1673_v28 = vsub.f32 %v3927_v15, %v1671_v11  ;;  %v4615_v41 = vsub.f32 %v3930_v6, %v1671_v11  ;;  %v1262_v11 = vsub.f32 %v3930_v6, %v4522_v61 }
 0x4d4   : > { %v2553_v14 = vpop.f32.mrf.mxu3 }
 0x4d5   : > { %v2670_v57 = vmul.f32 %v2553_v14, %v4424_v53  ;;  %v1269_v14 = vsub.f32 %v3942_v60, %v1267_v10 }
 0x4d7   : > { %v1736_v35 = vpop.permute.xlu2 %1735 }
 0x4dc   : > { %v2556_v34 = vpop.f32.mrf.mxu3 }
 0x4dd   : > { %v2674_v55 = vmul.f32 %v2556_v34, %v4426_v32  ;;  %v1020_v34 = vmul.f32 %v1018_v59, %v1018_v59  ;;  %v1524_v59 = vsub.f32 %v3927_v15, %v1522_v45 }
 0x4df   : > { %v4528_v33 = vadd.f32 %v2674_v55, %v2670_v57  ;;  %v1114_v57 = vmul.f32 %v1112_v2, %v1112_v2  ;;  %v1270_v55 = vsub.f32 %v3945_v58, %v1267_v10  ;;  %v1009_v10 = vsub.f32 %v3927_v15, %v4460_v18 }
 0x4e0   : > { %v4565_v2 = vmul.f32 %v1269_v14, %v1269_v14  ;;  %v4580_v14 = vmul.f32 %v1365_v62, %v1365_v62  ;;  %v4586_v18 = vmul.f32 %v1430_v46, %v1430_v46  ;;  %v1012_v62 = vmul.f32 %v1010_v4, %v1010_v4 }
 0x4e1   : > { %v4571_v19 = vmul.f32 %v1270_v55, %v1270_v55  ;;  %v4588_v55 = vmul.f32 %v1524_v59, %v1524_v59  ;;  %v2014_v46 = vsel %vm2007_vm14, %v4502_v21, %v4462_v16  ;;  %v1122_v59 = vmul.f32 %v1120_v49, %v1120_v49 }
 0x4e2   : > { %v1022_v40 = vadd.f32 %v1020_v34, %v1012_v62  ;;  %v1739_v34 = vsub.f32 %v3945_v58, %v1736_v35 }
 0x4e4   : > { %v2559_v23 = vpop.f32.mrf.mxu3 }
 0x4e5   : > { %v2737_v36 = vmul.f32 %v2559_v23, %v4424_v53  ;;  %v1223_v53 = vsub.f32 %v3942_v60, %v1221_v24 }
 0x4ec   : > { %v2562_v48 = vpop.f32.mrf.mxu3 }
 0x4ed   : > { %v2741_v1 = vmul.f32 %v2562_v48, %v4426_v32  ;;  %v1224_v32 = vsub.f32 %v3945_v58, %v1221_v24  ;;  %v1115_v48 = vmul.f32 %v1113_v12, %v1113_v12  ;;  %v1525_v12 = vsub.f32 %v3930_v6, %v1522_v45 }
 0x4ee   : > { %v2625_v45 = vrot.slane %v4520_v52, 4 }
 0x4ef   : > { %v4540_v56 = vadd.f32 %v2741_v1, %v2737_v36  ;;  %v4553_v36 = vmul.f32 %v1223_v53, %v1223_v53  ;;  %v1429_v1 = vsub.f32 %v3942_v60, %v1427_v39  ;;  %v4559_v24 = vmul.f32 %v1224_v32, %v1224_v32 }
 0x4f0   : > { %v1578_v53 = vsub.f32 %v3942_v60, %v1576_v42  ;;  %v4573_v32 = vmul.f32 %v1364_v63, %v1364_v63  ;;  %v1579_v39 = vsub.f32 %v3945_v58, %v1576_v42  ;;  %v1011_v63 = vmul.f32 %v1009_v10, %v1009_v10 }
 0x4f1   : > { %v4582_v25 = vmul.f32 %v1429_v1, %v1429_v1  ;;  %v1121_v42 = vsub.f32 %v3945_v58, %v4507_v38  ;;  %v4592_v3 = vmul.f32 %v1525_v12, %v1525_v12  ;;  %v1215_v1 = vsub.f32 %v3927_v15, %v4514_v37 }
 0x4f2   : > { %v4594_v26 = vmul.f32 %v1578_v53, %v1578_v53  ;;  %v4598_v43 = vmul.f32 %v1579_v39, %v1579_v39  ;;  %v1216_v38 = vsub.f32 %v3930_v6, %v4514_v37  ;;  %v2015_v12 = vsel %vm2007_vm14, %v4462_v16, %v4502_v21 }
 0x4f3   : > { %v2626_v53 = vadd.f32 %v2625_v45, %v4520_v52  ;;  %v1021_v49 = vadd.f32 %v1019_v50, %v1011_v63  ;;  %v1123_v47 = vmul.f32 %v1121_v42, %v1121_v42  ;;  %v1738_v37 = vsub.f32 %v3942_v60, %v1736_v35 }
 0x4f4   : > { %v2582_v23 = vpop.f32.mrf.mxu3  ;;  %5170 = vst [vmem:[#allocation5_spill] sm:$0xff] %v4594_v26  ;;  %v4618_v26 = vpop.permute.xlu0 %1464  ;;  %v2016_v21 = vsub.f32 %v2015_v12, %v3902_v5  ;;  %v2017_v52 = vsub.f32 %v2014_v46, %v3987_v8  ;;  %v1218_v45 = vmul.f32 %v1216_v38, %v1216_v38  ;;  %v4626_v42 = vmul.f32 %v1673_v28, %v1673_v28 }
 0x4f5   : > { %5171 = vst [vmem:[#allocation15_spill] sm:$0xff] %v4598_v43  ;;  %v2605_v4 = vmul.f32 %v2582_v23, %v4430_v17  ;;  %v1217_v43 = vmul.f32 %v1215_v1, %v1215_v1  ;;  %v1124_v23 = vadd.f32 %v1122_v59, %v1114_v57  ;;  %v2627_v50 = vrot.slane %v2626_v53, 2 }
 0x4f6   : > { %v1025_v62 = vmin.f32 %v1021_v49, 1e+30  ;;  %v1125_v1 = vadd.f32 %v1123_v47, %v1115_v48  ;;  %v4631_v12 = vmul.f32 %v1738_v37, %v1738_v37  ;;  %v1026_v57 = vmin.f32 %v1022_v40, 1e+30 }
 0x4f7   : > { %v4634_v46 = vadd.f32 %v4553_v36, %v1217_v43  ;;  %v4636_v38 = vand.u32 2147483647, %v2016_v21  ;;  %v4643_v28 = vadd.f32 %v4559_v24, %v1218_v45  ;;  %v1264_v48 = vmul.f32 %v1262_v11, %v1262_v11 }
 0x4f8   : > { %v2628_v49 = vadd.f32 %v2627_v50, %v2626_v53  ;;  %v4645_v8 = vmin.f32 %v1026_v57, %v1125_v1  ;;  %v1326_v40 = vsub.f32 %v3942_v60, %v4524_v7  ;;  %v1421_v43 = vsub.f32 %v3927_v15, %v4530_v22 }
 0x4f9   : > { %v1422_v36 = vsub.f32 %v3930_v6, %v4530_v22  ;;  %v1327_v53 = vsub.f32 %v3945_v58, %v4524_v7  ;;  %v1319_v45 = vsub.f32 %v3930_v6, %v4532_v0  ;;  %v2691_v22 = vrot.slane %v4528_v33, 4 }
 0x4fa   : > { %v4670_v11 = vadd.f32 %v4571_v19, %v1264_v48  ;;  %v2629_v7 = vrot.slane %v2628_v49, 1  ;;  %vm2020_vm15 = vcmp.eq.f32.partialorder %v4636_v38, 1.0  ;;  %v1570_v19 = vsub.f32 %v3927_v15, %v4578_v20 }
 0x4fb   : > { %v1329_v1 = vmul.f32 %v1327_v53, %v1327_v53 }
 0x4fc   : > { %v2585_v10 = vpop.f32.mrf.mxu3  ;;  %v1530_v50 = vpop.permute.xlu0 %1529 }
 0x4fd   : > { %v2609_v39 = vmul.f32 %v2585_v10, %v4434_v51  ;;  %v1261_v10 = vsub.f32 %v3927_v15, %v4522_v61  ;;  %v4638_v61 = vand.u32 2147483647, %v2017_v52  ;;  %v1232_v52 = vmin.f32 %v4645_v8, %v4643_v28 }
 0x4fe   : > { %v1328_v8 = vmul.f32 %v1326_v40, %v1326_v40  ;;  %v1321_v28 = vmul.f32 %v1319_v45, %v1319_v45 }
 0x4ff   : > { %v2631_v16 = vadd.f32 %v2609_v39, %v2605_v4  ;;  %v4629_v4 = vpop.permute.xlu1 %1632  ;;  %v4640_v39 = vmin.f32 %v1025_v62, %v1124_v23  ;;  %v1263_v47 = vmul.f32 %v1261_v10, %v1261_v10  ;;  %v1318_v23 = vsub.f32 %v3927_v15, %v4532_v0 }
 0x500   : > { %vm2021_vm4 = vcmp.eq.f32.partialorder %v4638_v61, 1.0  ;;  %v1424_v62 = vmul.f32 %v1422_v36, %v1422_v36  ;;  %v1475_v0 = vsub.f32 %v3942_v60, %v4536_v13 }
 0x501   : > { %v2632_v63 = vrot.slane %v2631_v16, 4  ;;  %v1231_v24 = vmin.f32 %v4640_v39, %v4634_v46  ;;  %v4667_v10 = vadd.f32 %v4565_v2, %v1263_v47  ;;  %v1476_v2 = vsub.f32 %v3945_v58, %v4536_v13 }
 0x502   : > { %v1571_v46 = vsub.f32 %v3930_v6, %v4578_v20  ;;  %v1320_v39 = vmul.f32 %v1318_v23, %v1318_v23  ;;  %v2692_v47 = vadd.f32 %v2691_v22, %v4528_v33  ;;  %v4689_v53 = vadd.f32 %v4586_v18, %v1424_v62 }
 0x503   : > { %v2633_v59 = vadd.f32 %v2632_v63, %v2631_v16  ;;  %v4653_v16 = vmul.f32 %v1739_v34, %v1739_v34  ;;  %v1423_v34 = vmul.f32 %v1421_v43, %v1421_v43  ;;  %v4691_v20 = vmul.f32 %v1475_v0, %v1475_v0 }
 0x504   : > { %v2588_v35 = vpop.f32.mrf.mxu3  ;;  %v1635_v33 = vsub.f32 %v3942_v60, %v4629_v4  ;;  %v4698_v45 = vmul.f32 %v1476_v2, %v1476_v2  ;;  %v1330_v22 = vadd.f32 %v1328_v8, %v1320_v39  ;;  %v4705_v18 = vmul.f32 %v1571_v46, %v1571_v46 }
 0x505   : > { %v2634_v37 = vrot.slane %v2633_v59, 2  ;;  %v2671_v43 = vmul.f32 %v2588_v35, %v4430_v17  ;;  %v4686_v36 = vadd.f32 %v4582_v25, %v1423_v34  ;;  %v4700_v25 = vmul.f32 %v1570_v19, %v1570_v19 }
 0x506   : > { %v1331_v34 = vadd.f32 %v1329_v1, %v1321_v28  ;;  %v1532_v2 = vsub.f32 %v3942_v60, %v1530_v50  ;;  %v1533_v19 = vsub.f32 %v3945_v58, %v1530_v50 }
 0x507   : > { %v2635_v21 = vadd.f32 %v2634_v37, %v2633_v59  ;;  %v1728_v59 = vpop.permute.xlu1 %1727  ;;  %v2630_v37 = vadd.f32 %v2629_v7, %v2628_v49  ;;  %v2693_v7 = vrot.slane %v2692_v47, 2 }
 0x508   : > { %v1730_v49 = vsub.f32 %v3927_v15, %v1728_v59 }
 0x509   : > { %v2636_v63 = vrot.slane %v2635_v21, 1 }
 0x50a   : > { %v1732_v39 = vmul.f32 %v1730_v49, %v1730_v49  ;;  %v1534_v49 = vmul.f32 %v1532_v2, %v1532_v2 }
 0x50b   : > { %v2637_v57 = vadd.f32 %v2636_v63, %v2635_v21  ;;  %v1731_v21 = vsub.f32 %v3930_v6, %v1728_v59  ;;  %v1636_v63 = vsub.f32 %v3945_v58, %v4629_v4  ;;  %v1637_v59 = vmul.f32 %v1635_v33, %v1635_v33 }
 0x50c   : > { %v2591_v48 = vpop.f32.mrf.mxu3 }
 0x50d   : > { %v2640_v40 = vrot.slane %v2637_v57, 7  ;;  %v2675_v13 = vmul.f32 %v2591_v48, %v4434_v51  ;;  %v1733_v48 = vmul.f32 %v1731_v21, %v1731_v21  ;;  %v1535_v21 = vmul.f32 %v1533_v19, %v1533_v19 }
 0x50e   : > { %v1536_v19 = vadd.f32 %v1534_v49, %v4588_v55 }
 0x50f   : > { %v2641_v35 = vsel %vm2242_vm5, %v2630_v37, %v2640_v40  ;;  %v2697_v23 = vadd.f32 %v2675_v13, %v2671_v43  ;;  %v1334_v37 = vmin.f32 %v1231_v24, %v1330_v22  ;;  %v2694_v40 = vadd.f32 %v2693_v7, %v2692_v47 }
 0x510   : > { %2643 = vst.msk [vmem:[%s4094_s27] ss:$8 sm:$0x3] %vm4086_vm6, %v2641_v35  ;;  %v1335_v43 = vmin.f32 %v1232_v52, %v1331_v34  ;;  %v1372_v52 = vsub.f32 %v3942_v60, %v4557_v9  ;;  %v1743_v7 = vadd.f32 %v4653_v16, %v1733_v48  ;;  %v1373_v34 = vsub.f32 %v3945_v58, %v4557_v9 }
 0x511   : > { %3029 = vst.msk [vmem:[%s4094_s27 + $0x15] ss:$8 sm:$0x3] %vm4086_vm6, %v2641_v35  ;;  %v2698_v62 = vrot.slane %v2697_v23, 4  ;;  %v3135_v0 = vpop.permute.xlu0 %3134  ;;  %v1638_v35 = vmul.f32 %v1636_v63, %v1636_v63  ;;  %v2758_v63 = vrot.slane %v4540_v56, 4 }
 0x512   : > { %v3137_v8 = vunpack.i.h.bf16 %v3135_v0  ;;  %v3136_v57 = vunpack.i.l.bf16 %v3135_v0  ;;  %v1437_v0 = vmin.f32 %v1334_v37, %v4686_v36  ;;  %v1467_v36 = vsub.f32 %v3927_v15, %v4618_v26 }
 0x513   : > { %v2699_v46 = vadd.f32 %v2698_v62, %v2697_v23  ;;  %v1742_v23 = vadd.f32 %v4631_v12, %v1732_v39  ;;  %v2695_v62 = vrot.slane %v2694_v40, 1  ;;  %v1375_v48 = vmul.f32 %v1373_v34, %v1373_v34  ;;  %v1782_v34 = vpop.permute.xlu1 %1781 }
 0x514   : > { %v2008_v4 = vsel %vm2007_vm14, %v3136_v57, %v3137_v8  ;;  %v2009_v1 = vsel %vm2007_vm14, %v3137_v8, %v3136_v57  ;;  %v2594_v28 = vpop.f32.mrf.mxu3  ;;  %v1537_v8 = vadd.f32 %v1535_v21, %v4592_v3  ;;  %v1374_v57 = vmul.f32 %v1372_v52, %v1372_v52 }
 0x515   : > { %v2700_v13 = vrot.slane %v2699_v46, 2  ;;  %v2022_v50 = vsel %vm2020_vm15, %v2009_v1, 1.0  ;;  %v2023_v33 = vsel %vm2021_vm4, %v2008_v4, 1.0  ;;  %v2759_v3 = vadd.f32 %v2758_v63, %v4540_v56 }
 0x516   : > { %v4723_v24 = vmin.f32 %v4478_v30, %v2022_v50  ;;  %v4726_v47 = vmin.f32 %v4481_v44, %v2023_v33  ;;  %v1438_v44 = vmin.f32 %v1335_v43, %v4689_v53  ;;  %v1468_v53 = vsub.f32 %v3930_v6, %v4618_v26 }
 0x517   : > { %v2701_v22 = vadd.f32 %v2700_v13, %v2699_v46  ;;  %v2696_v46 = vadd.f32 %v2695_v62, %v2694_v40  ;;  %v2738_v43 = vmul.f32 %v2594_v28, %v4430_v17  ;;  %v1540_v50 = vmin.f32 %v1437_v0, %v1536_v19 }
 0x518   : > { %v3138_v30 = vpack.i.bf16 %v4726_v47, %v4723_v24  ;;  %v1541_v33 = vmin.f32 %v1438_v44, %v1537_v8  ;;  %v1469_v26 = vmul.f32 %v1467_v36, %v1467_v36  ;;  %v1470_v52 = vmul.f32 %v1468_v53, %v1468_v53 }
 0x519   : > { %v2702_v12 = vrot.slane %v2701_v22, 1  ;;  %v1625_v2 = vpop.permute.xlu0 %1624  ;;  %v1376_v62 = vadd.f32 %v1374_v57, %v4573_v32  ;;  %v1377_v56 = vadd.f32 %v1375_v48, %v4580_v14  ;;  %v1277_v28 = vmin.f32 %v4494_v31, %v4667_v10 }
 0x51a   : > { %v1627_v16 = vsub.f32 %v3927_v15, %v1625_v2  ;;  %v1628_v9 = vsub.f32 %v3930_v6, %v1625_v2  ;;  %3139 = vrot.lane.b32.xlu1 %v3138_v30, %s3237_s15  ;;  %v1479_v2 = vadd.f32 %v4691_v20, %v1469_v26  ;;  %v1480_v31 = vadd.f32 %v4698_v45, %v1470_v52  ;;  %v5172_v20 = vld [vmem:[#allocation5_spill] sm:$0xff] }
 0x51b   : > { %v2703_v39 = vadd.f32 %v2702_v12, %v2701_v22  ;;  %v1784_v12 = vsub.f32 %v3942_v60, %v1782_v34  ;;  %v1582_v57 = vadd.f32 %v5172_v20, %v4700_v25  ;;  %v1785_v53 = vsub.f32 %v3945_v58, %v1782_v34 }
 0x51c   : > { %v1629_v37 = vmul.f32 %v1627_v16, %v1627_v16  ;;  %v1630_v55 = vmul.f32 %v1628_v9, %v1628_v9  ;;  %v2597_v4 = vpop.f32.mrf.mxu3 }
 0x51d   : > { %v2706_v1 = vrot.slane %v2703_v39, 7  ;;  %v2742_v13 = vmul.f32 %v2597_v4, %v4434_v51  ;;  %v1786_v4 = vmul.f32 %v1784_v12, %v1784_v12  ;;  %v1787_v26 = vmul.f32 %v1785_v53, %v1785_v53 }
 0x51e   : > { %v1639_v49 = vadd.f32 %v1637_v59, %v1629_v37  ;;  %v1640_v21 = vadd.f32 %v1638_v35, %v1630_v55  ;;  %v1278_v59 = vmin.f32 %v4496_v27, %v4670_v11  ;;  %v2760_v35 = vrot.slane %v2759_v3, 2  ;;  %v5173_v37 = vld [vmem:[#allocation15_spill] sm:$0xff] }
 0x51f   : > { %v2707_v40 = vsel %vm2242_vm5, %v2696_v46, %v2706_v1  ;;  %v2764_v22 = vadd.f32 %v2742_v13, %v2738_v43  ;;  %v1380_v27 = vmin.f32 %v1277_v28, %v1376_v62  ;;  %v1583_v55 = vadd.f32 %v5173_v37, %v4705_v18 }
 0x520   : > { %3032 = vst.msk [vmem:[%s4094_s27 + $0x1] ss:$8 sm:$0x3] %vm4086_vm6, %v2707_v40  ;;  %v1643_v17 = vmin.f32 %v1540_v50, %v1639_v49  ;;  %v1644_v51 = vmin.f32 %v1541_v33, %v1640_v21  ;;  %v1381_v11 = vmin.f32 %v1278_v59, %v1377_v56 }
 0x521   : > { %3033 = vst.msk [vmem:[%s4094_s27 + $0x16] ss:$8 sm:$0x3] %vm4086_vm6, %v2707_v40  ;;  %v2765_v30 = vrot.slane %v2764_v22, 4  ;;  %v1679_v0 = vpop.permute.xlu0 %1678  ;;  %v1483_v39 = vmin.f32 %v1380_v27, %v1479_v2 }
 0x522   : > { %v1746_v32 = vmin.f32 %v1643_v17, %v1742_v23  ;;  %v1747_v44 = vmin.f32 %v1644_v51, %v1743_v7  ;;  %v1681_v14 = vsub.f32 %v3942_v60, %v1679_v0  ;;  %v1682_v63 = vsub.f32 %v3945_v58, %v1679_v0 }
 0x523   : > { %v2766_v10 = vadd.f32 %v2765_v30, %v2764_v22  ;;  %v2761_v7 = vadd.f32 %v2760_v35, %v2759_v3  ;;  %v1676_v60 = vmul.f32 %v4615_v41, %v4615_v41  ;;  %v1484_v48 = vmin.f32 %v1381_v11, %v1480_v31 }
 0x524   : > { %v1818_v19 = vrot.slane %v1746_v32, 4  ;;  %v1824_v23 = vrot.slane %v1747_v44, 4  ;;  %v1683_v16 = vmul.f32 %v1681_v14, %v1681_v14  ;;  %v1684_v9 = vmul.f32 %v1682_v63, %v1682_v63 }
 0x525   : > { %v2767_v8 = vrot.slane %v2766_v10, 2  ;;  %v2762_v43 = vrot.slane %v2761_v7, 1  ;;  %v1586_v40 = vmin.f32 %v1483_v39, %v1582_v57  ;;  %v1587_v18 = vmin.f32 %v1484_v48, %v1583_v55 }
 0x526   : > { %v1819_v45 = vmin.f32 %v1746_v32, %v1818_v19  ;;  %v1825_v36 = vmin.f32 %v1747_v44, %v1824_v23  ;;  %v1685_v41 = vadd.f32 %v1683_v16, %v4626_v42  ;;  %v1686_v50 = vadd.f32 %v1684_v9, %v1676_v60 }
 0x527   : > { %v2768_v46 = vadd.f32 %v2767_v8, %v2766_v10  ;;  %v2763_v17 = vadd.f32 %v2762_v43, %v2761_v7 }
 0x528   : > { %v1820_v3 = vrot.slane %v1819_v45, 2  ;;  %v1826_v1 = vrot.slane %v1825_v36, 2  ;;  %v1689_v51 = vmin.f32 %v1586_v40, %v1685_v41  ;;  %v1690_v28 = vmin.f32 %v1587_v18, %v1686_v50  ;;  %v5175_v18 = vld [vmem:[#allocation22_spill] sm:$0xff] }
 0x529   : > { %v2769_v13 = vrot.slane %v2768_v46, 1  ;;  %v1774_v33 = vpop.permute.xlu0 %1773 }
 0x52a   : > { %v1776_v25 = vsub.f32 %v3927_v15, %v1774_v33  ;;  %v1777_v49 = vsub.f32 %v3930_v6, %v1774_v33  ;;  %v1821_v58 = vmin.f32 %v1819_v45, %v1820_v3  ;;  %v1827_v21 = vmin.f32 %v1825_v36, %v1826_v1 }
 0x52b   : > { %v2770_v52 = vadd.f32 %v2769_v13, %v2768_v46 }
 0x52c   : > { %v1778_v22 = vmul.f32 %v1776_v25, %v1776_v25  ;;  %v1779_v34 = vmul.f32 %v1777_v49, %v1777_v49  ;;  %v1822_v62 = vrot.slane %v1821_v58, 1  ;;  %v1828_v56 = vrot.slane %v1827_v21, 1 }
 0x52d   : > { %v2773_v42 = vrot.slane %v2770_v52, 7 }
 0x52e   : > { %v1788_v59 = vadd.f32 %v1786_v4, %v1778_v22  ;;  %v1789_v15 = vadd.f32 %v1787_v26, %v1779_v34  ;;  %v1823_v35 = vmin.f32 %v1821_v58, %v1822_v62  ;;  %v1829_v6 = vmin.f32 %v1827_v21, %v1828_v56  ;;  %v2034_v21 = vpop.permute.xlu2 %2033 }
 0x52f   : > { %v2774_v30 = vsel %vm2242_vm5, %v2763_v17, %v2773_v42  ;;  %v5174_v4 = vmov 0.0  }
 0x530   : > { %3036 = vst.msk [vmem:[%s4094_s27 + $0x2] ss:$8 sm:$0x3] %vm4086_vm6, %v2774_v30  ;;  %v1792_v0 = vmin.f32 %v1689_v51, %v1788_v59  ;;  %v1793_v32 = vmin.f32 %v1690_v28, %v1789_v15  ;;  %v1855_v44 = vmul.f32 -20.0, %v1829_v6  ;;  %v1854_v14 = vmul.f32 -20.0, %v1823_v35 }
 0x531   : > { %3037 = vst.msk [vmem:[%s4094_s27 + $0x17] ss:$8 sm:$0x3] %vm4086_vm6, %v2774_v30  ;;  %v2036_v58 = vpop.permute.xlu0 %2035 }
 0x532   : > { %v1830_v63 = vrot.slane %v1792_v0, 4  ;;  %v1836_v12 = vrot.slane %v1793_v32, 4  ;;  %v1858_v2 = vmul.f32 1.442695, %v1855_v44  ;;  %v1856_v31 = vmul.f32 1.442695, %v1854_v14 }
 0x533   : > { %v2037_v26 = vsel %vm2030_vm10, %v2034_v21, %v2036_v58  ;;  %v2038_v52 = vsel %vm2030_vm10, %v2036_v58, %v2034_v21  ;;  %v5179_v21 = vld [vmem:[#allocation18_spill] sm:$0xff] }
 0x534   : > { %v1831_v10 = vmin.f32 %v1792_v0, %v1830_v63  ;;  %v1837_v27 = vmin.f32 %v1793_v32, %v1836_v12  ;;  %3204 = vpow2.f32 %v1858_v2  ;;  %v2039_v40 = vsub.f32 %v2037_v26, %v3902_v5  ;;  %v2428_v32 = vld [vmem:[%s5060_s4 + $0x8] sm:$0xff]  ;;  %v3213_v63 = vld [vmem:[%s4272_s19] sm:$0xff] }
 0x535   : > { %3206 = vpow2.f32 %v1856_v31  ;;  %v2040_v22 = vsub.f32 %v2038_v52, %v5175_v18  ;;  %v3214_v2 = vld [vmem:[%s4272_s19 + $0x8] sm:$0xff] }
 0x536   : > { %v1832_v11 = vrot.slane %v1831_v10, 2  ;;  %v1838_v19 = vrot.slane %v1837_v27, 2  ;;  %v4819_v34 = vand.u32 2147483647, %v2039_v40  ;;  %v2057_v14 = vpop.permute.xlu2 %2056  ;;  %v5180_v40 = vld [vmem:[#allocation3_spill] sm:$0xff] }
 0x537   : > { %v4821_v62 = vand.u32 2147483647, %v2040_v22 }
 0x538   : > { %v1833_v23 = vmin.f32 %v1831_v10, %v1832_v11  ;;  %v1839_v7 = vmin.f32 %v1837_v27, %v1838_v19  ;;  %vm2043_vm13 = vcmp.eq.f32.partialorder %v4819_v34, 1.0  ;;  %v5184_v27 = vld [vmem:[#allocation27_spill] sm:$0xff]  ;;  %v5185_v19 = vld [vmem:[#allocation28_spill] sm:$0xff] }
 0x53a   : > { %v3205_v8 = vpop.eup %3204  ;;  %v1834_v16 = vrot.slane %v1833_v23, 1  ;;  %v1840_v9 = vrot.slane %v1839_v7, 1 }
 0x53b   : > { %v2278_v60 = vrot.slane %v3205_v8, 7  ;;  %v3207_v20 = vpop.eup %3206 }
 0x53c   : > { %v1835_v57 = vmin.f32 %v1833_v23, %v1834_v16  ;;  %v1841_v45 = vmin.f32 %v1839_v7, %v1840_v9  ;;  %v3215_v9 = vld [vmem:[%s4272_s19 + $0x10] sm:$0xff] }
 0x53d   : > { %v2279_v36 = vsel %vm2242_vm5, %v3207_v20, %v2278_v60  ;;  %v5178_v60 = vld [vmem:[#allocation29_spill] sm:$0xff]  ;;  %v3216_v20 = vld [vmem:[%s4272_s19 + $0x18] sm:$0xff] }
 0x53e   : > { %v1860_v53 = vmul.f32 -20.0, %v1835_v57  ;;  %v1861_v39 = vmul.f32 -20.0, %v1841_v45  ;;  %v1874_v48 = vmin.f32 %v1823_v35, %v1835_v57  ;;  %v1875_v46 = vmin.f32 %v1829_v6, %v1841_v45  ;;  %2990 = vst.msk [vmem:[%s4094_s27 + $0x20] ss:$8 sm:$0x3] %vm4086_vm6, %v2279_v36  ;;  %v893_v35 = vld [vmem:[%s5064_s8 + $0x10] sm:$0xff] }
 0x53f   : > { %2996 = vst.msk [vmem:[%s4094_s27 + $0x26] ss:$8 sm:$0x3] %vm4086_vm6, %v2279_v36  ;;  %v2430_v6 = vld [vmem:[%s5060_s4 + $0x18] sm:$0xff]  ;;  %914 = vmatmul.f32.gmra.mxu1 %v893_v35  ;;  %v3217_v57 = vld [vmem:[%s4272_s19 + $0x20] sm:$0xff]  ;;  %v3218_v45 = vld [vmem:[%s4272_s19 + $0x28] sm:$0xff]  ;;  %v2059_v36 = vpop.permute.xlu0 %2058 }
 0x540   : > { %v1864_v37 = vmul.f32 1.442695, %v1861_v39  ;;  %vm1876_vm8 = vcmp.gt.f32.partialorder %v1874_v48, 0.03465736  ;;  %v1862_v55 = vmul.f32 1.442695, %v1860_v53  ;;  %2509 = vmatpush.msra.mxu1 %v2430_v6 }
 0x541   : > { %vm1877_vm9 = vcmp.gt.f32.partialorder %v1875_v46, 0.03465736  ;;  %v2984_v3 = vsel %vm1876_vm8, 1.0, %v5174_v4  ;;  %vm2044_vm8 = vcmp.eq.f32.partialorder %v4821_v62, 1.0 }
 0x542   : > { %v2985_v1 = vsel %vm1877_vm9, 1.0, %v5174_v4  ;;  %3208 = vpow2.f32 %v1864_v37  ;;  %2510 = vmatpush.msra.mxu1 %v2428_v32 }
 0x543   : > { %v2294_v43 = vrot.slane %v2985_v1, 7  ;;  %v3148_v13 = vpack.i.bf16 %v2985_v1, %v2984_v3  ;;  %3210 = vpow2.f32 %v1862_v55 }
 0x545   : > { %3149 = vrot.lane.b32.xlu2 %v3148_v13, %s3228_s24  ;;  %v2295_v41 = vsel %vm2242_vm5, %v2984_v3, %v2294_v43 }
 0x546   : > { %2992 = vst.msk [vmem:[%s4094_s27 + $0x22] ss:$8 sm:$0x3] %vm4086_vm6, %v2295_v41 }
 0x547   : > { %2998 = vst.msk [vmem:[%s4094_s27 + $0x30] ss:$8 sm:$0x3] %vm4086_vm6, %v2295_v41  ;;  %3011 = vmatmul.msk.f32.vlgmr.msra.gmra.mxu1 %vm2441_vm11, %v3213_v63  ;;  %v2080_v52 = vpop.permute.xlu0 %2079 }
 0x548   : > { %v3209_v50 = vpop.eup %3208 }
 0x549   : > { %v2286_v33 = vrot.slane %v3209_v50, 7  ;;  %v3211_v25 = vpop.eup %3210 }
 0x54b   : > { %v2287_v49 = vsel %vm2242_vm5, %v3211_v25, %v2286_v33 }
 0x54c   : > { %2991 = vst.msk [vmem:[%s4094_s27 + $0x21] ss:$8 sm:$0x3] %vm4086_vm6, %v2287_v49 }
 0x54d   : > { %2997 = vst.msk [vmem:[%s4094_s27 + $0x27] ss:$8 sm:$0x3] %vm4086_vm6, %v2287_v49 }
 0x54f   : > { %3012 = vmatmul.msk.f32.gmra.mxu1 %vm2441_vm11, %v3214_v2 }
 0x557   : > { %3013 = vmatmul.msk.f32.gmra.mxu1 %vm2441_vm11, %v3215_v9 }
 0x55f   : > { %3014 = vmatmul.msk.f32.gmra.mxu1 %vm2441_vm11, %v3216_v20 }
 0x567   : > { %3015 = vmatmul.msk.f32.gmra.mxu1 %vm2441_vm11, %v3217_v57 }
 0x56f   : > { %3016 = vmatmul.msk.f32.gmra.mxu1 %vm2441_vm11, %v3218_v45  ;;  %vm954_vm11 = vcmask 15368  }
 0x58c   : > { %v3140_v56 = vpop.permute.xlu1 %3139 }
 0x58d   : > { %v3142_v17 = vunpack.i.h.bf16 %v3140_v56  ;;  %v3141_v42 = vunpack.i.l.bf16 %v3140_v56  ;;  %v5181_v56 = vld [vmem:[#allocation4_spill] sm:$0xff] }
 0x58f   : > { %v2031_v51 = vsel %vm2030_vm10, %v3141_v42, %v3142_v17  ;;  %v2032_v28 = vsel %vm2030_vm10, %v3142_v17, %v3141_v42 }
 0x590   : > { %v2045_v59 = vsel %vm2043_vm13, %v2031_v51, 1.0  ;;  %v2046_v15 = vsel %vm2044_vm8, %v2032_v28, 1.0 }
 0x591   : > { %v2047_v30 = vmin.f32 %v4723_v24, %v2045_v59  ;;  %v2048_v0 = vmin.f32 %v4726_v47, %v2046_v15 }
 0x593   : > { %v3143_v44 = vpack.i.bf16 %v2048_v0, %v2047_v30 }
 0x595   : > { %3144 = vrot.lane.b32.xlu1 %v3143_v44, %s3238_s17 }
 0x59d   : > { %2081 = vrot.lane.b32.xlu1 %v5175_v18, %s3239_s18 }
 0x59f   : > { %v3150_v24 = vpop.permute.xlu2 %3149 }
 0x5a0   : > { %v3152_v47 = vunpack.i.h.bf16 %v3150_v24  ;;  %v3151_v12 = vunpack.i.l.bf16 %v3150_v24 }
 0x5a2   : > { %v2158_v31 = vsel %vm1888_vm7, %v3151_v12, %v3152_v47  ;;  %v2159_v10 = vsel %vm1888_vm7, %v3152_v47, %v3151_v12  ;;  %vm2053_vm7 = vcmp.lt.s32.totalorder %v4125_v29, 32 }
 0x5a3   : > { %v2160_v11 = vsel %vm1902_vm0, %v2159_v10, 1.0  ;;  %v2161_v23 = vsel %vm1903_vm1, %v2158_v31, 1.0  ;;  %v2060_v53 = vsel %vm2053_vm7, %v2057_v14, %v2059_v36  ;;  %v2061_v39 = vsel %vm2053_vm7, %v2059_v36, %v2057_v14 }
 0x5a4   : > { %v2162_v7 = vmin.f32 %v2984_v3, %v2160_v11  ;;  %v2163_v8 = vmin.f32 %v2985_v1, %v2161_v23  ;;  %v2062_v48 = vsub.f32 %v2061_v39, %v3902_v5  ;;  %v2063_v46 = vsub.f32 %v2060_v53, %v5175_v18 }
 0x5a5   : > { %2102 = vrot.lane.b32.xlu1 %v3902_v5, %s3240_s26 }
 0x5a6   : > { %v3158_v16 = vpack.i.bf16 %v2163_v8, %v2162_v7  ;;  %v2064_v37 = vand.u32 2147483647, %v2062_v48  ;;  %v2065_v55 = vand.u32 2147483647, %v2063_v46 }
 0x5a8   : > { %3159 = vrot.lane.b32.xlu0 %v3158_v16, %s3229_s12  ;;  %vm2066_vm0 = vcmp.eq.f32.partialorder %v2064_v37, 2.0  ;;  %vm2067_vm1 = vcmp.eq.f32.partialorder %v2065_v55, 2.0 }
 0x5b0   : > { %3164 = vrot.lane.b32.xlu0 %v5178_v60, %s3236_s25 }
 0x5bc   : > { %v915_v58 = vpop.f32.mrf.mxu1 }
 0x5bd   : > { %v939_v26 = vadd.f32 %v5179_v21, %v915_v58 }
 0x5bf   : > { %v951_v22 = vmul.f32 %v5180_v40, %v939_v26 }
 0x5c1   : > { %v953_v17 = vadd.f32 %v5181_v56, %v951_v22 }
 0x5c3   : > { %955 = vst.msk [vmem:[%s4186_s16] sm:$0xff] %vm954_vm11, %v953_v17 }
 0x607   : > { %v3145_v4 = vpop.permute.xlu1 %3144 }
 0x608   : > { %v3147_v3 = vunpack.i.h.bf16 %v3145_v4  ;;  %v3146_v1 = vunpack.i.l.bf16 %v3145_v4 }
 0x60a   : > { %v2054_v43 = vsel %vm2053_vm7, %v3146_v1, %v3147_v3  ;;  %v2055_v13 = vsel %vm2053_vm7, %v3147_v3, %v3146_v1 }
 0x60b   : > { %v2068_v41 = vsel %vm2066_vm0, %v2055_v13, 1.0  ;;  %v2069_v50 = vsel %vm2067_vm1, %v2054_v43, 1.0 }
 0x60c   : > { %v2070_v33 = vmin.f32 %v2047_v30, %v2068_v41  ;;  %v2071_v25 = vmin.f32 %v2048_v0, %v2069_v50 }
 0x60e   : > { %v3153_v49 = vpack.i.bf16 %v2071_v25, %v2070_v33 }
 0x60f   : > { %v2082_v9 = vpop.permute.xlu1 %2081 }
 0x610   : > { %3154 = vrot.lane.b32.xlu2 %v3153_v49, %s3239_s18 }
 0x618   : > { %2104 = vrot.lane.b32.xlu2 %v5175_v18, %s3240_s26 }
 0x61a   : > { %v3160_v42 = vpop.permute.xlu0 %3159 }
 0x61b   : > { %v3162_v51 = vunpack.i.h.bf16 %v3160_v42  ;;  %v3161_v28 = vunpack.i.l.bf16 %v3160_v42  ;;  %v2432_v42 = vld [vmem:[%s5061_s5 + $0x8] sm:$0xff] }
 0x61d   : > { %v2168_v59 = vsel %vm1912_vm12, %v3161_v28, %v3162_v51  ;;  %v2169_v15 = vsel %vm1912_vm12, %v3162_v51, %v3161_v28  ;;  %vm2076_vm12 = vcmp.lt.s32.totalorder %v4125_v29, 96  ;;  %v2434_v51 = vld [vmem:[%s5061_s5 + $0x18] sm:$0xff] }
 0x61e   : > { %v2170_v6 = vsel %vm1921_vm2, %v2168_v59, 1.0  ;;  %v2171_v0 = vsel %vm1922_vm3, %v2169_v15, 1.0  ;;  %v2083_v60 = vsel %vm2076_vm12, %v2080_v52, %v2082_v9  ;;  %v2084_v20 = vsel %vm2076_vm12, %v2082_v9, %v2080_v52 }
 0x61f   : > { %v2172_v32 = vmin.f32 %v2162_v7, %v2170_v6  ;;  %v2173_v44 = vmin.f32 %v2163_v8, %v2171_v0  ;;  %v2512_v8 = vpop.f32.mrf.mxu1  ;;  %v2085_v57 = vsub.f32 %v2083_v60, %v3902_v5  ;;  %v2086_v45 = vsub.f32 %v2084_v20, %v5175_v18 }
 0x620   : > { %v2603_v59 = vmul.f32 %v2512_v8, %v2432_v42 }
 0x621   : > { %v3173_v14 = vpack.i.bf16 %v2173_v44, %v2172_v32  ;;  %v2087_v53 = vand.u32 2147483647, %v2085_v57  ;;  %v2088_v39 = vand.u32 2147483647, %v2086_v45 }
 0x622   : > { %v3165_v63 = vpop.permute.xlu0 %3164 }
 0x623   : > { %v3167_v24 = vunpack.i.h.bf16 %v3165_v63  ;;  %v3166_v47 = vunpack.i.l.bf16 %v3165_v63  ;;  %3174 = vrot.lane.b32.xlu2 %v3173_v14, %s3236_s25  ;;  %vm2089_vm2 = vcmp.eq.f32.partialorder %v2087_v53, 2.0  ;;  %vm2090_vm3 = vcmp.eq.f32.partialorder %v2088_v39, 2.0 }
 0x625   : > { %v2138_v12 = vsel %vm2007_vm14, %v3166_v47, %v3167_v24  ;;  %v2139_v2 = vsel %vm2007_vm14, %v3167_v24, %v3166_v47  ;;  %v5186_v47 = vld [vmem:[#allocation11_spill] sm:$0xff] }
 0x626   : > { %v2140_v31 = vsel %vm2020_vm15, %v2139_v2, 1.0  ;;  %v2141_v10 = vsel %vm2021_vm4, %v2138_v12, 1.0  ;;  %v2611_v12 = vrot.slane %v5186_v47, 4  ;;  %v5187_v2 = vld [vmem:[#allocation13_spill] sm:$0xff] }
 0x627   : > { %v4904_v11 = vmin.f32 %v5184_v27, %v2140_v31  ;;  %v4907_v23 = vmin.f32 %v5185_v19, %v2141_v10  ;;  %v2515_v16 = vpop.f32.mrf.mxu1  ;;  %v2677_v31 = vrot.slane %v5187_v2, 4  ;;  %v5188_v10 = vld [vmem:[#allocation14_spill] sm:$0xff] }
 0x628   : > { %v2607_v15 = vmul.f32 %v2515_v16, %v2434_v51  ;;  %v2744_v27 = vrot.slane %v5188_v10, 4  ;;  %v2612_v16 = vadd.f32 %v2611_v12, %v5186_v47 }
 0x629   : > { %v3178_v7 = vpack.i.bf16 %v4907_v23, %v4904_v11  ;;  %v2678_v9 = vadd.f32 %v2677_v31, %v5187_v2 }
 0x62a   : > { %v2617_v0 = vadd.f32 %v2607_v15, %v2603_v59  ;;  %v2745_v60 = vadd.f32 %v2744_v27, %v5188_v10 }
 0x62b   : > { %3179 = vrot.lane.b32.xlu0 %v3178_v7, %s3237_s15  ;;  %v2679_v53 = vrot.slane %v2678_v9, 2 }
 0x62c   : > { %v2618_v14 = vrot.slane %v2617_v0, 4  ;;  %v2746_v39 = vrot.slane %v2745_v60, 2 }
 0x62e   : > { %v2619_v19 = vadd.f32 %v2618_v14, %v2617_v0 }
 0x62f   : > { %v2518_v36 = vpop.f32.mrf.mxu1 }
 0x630   : > { %v2669_v61 = vmul.f32 %v2518_v36, %v2432_v42  ;;  %v2620_v20 = vrot.slane %v2619_v19, 2  ;;  %v2613_v36 = vrot.slane %v2612_v16, 2 }
 0x637   : > { %v2521_v41 = vpop.f32.mrf.mxu1 }
 0x638   : > { %v2673_v35 = vmul.f32 %v2521_v41, %v2434_v51 }
 0x63f   : > { %v2524_v58 = vpop.f32.mrf.mxu1 }
 0x640   : > { %v2736_v6 = vmul.f32 %v2524_v58, %v2432_v42 }
 0x647   : > { %v2527_v38 = vpop.f32.mrf.mxu1 }
 0x648   : > { %v2740_v30 = vmul.f32 %v2527_v38, %v2434_v51 }
 0x66a   : > { %v3155_v48 = vpop.permute.xlu2 %3154 }
 0x66b   : > { %v3157_v46 = vunpack.i.h.bf16 %v3155_v48  ;;  %v3156_v37 = vunpack.i.l.bf16 %v3155_v48  ;;  %v2621_v48 = vadd.f32 %v2620_v20, %v2619_v19 }
 0x66d   : > { %v2077_v55 = vsel %vm2076_vm12, %v3156_v37, %v3157_v46  ;;  %v2078_v4 = vsel %vm2076_vm12, %v3157_v46, %v3156_v37  ;;  %v2622_v41 = vrot.slane %v2621_v48, 1 }
 0x66e   : > { %v2091_v3 = vsel %vm2089_vm2, %v2077_v55, 1.0  ;;  %v2092_v1 = vsel %vm2090_vm3, %v2078_v4, 1.0  ;;  %v2614_v55 = vadd.f32 %v2613_v36, %v2612_v16  ;;  %v2680_v4 = vadd.f32 %v2679_v53, %v2678_v9 }
 0x66f   : > { %v4915_v43 = vmin.f32 %v2070_v33, %v2091_v3  ;;  %v4917_v13 = vmin.f32 %v2071_v25, %v2092_v1  ;;  %v2747_v3 = vadd.f32 %v2746_v39, %v2745_v60 }
 0x671   : > { %v3168_v50 = vpack.i.bf16 %v4917_v13, %v4915_v43 }
 0x672   : > { %v4922_v49 = vpop.permute.xlu2 %2104 }
 0x673   : > { %3169 = vrot.lane.b32.xlu1 %v3168_v50, %s3240_s26 }
 0x67d   : > { %v3175_v21 = vpop.permute.xlu2 %3174 }
 0x67e   : > { %v3177_v26 = vunpack.i.h.bf16 %v3175_v21  ;;  %v3176_v52 = vunpack.i.l.bf16 %v3175_v21 }
 0x680   : > { %v2178_v40 = vsel %vm2007_vm14, %v3176_v52, %v3177_v26  ;;  %v2179_v33 = vsel %vm2007_vm14, %v3177_v26, %v3176_v52  ;;  %v2615_v52 = vrot.slane %v2614_v55, 1  ;;  %vm2099_vm14 = vcmp.lt.s32.totalorder %v4125_v29, 64 }
 0x681   : > { %v2180_v25 = vsel %vm2020_vm15, %v2179_v33, 1.0  ;;  %v2181_v22 = vsel %vm2021_vm4, %v2178_v40, 1.0 }
 0x682   : > { %v4932_v56 = vmin.f32 %v2172_v32, %v2180_v25  ;;  %v4934_v17 = vmin.f32 %v2173_v44, %v2181_v22  ;;  %v2683_v32 = vadd.f32 %v2673_v35, %v2669_v61  ;;  %v2750_v44 = vadd.f32 %v2740_v30, %v2736_v6 }
 0x683   : > { %v2681_v25 = vrot.slane %v2680_v4, 1  ;;  %v2748_v22 = vrot.slane %v2747_v3, 1  ;;  %v4967_v35 = vadd.f32 %v2615_v52, %v2614_v55 }
 0x684   : > { %v3188_v28 = vpack.i.bf16 %v4934_v17, %v4932_v56  ;;  %v2684_v63 = vrot.slane %v2683_v32, 4  ;;  %v2751_v24 = vrot.slane %v2750_v44, 4 }
 0x686   : > { %3189 = vrot.lane.b32.xlu2 %v3188_v28, %s3237_s15  ;;  %v2685_v7 = vadd.f32 %v2684_v63, %v2683_v32  ;;  %v2752_v8 = vadd.f32 %v2751_v24, %v2750_v44  ;;  %v4959_v28 = vadd.f32 %v2622_v41, %v2621_v48  ;;  %v4969_v32 = vadd.f32 %v2681_v25, %v2680_v4 }
 0x687   : > { %v4971_v44 = vadd.f32 %v2748_v22, %v2747_v3 }
 0x688   : > { %v2686_v57 = vrot.slane %v2685_v7, 2  ;;  %v2753_v45 = vrot.slane %v2752_v8, 2 }
 0x68a   : > { %v2687_v46 = vadd.f32 %v2686_v57, %v2685_v7  ;;  %v2754_v37 = vadd.f32 %v2753_v45, %v2752_v8  ;;  %v2103_v8 = vpop.permute.xlu1 %2102 }
 0x68b   : > { %v2106_v16 = vsel %vm2099_vm14, %v2103_v8, %v4922_v49  ;;  %v2107_v9 = vsel %vm2099_vm14, %v4922_v49, %v2103_v8 }
 0x68c   : > { %v2688_v21 = vrot.slane %v2687_v46, 1  ;;  %v2755_v26 = vrot.slane %v2754_v37, 1  ;;  %v2108_v60 = vsub.f32 %v2107_v9, %v3902_v5  ;;  %v2109_v20 = vsub.f32 %v2106_v16, %v5175_v18 }
 0x68e   : > { %v4963_v15 = vadd.f32 %v2688_v21, %v2687_v46  ;;  %v4965_v61 = vadd.f32 %v2755_v26, %v2754_v37  ;;  %v2110_v48 = vand.u32 2147483647, %v2108_v60  ;;  %v2111_v46 = vand.u32 2147483647, %v2109_v20 }
 0x690   : > { %vm2112_vm15 = vcmp.eq.f32.partialorder %v2110_v48, 4.0  ;;  %vm2113_vm4 = vcmp.eq.f32.partialorder %v2111_v46, 4.0 }
 0x69d   : > { %v3180_v1 = vpop.permute.xlu0 %3179 }
 0x69e   : > { %v3182_v50 = vunpack.i.h.bf16 %v3180_v1  ;;  %v3181_v58 = vunpack.i.l.bf16 %v3180_v1 }
 0x6a0   : > { %v2148_v40 = vsel %vm2030_vm10, %v3181_v58, %v3182_v50  ;;  %v2149_v33 = vsel %vm2030_vm10, %v3182_v50, %v3181_v58 }
 0x6a1   : > { %v2150_v42 = vsel %vm2043_vm13, %v2148_v40, 1.0  ;;  %v2151_v51 = vsel %vm2044_vm8, %v2149_v33, 1.0  ;;  %v2124_v40 = vsub.f32 %v2106_v16, %v3902_v5  ;;  %v2125_v33 = vsub.f32 %v2107_v9, %v5175_v18 }
 0x6a2   : > { %v2152_v38 = vmin.f32 %v4904_v11, %v2150_v42  ;;  %v2153_v59 = vmin.f32 %v4907_v23, %v2151_v51 }
 0x6a3   : > { %v2126_v25 = vand.u32 2147483647, %v2124_v40  ;;  %v2127_v22 = vand.u32 2147483647, %v2125_v33 }
 0x6a4   : > { %v2320_v6 = vrot.slane %v2153_v59, 7  ;;  %v2600_v30 = vsub.f32 1.0, %v2152_v38  ;;  %v2601_v0 = vsub.f32 1.0, %v2153_v59 }
 0x6a5   : > { %vm2128_vm9 = vcmp.eq.f32.partialorder %v2126_v25, 4.0 }
 0x6a6   : > { %v2321_v14 = vsel %vm2242_vm5, %v2152_v38, %v2320_v6  ;;  %v2659_v11 = vmul.f32 %v4959_v28, %v2601_v0  ;;  %v2726_v23 = vmul.f32 %v4963_v15, %v2601_v0  ;;  %v2793_v63 = vmul.f32 %v4965_v61, %v2601_v0 }
 0x6a7   : > { %2999 = vst.msk [vmem:[%s4094_s27 + $0x31] ss:$8 sm:$0x3] %vm4086_vm6, %v2321_v14  ;;  %v2658_v24 = vmul.f32 %v4967_v35, %v2600_v30  ;;  %v2725_v12 = vmul.f32 %v4969_v32, %v2600_v30  ;;  %v2792_v31 = vmul.f32 %v4971_v44, %v2600_v30 }
 0x6a8   : > { %v2662_v47 = vrot.slane %v2659_v11, 7  ;;  %v2729_v2 = vrot.slane %v2726_v23, 7  ;;  %v2796_v10 = vrot.slane %v2793_v63, 7 }
 0x6aa   : > { %v2663_v27 = vsel %vm2242_vm5, %v2658_v24, %v2662_v47  ;;  %v2730_v19 = vsel %vm2242_vm5, %v2725_v12, %v2729_v2  ;;  %v2797_v7 = vsel %vm2242_vm5, %v2792_v31, %v2796_v10 }
 0x6ab   : > { %3031 = vst.msk [vmem:[%s4094_s27 + $0x7] ss:$8 sm:$0x3] %vm4086_vm6, %v2663_v27 }
 0x6ac   : > { %3035 = vst.msk [vmem:[%s4094_s27 + $0x10] ss:$8 sm:$0x3] %vm4086_vm6, %v2730_v19 }
 0x6ad   : > { %3039 = vst.msk [vmem:[%s4094_s27 + $0x11] ss:$8 sm:$0x3] %vm4086_vm6, %v2797_v7 }
 0x6e0   : > { %v3190_v57 = vpop.permute.xlu2 %3189 }
 0x6e1   : > { %v3192_v45 = vunpack.i.h.bf16 %v3190_v57  ;;  %v3191_v36 = vunpack.i.l.bf16 %v3190_v57 }
 0x6e3   : > { %v2188_v53 = vsel %vm2030_vm10, %v3191_v36, %v3192_v45  ;;  %v2189_v39 = vsel %vm2030_vm10, %v3192_v45, %v3191_v36  ;;  %vm2129_vm10 = vcmp.eq.f32.partialorder %v2127_v22, 4.0 }
 0x6e4   : > { %v2190_v37 = vsel %vm2043_vm13, %v2188_v53, 1.0  ;;  %v2191_v49 = vsel %vm2044_vm8, %v2189_v39, 1.0 }
 0x6e5   : > { %v2193_v55 = vmin.f32 %v4934_v17, %v2191_v49  ;;  %v3170_v4 = vpop.permute.xlu1 %3169  ;;  %v2192_v41 = vmin.f32 %v4932_v56, %v2190_v37 }
 0x6e6   : > { %v3172_v3 = vunpack.i.h.bf16 %v3170_v4  ;;  %v3171_v1 = vunpack.i.l.bf16 %v3170_v4 }
 0x6e7   : > { %v2328_v50 = vrot.slane %v2193_v55, 7 }
 0x6e8   : > { %v2100_v58 = vsel %vm2099_vm14, %v3171_v1, %v3172_v3  ;;  %v2101_v34 = vsel %vm2099_vm14, %v3172_v3, %v3171_v1 }
 0x6e9   : > { %v2329_v21 = vsel %vm2242_vm5, %v2192_v41, %v2328_v50  ;;  %v2114_v62 = vsel %vm2112_vm15, %v2101_v34, 1.0  ;;  %v2115_v26 = vsel %vm2113_vm4, %v2100_v58, 1.0 }
 0x6ea   : > { %3000 = vst.msk [vmem:[%s4094_s27 + $0x32] ss:$8 sm:$0x3] %vm4086_vm6, %v2329_v21  ;;  %v2116_v17 = vmin.f32 %v4915_v43, %v2114_v62  ;;  %v2117_v56 = vmin.f32 %v4917_v13, %v2115_v26 }
 0x6ec   : > { %v3183_v52 = vpack.i.bf16 %v2117_v56, %v2116_v17 }
 0x6ee   : > { %3184 = vrot.lane.b32.xlu1 %v3183_v52, %s3240_s26 }
 0x760   : > { %v3185_v42 = vpop.permute.xlu1 %3184 }
 0x761   : > { %v3187_v51 = vunpack.i.h.bf16 %v3185_v42  ;;  %v3186_v38 = vunpack.i.l.bf16 %v3185_v42 }
 0x763   : > { %v2122_v43 = vsel %vm2099_vm14, %v3186_v38, %v3187_v51  ;;  %v2123_v13 = vsel %vm2099_vm14, %v3187_v51, %v3186_v38 }
 0x764   : > { %v2130_v59 = vsel %vm2128_vm9, %v2122_v43, 1.0  ;;  %v2131_v6 = vsel %vm2129_vm10, %v2123_v13, 1.0 }
 0x765   : > { %v2132_v5 = vmin.f32 %v2116_v17, %v2130_v59  ;;  %v2133_v30 = vmin.f32 %v2117_v56, %v2131_v6 }
 0x767   : > { %v2241_v18 = vrot.slane %v2133_v30, 7  ;;  %v2649_v0 = vmul.f32 %v4959_v28, %v2133_v30  ;;  %v2716_v14 = vmul.f32 %v4963_v15, %v2133_v30  ;;  %v2783_v11 = vmul.f32 %v4965_v61, %v2133_v30 }
 0x768   : > { %v2648_v63 = vmul.f32 %v4967_v35, %v2132_v5  ;;  %v2715_v24 = vmul.f32 %v4969_v32, %v2132_v5  ;;  %v2782_v12 = vmul.f32 %v4971_v44, %v2132_v5 }
 0x769   : > { %v2243_v23 = vsel %vm2242_vm5, %v2132_v5, %v2241_v18  ;;  %v2652_v29 = vrot.slane %v2649_v0, 7  ;;  %v2719_v47 = vrot.slane %v2716_v14, 7  ;;  %v2786_v2 = vrot.slane %v2783_v11, 7 }
 0x76a   : > { %2986 = vst.msk [vmem:[%s4094_s27 + $0x6] ss:$8 sm:$0x3] %vm4086_vm6, %v2243_v23 }
 0x76b   : > { %v2653_v28 = vsel %vm2242_vm5, %v2648_v63, %v2652_v29  ;;  %v2720_v15 = vsel %vm2242_vm5, %v2715_v24, %v2719_v47  ;;  %v2787_v61 = vsel %vm2242_vm5, %v2782_v12, %v2786_v2 }
 0x76c   : > { %3030 = vst.msk [vmem:[%s4094_s27 + $0x3] ss:$8 sm:$0x3] %vm4086_vm6, %v2653_v28 }
 0x76d   : > { %3034 = vst.msk [vmem:[%s4094_s27 + $0x4] ss:$8 sm:$0x3] %vm4086_vm6, %v2720_v15 }
 0x76e   : > { %3038 = vst.msk [vmem:[%s4094_s27 + $0x5] ss:$8 sm:$0x3] %vm4086_vm6, %v2787_v61 }
 0x76f PF: > { %s21_s13 = sadd.s32 1, %s3225_s13  }
 0x770   : > { %p18_p4 = scmp.ge.s32.totalorder %s21_s13, 4  }
 0x772   :  { %20 = sbr.rel (!%p18_p4) target bundleno = 1 (0x1), region = 165 }

</bundles_post_ra>
